<compile_context>
chip_gen: v7x
topology: tpu7x:2x2x1
jax: 0.10.0
libtpu: 0.0.40
codegen_flags: <defaults>
</compile_context>

<pallas_src>
import jax
import jax.numpy as jnp
from jax.experimental import pallas as pl
from jax.experimental.pallas import tpu as pltpu

# ---------------- configuration (small, consistent with the module) -------------
B, H, W = 2, 4, 4          # image feature map (batch, spatial)
C_IMG = 1024               # image feature channels (Adapter_nc(1024, 4))
RED = 4                    # adapter reduction
N_CLS = 4                  # number of class names
N_CTX = 8                  # number of learnable context tokens
CTX_DIM = 128              # CLIP text transformer width (ln_final.weight.shape[0])
N_HEADS = 2
N_LAYERS = 2               # small synthetic CLIP text transformer
SEQ_LEN = 16               # 1 prefix + 8 ctx + 7 suffix tokens
EMB_DIM = 1024             # joint embedding dim (text_projection output == image dim)


# ------------------------------ Pallas kernel ------------------------------------
def _adapter_logits_kernel(x_ref, w1_ref, w2_ref, txt_ref, o_ref):
    # Fused, channels-on-contraction:
    #   x  : (1024, tm) bf16   (columns = spatial positions of one batch element)
    #   w1 : (256, 1024) bf16  (PyTorch fc1.weight layout, out x in)
    #   w2 : (1024, 256) bf16  (PyTorch fc2.weight layout)
    #   txt: (n_cls, 1024) bf16, already L2-normalized and scaled by exp(logit_scale)
    # Adapter MLP + 0.5/0.5 residual + per-column L2-norm + scaled logits.
    xb = x_ref[...]                                           # (1024, tm) bf16
    h = jnp.dot(w1_ref[...], xb, preferred_element_type=jnp.float32)     # (256, tm)
    h = jnp.maximum(h, 0.0)
    y = jnp.dot(w2_ref[...], h.astype(jnp.bfloat16),
                preferred_element_type=jnp.float32)                       # (1024, tm)
    y = jnp.maximum(y, 0.0)
    f = 0.5 * y + 0.5 * xb.astype(jnp.float32)                # ratio = 0.5 (module)
    # rsqrt -> EUP slot; no eps, matching the PyTorch norm (see review note).
    f = f * jax.lax.rsqrt(jnp.sum(f * f, axis=0, keepdims=True))
    # (n_cls, 1024) @ (1024, tm): lane-dense (n_cls, tm) output, no operand transpose.
    o_ref[...] = jnp.dot(txt_ref[...], f.astype(jnp.bfloat16),
                         preferred_element_type=jnp.float32)


def _hw_tile_cap():
    # Generation-aware cap for the spatial (lane) tile, per perf review:
    #   v5e: 256 (16 MiB default scoped VMEM), v7x: 512 (64 MiB physical VMEM),
    #   v6e: 1024 with an explicitly raised vmem_limit.  Fallback is the safe 256.
    try:
        kind = jax.devices()[0].device_kind.lower()
    except Exception:
        return 256, None
    if "v6" in kind or "trillium" in kind:
        return 1024, 64 * 1024 * 1024
    if "v7" in kind or "7x" in kind:
        return 512, None
    if "v5" in kind:
        return 256, None
    return 256, None


def adapter_logits(x3, w1, w2, text_scaled):
    # x3: (B, 1024, HW) activations (NCHW reshaped, no transpose)
    # w1: (256, 1024), w2: (1024, 256)  -- PyTorch Linear weight layout
    # text_scaled: (n_cls, 1024) already normalized * exp(logit_scale)
    bsz, c, hw = x3.shape
    n_cls = text_scaled.shape[0]
    cap, vmem_limit = _hw_tile_cap()

    if hw <= cap:
        tm, hw_pad = hw, hw                   # single full block (toy sizes)
    else:
        tm = cap                              # multiple of 128 -> lane-aligned tiles
        hw_pad = pl.cdiv(hw, tm) * tm

    xb = x3.astype(jnp.bfloat16)              # bf16 activation DMA (half the bytes)
    if hw_pad != hw:
        # Padded columns produce NaN logits (0/0 norm) but are sliced off below;
        # matmul columns are independent so nothing propagates into valid output.
        xb = jnp.pad(xb, ((0, 0), (0, 0), (0, hw_pad - hw)))

    grid = (bsz, hw_pad // tm)
    cols = bsz * hw_pad
    cost = pl.CostEstimate(
        flops=int(cols * (4 * c * (c // RED) + 2 * n_cls * c)),
        transcendentals=int(cols),
        bytes_accessed=int(cols * c * 2 + cols * n_cls * 4
                           + 2 * (c * (c // RED)) * 2 + n_cls * c * 2))

    out = pl.pallas_call(
        _adapter_logits_kernel,
        out_shape=jax.ShapeDtypeStruct((bsz, n_cls, hw_pad), jnp.float32),
        grid_spec=pltpu.PrefetchScalarGridSpec(
            num_scalar_prefetch=0,
            grid=grid,
            in_specs=[
                # activation column tile; leading batch dim squeezed away
                pl.BlockSpec((None, c, tm), lambda b, j: (b, 0, j)),
                # pinned weights / text (constant index_map)
                # TODO(synk): single-buffer (pl.Buffered(1)) the pinned operands on
                # v7x to reclaim ~1 MiB of dead double-buffer; skipped for safety.
                pl.BlockSpec((c // RED, c), lambda b, j: (0, 0)),
                pl.BlockSpec((c, c // RED), lambda b, j: (0, 0)),
                pl.BlockSpec((n_cls, c), lambda b, j: (0, 0)),
            ],
            out_specs=pl.BlockSpec((None, n_cls, tm), lambda b, j: (b, 0, j)),
        ),
        compiler_params=pltpu.CompilerParams(
            dimension_semantics=("parallel", "parallel"),
            vmem_limit_bytes=vmem_limit),
        cost_estimate=cost,
    )(xb,
      w1.astype(jnp.bfloat16),
      w2.astype(jnp.bfloat16),
      text_scaled.astype(jnp.bfloat16))

    if hw_pad != hw:
        out = out[:, :, :hw]
    return out                                # (B, n_cls, HW) f32


# ------------------------------ plain-JAX glue -----------------------------------
def layer_norm(x, g, b, eps=1e-5):
    mu = jnp.mean(x, axis=-1, keepdims=True)
    var = jnp.mean((x - mu) ** 2, axis=-1, keepdims=True)
    return (x - mu) / jnp.sqrt(var + eps) * g + b


def lstm_layer_dir(x_seq, W_ih, W_hh, b_ih, b_hh, reverse):
    # single-direction LSTM over an unbatched sequence (seq, in) -> (seq, hidden)
    Hh = W_hh.shape[1]

    def step(carry, xt):
        h, c = carry
        gates = xt @ W_ih.T + b_ih + h @ W_hh.T + b_hh
        i, f, g, o = jnp.split(gates, 4)
        c = jax.nn.sigmoid(f) * c + jax.nn.sigmoid(i) * jnp.tanh(g)
        h = jax.nn.sigmoid(o) * jnp.tanh(c)
        return (h, c), h

    init = (jnp.zeros((Hh,), jnp.float32), jnp.zeros((Hh,), jnp.float32))
    _, ys = jax.lax.scan(step, init, x_seq, reverse=reverse)
    return ys


def lstm2_bidir(x, lstm_params):
    # PromptEncoder 'LSTM2': 2-layer bidirectional LSTM, hidden = ctx_dim // 2.
    # TODO(synk): tiny sequential bidirectional LSTM (seq=8, hidden=64) kept in
    # plain JAX (lax.scan); no clean Pallas win.  Inter-layer dropout (p=0.05)
    # is eval-mode identity and omitted.
    out = x
    for layer in lstm_params:
        yf = lstm_layer_dir(out, *layer['fwd'], reverse=False)
        yb = lstm_layer_dir(out, *layer['bwd'], reverse=True)
        out = jnp.concatenate([yf, yb], axis=-1)
    return out


def residual_attn_block(x, p):
    # CLIP ResidualAttentionBlock with causal mask and QuickGELU.
    # TODO(synk): these (64x128)-class matmuls are left to XLA (launch-bound in
    # Pallas per the perf review); XLA fuses bias/GELU/LN around them.
    n_cls, L, D = x.shape
    hd = D // N_HEADS

    xa = layer_norm(x, p['ln1_g'], p['ln1_b'])
    qkv = xa @ p['attn_in_w'] + p['attn_in_b']                   # (n_cls, L, 3D)
    q, k, v = jnp.split(qkv, 3, axis=-1)

    def split_heads(t):
        return t.reshape(n_cls, L, N_HEADS, hd).transpose(0, 2, 1, 3)

    q, k, v = split_heads(q), split_heads(k), split_heads(v)
    scores = jnp.einsum('bhqd,bhkd->bhqk', q, k) / jnp.sqrt(jnp.float32(hd))
    mask = jnp.triu(jnp.full((L, L), float('-inf'), jnp.float32), k=1)
    attn = jax.nn.softmax(scores + mask, axis=-1)
    av = jnp.einsum('bhqk,bhkd->bhqd', attn, v).transpose(0, 2, 1, 3).reshape(n_cls, L, D)
    x = x + (av @ p['attn_out_w'] + p['attn_out_b'])

    xm = layer_norm(x, p['ln2_g'], p['ln2_b'])
    h1 = xm @ p['mlp_fc_w'] + p['mlp_fc_b']
    h1 = h1 * jax.nn.sigmoid(1.702 * h1)                         # QuickGELU
    x = x + (h1 @ p['mlp_proj_w'] + p['mlp_proj_b'])
    return x


# ------------------------------ forward pass -------------------------------------
def custom_clip_nc_forward(image_features, params):
    # image_features: NCHW (B, 1024, H, W)
    b, c, h, w = image_features.shape
    # Free reshape (no NCHW->NHWC transpose): columns are spatial positions.
    x3 = image_features.reshape(b, c, h * w)

    # --- PromptLearner ---
    ctx = params['ctx']                                       # (n_ctx, ctx_dim)
    ctx_enc = lstm2_bidir(ctx, params['lstm']) + ctx          # residual PromptEncoder
    ctx_b = jnp.broadcast_to(ctx_enc[None], (N_CLS, N_CTX, CTX_DIM))
    prompts = jnp.concatenate(
        [params['token_prefix'], ctx_b, params['token_suffix']], axis=1)  # (n_cls, L, D)

    # --- TextEncoder (plain JAX; tiny matmuls handled by XLA) ---
    x = prompts + params['pos_emb'][None]
    for lp in params['layers']:
        x = residual_attn_block(x, lp)
    x = layer_norm(x, params['ln_final_g'], params['ln_final_b'])
    eot = jnp.argmax(params['tokenized_prompts'], axis=-1)    # (n_cls,)
    x_eot = x[jnp.arange(N_CLS), eot]                         # (n_cls, D)
    text_feat = x_eot @ params['text_projection']             # (n_cls, 1024)

    # Hoisted out of the kernel: text L2-norm + exp(logit_scale) (pinned operand,
    # would otherwise be redone every grid step).
    t = text_feat * jax.lax.rsqrt(jnp.sum(text_feat * text_feat, axis=-1, keepdims=True))
    t_scaled = jnp.exp(params['logit_scale']) * t             # (n_cls, 1024)

    # --- fused Adapter_nc + residual mix + image L2-norm + scaled logits (Pallas) ---
    logits3 = adapter_logits(x3, params['adapter_w1'], params['adapter_w2'],
                             t_scaled)                        # (B, n_cls, H*W)
    return logits3.reshape(b, N_CLS, h, w)                    # (B, n_cls, H, W)


# ------------------------------ parameter init ------------------------------------
def init_params(key):
    keys = iter(jax.random.split(key, 64))

    def nrm(shape, std=0.02):
        return jax.random.normal(next(keys), shape, jnp.float32) * std

    p = {}
    # PyTorch nn.Linear weight layout (out_features, in_features), bias=False.
    p['adapter_w1'] = nrm((C_IMG // RED, C_IMG))
    p['adapter_w2'] = nrm((C_IMG, C_IMG // RED))
    p['ctx'] = nrm((N_CTX, CTX_DIM))

    Hh = CTX_DIM // 2
    lstm = []
    for _ in range(2):                       # 2 layers; layer-1 input = 2*Hh = CTX_DIM
        layer_p = {}
        for d in ('fwd', 'bwd'):
            layer_p[d] = (nrm((4 * Hh, CTX_DIM)), nrm((4 * Hh, Hh)),
                          jnp.zeros((4 * Hh,), jnp.float32),
                          jnp.zeros((4 * Hh,), jnp.float32))
        lstm.append(layer_p)
    p['lstm'] = lstm

    n_suffix = SEQ_LEN - 1 - N_CTX
    p['token_prefix'] = nrm((N_CLS, 1, CTX_DIM))
    p['token_suffix'] = nrm((N_CLS, n_suffix, CTX_DIM))
    p['pos_emb'] = nrm((SEQ_LEN, CTX_DIM))

    layers = []
    for _ in range(N_LAYERS):
        D = CTX_DIM
        layers.append(dict(
            ln1_g=jnp.ones((D,), jnp.float32), ln1_b=jnp.zeros((D,), jnp.float32),
            attn_in_w=nrm((D, 3 * D)), attn_in_b=jnp.zeros((3 * D,), jnp.float32),
            attn_out_w=nrm((D, D)), attn_out_b=jnp.zeros((D,), jnp.float32),
            ln2_g=jnp.ones((D,), jnp.float32), ln2_b=jnp.zeros((D,), jnp.float32),
            mlp_fc_w=nrm((D, 4 * D)), mlp_fc_b=jnp.zeros((4 * D,), jnp.float32),
            mlp_proj_w=nrm((4 * D, D)), mlp_proj_b=jnp.zeros((D,), jnp.float32),
        ))
    p['layers'] = layers
    p['ln_final_g'] = jnp.ones((CTX_DIM,), jnp.float32)
    p['ln_final_b'] = jnp.zeros((CTX_DIM,), jnp.float32)
    p['text_projection'] = nrm((CTX_DIM, EMB_DIM))
    p['logit_scale'] = jnp.array(jnp.log(1.0 / 0.07), jnp.float32)   # CLIP init

    # synthetic tokenized prompts: EOT (largest token id) at 1 + n_ctx + name_len + 1
    name_lens = [1, 2, 3, 2][:N_CLS]
    tok = jax.random.randint(next(keys), (N_CLS, SEQ_LEN), 1, 1000, dtype=jnp.int32)
    eot_pos = jnp.array([1 + N_CTX + nl + 1 for nl in name_lens], jnp.int32)
    tok = tok.at[jnp.arange(N_CLS), eot_pos].set(49407)
    p['tokenized_prompts'] = tok
    return p


# ------------------------------------ main ----------------------------------------
if __name__ == "__main__":
    key = jax.random.PRNGKey(0)
    k_param, k_input = jax.random.split(key)
    params = init_params(k_param)

    # NCHW input, like the PyTorch module's `image_features`
    image_features = jax.random.normal(k_input, (B, C_IMG, H, W), jnp.float32)

    fwd = jax.jit(custom_clip_nc_forward)
    out = fwd(image_features, params)
    out = jax.block_until_ready(out)

    assert out.shape == (B, N_CLS, H, W), out.shape
    assert out.dtype == jnp.float32
    assert bool(jnp.all(jnp.isfinite(out)))
    print("KERNEL_OK")
</pallas_src>

<mosaic_0001>
module attributes {stable_mosaic.version = 11 : i64} {
  func.func @_adapter_logits_kernel(%arg0: i32, %arg1: i32, %arg2: memref<1x1024x16xbf16, #tpu.memory_space<vmem>>, %arg3: memref<256x1024xbf16, #tpu.memory_space<vmem>>, %arg4: memref<1024x256xbf16, #tpu.memory_space<vmem>>, %arg5: memref<4x1024xbf16, #tpu.memory_space<vmem>>, %arg6: memref<1x4x16xf32, #tpu.memory_space<vmem>>) attributes {dimension_semantics = [#tpu.dimension_semantics<parallel>, #tpu.dimension_semantics<parallel>], iteration_bounds = array<i64: 2, 1>, scalar_prefetch = 0 : i64, scratch_operands = 0 : i64, tpu.core_type = #tpu.core_type<tc>, window_params = [{transform_indices = @transform_0, window_bounds = array<i64: 1, 1024, 16>}, {pipeline_mode = #tpu.pipeline_mode<synchronous>, transform_indices = @transform_1, window_bounds = array<i64: 256, 1024>}, {pipeline_mode = #tpu.pipeline_mode<synchronous>, transform_indices = @transform_2, window_bounds = array<i64: 1024, 256>}, {pipeline_mode = #tpu.pipeline_mode<synchronous>, transform_indices = @transform_3, window_bounds = array<i64: 4, 1024>}, {transform_indices = @transform_4, window_bounds = array<i64: 1, 4, 16>}]} {
    %c0 = arith.constant 0 : index
    %c0_0 = arith.constant 0 : index
    %c0_1 = arith.constant 0 : index
    %0 = vector.load %arg2[%c0, %c0_0, %c0_1] : memref<1x1024x16xbf16, #tpu.memory_space<vmem>>, vector<1x1024x16xbf16>
    %1 = vector.shape_cast %0 : vector<1x1024x16xbf16> to vector<1024x16xbf16>
    %c0_2 = arith.constant 0 : index
    %c0_3 = arith.constant 0 : index
    %2 = vector.load %arg3[%c0_2, %c0_3] : memref<256x1024xbf16, #tpu.memory_space<vmem>>, vector<256x1024xbf16>
    %cst = arith.constant dense<0.000000e+00> : vector<256x16xf32>
    %3 = tpu.matmul %2, %1, %cst {dimension_numbers = #tpu.dot_dimension_numbers<[1], [0], [0], [1], [0, 0, 1, 1], [], []>} : vector<256x1024xbf16>, vector<1024x16xbf16>, vector<256x16xf32> -> vector<256x16xf32>
    %cst_4 = arith.constant 0.000000e+00 : f32
    %4 = vector.broadcast %cst_4 : f32 to vector<256x16xf32>
    %5 = arith.maximumf %3, %4 : vector<256x16xf32>
    %c0_5 = arith.constant 0 : index
    %c0_6 = arith.constant 0 : index
    %6 = vector.load %arg4[%c0_5, %c0_6] : memref<1024x256xbf16, #tpu.memory_space<vmem>>, vector<1024x256xbf16>
    %7 = arith.truncf %5 : vector<256x16xf32> to vector<256x16xbf16>
    %cst_7 = arith.constant dense<0.000000e+00> : vector<1024x16xf32>
    %8 = tpu.matmul %6, %7, %cst_7 {dimension_numbers = #tpu.dot_dimension_numbers<[1], [0], [0], [1], [0, 0, 1, 1], [], []>} : vector<1024x256xbf16>, vector<256x16xbf16>, vector<1024x16xf32> -> vector<1024x16xf32>
    %cst_8 = arith.constant 0.000000e+00 : f32
    %9 = vector.broadcast %cst_8 : f32 to vector<1024x16xf32>
    %10 = arith.maximumf %8, %9 : vector<1024x16xf32>
    %cst_9 = arith.constant 5.000000e-01 : f32
    %11 = vector.broadcast %cst_9 : f32 to vector<1024x16xf32>
    %12 = arith.mulf %11, %10 : vector<1024x16xf32>
    %13 = arith.extf %1 : vector<1024x16xbf16> to vector<1024x16xf32>
    %cst_10 = arith.constant 5.000000e-01 : f32
    %14 = vector.broadcast %cst_10 : f32 to vector<1024x16xf32>
    %15 = arith.mulf %14, %13 : vector<1024x16xf32>
    %16 = arith.addf %12, %15 : vector<1024x16xf32>
    %17 = arith.mulf %16, %16 : vector<1024x16xf32>
    %cst_11 = arith.constant dense<0.000000e+00> : vector<16xf32>
    %18 = vector.multi_reduction <add>, %17, %cst_11 [0] : vector<1024x16xf32> to vector<16xf32>
    %19 = vector.shape_cast %18 : vector<16xf32> to vector<1x16xf32>
    %20 = math.rsqrt %19 : vector<1x16xf32>
    %21 = vector.broadcast %20 : vector<1x16xf32> to vector<1024x16xf32>
    %22 = arith.mulf %16, %21 : vector<1024x16xf32>
    %c0_12 = arith.constant 0 : index
    %c0_13 = arith.constant 0 : index
    %23 = vector.load %arg5[%c0_12, %c0_13] : memref<4x1024xbf16, #tpu.memory_space<vmem>>, vector<4x1024xbf16>
    %24 = arith.truncf %22 : vector<1024x16xf32> to vector<1024x16xbf16>
    %cst_14 = arith.constant dense<0.000000e+00> : vector<4x16xf32>
    %25 = tpu.matmul %23, %24, %cst_14 {dimension_numbers = #tpu.dot_dimension_numbers<[1], [0], [0], [1], [0, 0, 1, 1], [], []>} : vector<4x1024xbf16>, vector<1024x16xbf16>, vector<4x16xf32> -> vector<4x16xf32>
    %c0_15 = arith.constant 0 : index
    %c0_16 = arith.constant 0 : index
    %c0_17 = arith.constant 0 : index
    %26 = vector.load %arg6[%c0_15, %c0_16, %c0_17] : memref<1x4x16xf32, #tpu.memory_space<vmem>>, vector<1x4x16xf32>
    %27 = vector.shape_cast %26 : vector<1x4x16xf32> to vector<4x16xf32>
    %28 = vector.shape_cast %25 : vector<4x16xf32> to vector<1x4x16xf32>
    tpu.vector_store %arg6[%c0_15, %c0_16, %c0_17], %28 {strides = array<i32>} : memref<1x4x16xf32, #tpu.memory_space<vmem>>, vector<1x4x16xf32>,
    return
  }
  func.func @transform_0(%arg0: i32, %arg1: i32) -> (i32, i32, i32) {
    %c0_i32 = arith.constant 0 : i32
    %c0_i32_0 = arith.constant 0 : i32
    return %arg0, %c0_i32, %arg1 : i32, i32, i32
  }
  func.func @transform_1(%arg0: i32, %arg1: i32) -> (i32, i32) {
    %c0_i32 = arith.constant 0 : i32
    %c0_i32_0 = arith.constant 0 : i32
    %c0_i32_1 = arith.constant 0 : i32
    return %c0_i32, %c0_i32_0 : i32, i32
  }
  func.func @transform_2(%arg0: i32, %arg1: i32) -> (i32, i32) {
    %c0_i32 = arith.constant 0 : i32
    %c0_i32_0 = arith.constant 0 : i32
    %c0_i32_1 = arith.constant 0 : i32
    return %c0_i32, %c0_i32_0 : i32, i32
  }
  func.func @transform_3(%arg0: i32, %arg1: i32) -> (i32, i32) {
    %c0_i32 = arith.constant 0 : i32
    %c0_i32_0 = arith.constant 0 : i32
    %c0_i32_1 = arith.constant 0 : i32
    return %c0_i32, %c0_i32_0 : i32, i32
  }
  func.func @transform_4(%arg0: i32, %arg1: i32) -> (i32, i32, i32) {
    %c0_i32 = arith.constant 0 : i32
    %c0_i32_0 = arith.constant 0 : i32
    return %arg0, %c0_i32, %arg1 : i32, i32, i32
  }
}

</mosaic_0001>

<bundles_post_ra>
// kernel: custom-call.9
= control target key start
LH: loop header
LB: loop body
LE: loop exit
PB: predicated region body
PF: predicated region fallthrough
CT: control target
= control target key end

     0   :  { %s6_s0 = inlined_call_operand.vmem [shape: f32[64], index: 0, kind: output, shape index: {}]  }

// kernel: custom_clip_nc_forward.1
= control target key start
LH: loop header
LB: loop body
LE: loop exit
PB: predicated region body
PF: predicated region fallthrough
CT: control target
= control target key end

     0   :  { %s6385_s15 = smov 0   ;;  %s6387_s16 = smov 0   ;;  %s8695_s0 = inlined_call_operand.vmem [shape: bf16[2,1024,16], index: 0, kind: input, shape index: {}]   ;;  %s8696_s1 = inlined_call_operand.vmem [shape: bf16[256,1024], index: 1, kind: input, shape index: {}]   ;;  %s8697_s2 = inlined_call_operand.vmem [shape: bf16[1024,256], index: 2, kind: input, shape index: {}]   ;;  %s8698_s3 = inlined_call_operand.vmem [shape: bf16[4,1024], index: 3, kind: input, shape index: {}]   ;;  %s8699_s4 = inlined_call_operand.vmem [shape: f32[2,4,16], index: 4, kind: output, shape index: {}]  }
   0x1   :  { %s6389_s17 = smov 0  }
   0x2 LB: > { %s26_s18 = sadd.s32 1, %s6352_s16  ;;  %p5025_p0 = scmp.ge.s32.totalorder %s6356_s17, 1  ;;  %s6356_s17 = sphi %s6389_s17, %s14_s17   ;;  %s6352_s16 = sphi %s6387_s16, %s8995_s16   ;;  %s6348_s15 = sphi %s6385_s15, %s8994_s15  }
   0x3   : > { %p28_p1 = scmp.ge.s32.totalorder %s26_s18, 2  ;;  %p181_p2 = scmp.lt.s32.totalorder %s6356_s17, 3 }
   0x5   : > { %s8997_s18 = smov (%p28_p1, %s26_s18), 0  ;;  %p182_p3 = pnand %p5025_p0, %p181_p2 }
   0x7   : > { %185 = sbr.rel (%p182_p3) target bundleno = 1531 (0x5fb), region = 36 }
   0xe   : > { %p212_p4 = scmp.lt.s32.totalorder %s6348_s15, 1  ;;  %v6406_v0 = vld [vmem:[%s8696_s1] sm:$0xff]  ;;  %v6416_v2 = vld [vmem:[%s8696_s1 + $0x8] sm:$0xff]  ;;  %vm4281_vm0 = vcmask 130048   ;;  %vm4942_vm1 = vcmask 125952  }
   0xf   : > { %v6411_v1 = vld [vmem:[%s8696_s1 + $0x20] sm:$0xff]  ;;  %v6423_v4 = vld [vmem:[%s8696_s1 + $0x28] sm:$0xff] }
  0x10   : > { %v5030_v3 = vcombine.high %v6406_v0, %v6411_v1  ;;  %s8999_s15 = smov (!%p212_p4, %s6348_s15), 1  ;;  %v5032_v5 = vcombine.high %v6416_v2, %v6423_v4  ;;  %v364_v40 = vld [vmem:[%s8696_s1 + $0x40] sm:$0xff]  ;;  %v365_v42 = vld [vmem:[%s8696_s1 + $0x48] sm:$0xff]  ;;  %v5029_v45 = vcombine.low %v6406_v0, %v6411_v1  ;;  %v5031_v48 = vcombine.low %v6416_v2, %v6423_v4 }
  0x11   : > { %s5351_s27 = sshll.u32 %s8999_s15, 9  ;;  %v368_v41 = vld [vmem:[%s8696_s1 + $0x60] sm:$0xff]  ;;  %v369_v43 = vld [vmem:[%s8696_s1 + $0x68] sm:$0xff]  ;;  %s5028_s8 = sshll.u32 %s8999_s15, 2 }
  0x12   : > { %1540 = vmatprep.mubr.bf16.mxu0 %v5030_v3  ;;  %1701 = vmatprep.mubr.bf16.mxu1 %v5032_v5  ;;  %s6433_s30 = scalar_lea.vmem %s8695_s0, %s5351_s27  ;;  %v5038_v49 = vcombine.high %v364_v40, %v368_v41  ;;  %v5040_v51 = vcombine.high %v365_v42, %v369_v43  ;;  %v372_v55 = vld [vmem:[%s8696_s1 + $0x80] sm:$0xff]  ;;  %v373_v58 = vld [vmem:[%s8696_s1 + $0x88] sm:$0xff]  ;;  %v5037_v63 = vcombine.low %v364_v40, %v368_v41  ;;  %s226_s11 = scalar_lea.vmem %s8699_s4, %s5028_s8 }
  0x13   : > { %v244_v6 = vld [vmem:[%s6433_s30 + $0x40] sm:$0xff]   ;;  %v246_v10 = vld [vmem:[%s6433_s30 + $0x48] sm:$0xff]   ;;  %v248_v14 = vld [vmem:[%s6433_s30 + $0x50] sm:$0xff]   ;;  %v5039_v1 = vcombine.low %v365_v42, %v369_v43 }
  0x14   : > { %v276_v7 = vld [vmem:[%s6433_s30 + $0xc0] sm:$0xff]   ;;  %v278_v11 = vld [vmem:[%s6433_s30 + $0xc8] sm:$0xff]   ;;  %5352 = vmatprep.subr.bf16.mxu0 %v244_v6  ;;  %v280_v15 = vld [vmem:[%s6433_s30 + $0xd0] sm:$0xff]  }
  0x15   : > { %v228_v8 = vld [vmem:[%s6433_s30] sm:$0xff]   ;;  %5464 = vmatprep.subr.bf16.mxu1 %v276_v7  ;;  %v230_v12 = vld [vmem:[%s6433_s30 + $0x8] sm:$0xff]   ;;  %v232_v16 = vld [vmem:[%s6433_s30 + $0x10] sm:$0xff]  }
  0x16   : > { %v260_v9 = vld [vmem:[%s6433_s30 + $0x80] sm:$0xff]   ;;  %v262_v13 = vld [vmem:[%s6433_s30 + $0x88] sm:$0xff]   ;;  %5353 = vmatpush3.bf16.msra.mxu0 %v228_v8  ;;  %v264_v17 = vld [vmem:[%s6433_s30 + $0x90] sm:$0xff]  }
  0x17   : > { %5465 = vmatpush3.bf16.msra.mxu1 %v260_v9  ;;  %v250_v18 = vld [vmem:[%s6433_s30 + $0x58] sm:$0xff]   ;;  %5354 = vmatprep.subr.bf16.mxu0 %v246_v10  ;;  %v252_v22 = vld [vmem:[%s6433_s30 + $0x60] sm:$0xff]   ;;  %v254_v26 = vld [vmem:[%s6433_s30 + $0x68] sm:$0xff]  }
  0x18   : > { %5466 = vmatprep.subr.bf16.mxu1 %v278_v11  ;;  %v282_v19 = vld [vmem:[%s6433_s30 + $0xd8] sm:$0xff]   ;;  %v284_v23 = vld [vmem:[%s6433_s30 + $0xe0] sm:$0xff]   ;;  %v286_v27 = vld [vmem:[%s6433_s30 + $0xe8] sm:$0xff]  }
  0x19   : > { %v234_v20 = vld [vmem:[%s6433_s30 + $0x18] sm:$0xff]   ;;  %v236_v24 = vld [vmem:[%s6433_s30 + $0x20] sm:$0xff]   ;;  %v238_v28 = vld [vmem:[%s6433_s30 + $0x28] sm:$0xff]  }
  0x1a   : > { %5355 = vmatpush3.bf16.msra.mxu0 %v230_v12  ;;  %v266_v21 = vld [vmem:[%s6433_s30 + $0x98] sm:$0xff]   ;;  %v268_v25 = vld [vmem:[%s6433_s30 + $0xa0] sm:$0xff]   ;;  %v270_v29 = vld [vmem:[%s6433_s30 + $0xa8] sm:$0xff]  }
  0x1b   : > { %5467 = vmatpush3.bf16.msra.mxu1 %v262_v13  ;;  %5356 = vmatprep.subr.bf16.mxu0 %v248_v14  ;;  %v256_v30 = vld [vmem:[%s6433_s30 + $0x70] sm:$0xff]   ;;  %v258_v34 = vld [vmem:[%s6433_s30 + $0x78] sm:$0xff]   ;;  %v308_v38 = vld [vmem:[%s6433_s30 + $0x140] sm:$0xff]  }
  0x1c   : > { %5468 = vmatprep.subr.bf16.mxu1 %v280_v15  ;;  %v288_v31 = vld [vmem:[%s6433_s30 + $0xf0] sm:$0xff]   ;;  %v290_v35 = vld [vmem:[%s6433_s30 + $0xf8] sm:$0xff]   ;;  %v340_v39 = vld [vmem:[%s6433_s30 + $0x1c0] sm:$0xff]  }
  0x1d   : > { %v240_v32 = vld [vmem:[%s6433_s30 + $0x30] sm:$0xff]   ;;  %v242_v36 = vld [vmem:[%s6433_s30 + $0x38] sm:$0xff]   ;;  %v292_v44 = vld [vmem:[%s6433_s30 + $0x100] sm:$0xff]  }
  0x1e   : > { %5357 = vmatpush3.bf16.msra.mxu0 %v232_v16  ;;  %v272_v33 = vld [vmem:[%s6433_s30 + $0xb0] sm:$0xff]   ;;  %v274_v37 = vld [vmem:[%s6433_s30 + $0xb8] sm:$0xff]   ;;  %v324_v46 = vld [vmem:[%s6433_s30 + $0x180] sm:$0xff]  }
  0x1f   : > { %5469 = vmatpush3.bf16.msra.mxu1 %v264_v17  ;;  %5358 = vmatprep.subr.bf16.mxu0 %v250_v18  ;;  %v310_v47 = vld [vmem:[%s6433_s30 + $0x148] sm:$0xff]   ;;  %v312_v54 = vld [vmem:[%s6433_s30 + $0x150] sm:$0xff]   ;;  %v376_v57 = vld [vmem:[%s8696_s1 + $0xa0] sm:$0xff] }
  0x20   : > { %5470 = vmatprep.subr.bf16.mxu1 %v282_v19  ;;  %v342_v50 = vld [vmem:[%s6433_s30 + $0x1c8] sm:$0xff]   ;;  %v344_v56 = vld [vmem:[%s6433_s30 + $0x1d0] sm:$0xff]   ;;  %v314_v62 = vld [vmem:[%s6433_s30 + $0x158] sm:$0xff]   ;;  %v5046_v2 = vcombine.high %v372_v55, %v376_v57  ;;  %v5045_v16 = vcombine.low %v372_v55, %v376_v57 }
  0x21   : > { %v294_v52 = vld [vmem:[%s6433_s30 + $0x108] sm:$0xff]   ;;  %v296_v60 = vld [vmem:[%s6433_s30 + $0x110] sm:$0xff]   ;;  %v346_v0 = vld [vmem:[%s6433_s30 + $0x1d8] sm:$0xff]  }
  0x22   : > { %5359 = vmatpush3.bf16.msra.mxu0 %v234_v20  ;;  %v326_v53 = vld [vmem:[%s6433_s30 + $0x188] sm:$0xff]   ;;  %v328_v61 = vld [vmem:[%s6433_s30 + $0x190] sm:$0xff]   ;;  %v298_v3 = vld [vmem:[%s6433_s30 + $0x118] sm:$0xff]  }
  0x23   : > { %5471 = vmatpush3.bf16.msra.mxu1 %v266_v21  ;;  %5360 = vmatprep.subr.bf16.mxu0 %v252_v22  ;;  %v377_v59 = vld [vmem:[%s8696_s1 + $0xa8] sm:$0xff]  ;;  %v330_v5 = vld [vmem:[%s6433_s30 + $0x198] sm:$0xff]   ;;  %v316_v6 = vld [vmem:[%s6433_s30 + $0x160] sm:$0xff]  }
  0x24   : > { %5472 = vmatprep.subr.bf16.mxu1 %v284_v23  ;;  %v5048_v4 = vcombine.high %v373_v58, %v377_v59  ;;  %v380_v7 = vld [vmem:[%s8696_s1 + $0xc0] sm:$0xff]  ;;  %v381_v9 = vld [vmem:[%s8696_s1 + $0xc8] sm:$0xff]  ;;  %v5047_v17 = vcombine.low %v373_v58, %v377_v59  ;;  %v320_v22 = vld [vmem:[%s6433_s30 + $0x170] sm:$0xff]  }
  0x25   : > { %v384_v8 = vld [vmem:[%s8696_s1 + $0xe0] sm:$0xff]  ;;  %v385_v10 = vld [vmem:[%s8696_s1 + $0xe8] sm:$0xff] }
  0x26   : > { %5361 = vmatpush3.bf16.msra.mxu0 %v236_v24  ;;  %v348_v11 = vld [vmem:[%s6433_s30 + $0x1e0] sm:$0xff]   ;;  %v318_v14 = vld [vmem:[%s6433_s30 + $0x168] sm:$0xff]   ;;  %v5054_v18 = vcombine.high %v380_v7, %v384_v8  ;;  %v5056_v20 = vcombine.high %v381_v9, %v385_v10 }
  0x27   : > { %5473 = vmatpush3.bf16.msra.mxu1 %v268_v25  ;;  %5362 = vmatprep.subr.bf16.mxu0 %v254_v26  ;;  %v300_v12 = vld [vmem:[%s6433_s30 + $0x120] sm:$0xff]   ;;  %v350_v15 = vld [vmem:[%s6433_s30 + $0x1e8] sm:$0xff]  }
  0x28   : > { %5474 = vmatprep.subr.bf16.mxu1 %v286_v27  ;;  %v332_v13 = vld [vmem:[%s6433_s30 + $0x1a0] sm:$0xff]   ;;  %v302_v19 = vld [vmem:[%s6433_s30 + $0x128] sm:$0xff]   ;;  %v352_v27 = vld [vmem:[%s6433_s30 + $0x1f0] sm:$0xff]  }
  0x29   : > { %v334_v21 = vld [vmem:[%s6433_s30 + $0x1a8] sm:$0xff]   ;;  %v388_v23 = vld [vmem:[%s8696_s1 + $0x100] sm:$0xff] }
  0x2a   : > { %5363 = vmatpush3.bf16.msra.mxu0 %v238_v28  ;;  %v392_v24 = vld [vmem:[%s8696_s1 + $0x120] sm:$0xff]  ;;  %v389_v25 = vld [vmem:[%s8696_s1 + $0x108] sm:$0xff]  ;;  %v304_v28 = vld [vmem:[%s6433_s30 + $0x130] sm:$0xff]  }
  0x2b   : > { %5475 = vmatpush3.bf16.msra.mxu1 %v270_v29  ;;  %5364 = vmatprep.subr.bf16.mxu0 %v256_v30  ;;  %v393_v26 = vld [vmem:[%s8696_s1 + $0x128] sm:$0xff]  ;;  %v336_v29 = vld [vmem:[%s6433_s30 + $0x1b0] sm:$0xff]   ;;  %v322_v30 = vld [vmem:[%s6433_s30 + $0x178] sm:$0xff]   ;;  %v5061_v42 = vcombine.low %v388_v23, %v392_v24 }
  0x2c   : > { %5476 = vmatprep.subr.bf16.mxu1 %v288_v31  ;;  %v354_v31 = vld [vmem:[%s6433_s30 + $0x1f8] sm:$0xff]   ;;  %v397_v40 = vld [vmem:[%s8696_s1 + $0x148] sm:$0xff]  ;;  %v5063_v43 = vcombine.low %v389_v25, %v393_v26  ;;  %v416_v55 = vld [vmem:[%s8696_s1 + $0x1e0] sm:$0xff] }
  0x2d   : > { %v401_v41 = vld [vmem:[%s8696_s1 + $0x168] sm:$0xff] }
  0x2e   : > { %5365 = vmatpush3.bf16.msra.mxu0 %v240_v32  ;;  %v5053_v32 = vcombine.low %v380_v7, %v384_v8  ;;  %v417_v57 = vld [vmem:[%s8696_s1 + $0x1e8] sm:$0xff]  ;;  %v432_v7 = vld [vmem:[%s8696_s1 + $0x260] sm:$0xff] }
  0x2f   : > { %5477 = vmatpush3.bf16.msra.mxu1 %v272_v33  ;;  %5366 = vmatprep.subr.bf16.mxu0 %v258_v34  ;;  %v5055_v33 = vcombine.low %v381_v9, %v385_v10  ;;  %v5062_v34 = vcombine.high %v388_v23, %v392_v24  ;;  %v429_v8 = vld [vmem:[%s8696_s1 + $0x248] sm:$0xff]  ;;  %v448_v23 = vld [vmem:[%s8696_s1 + $0x2e0] sm:$0xff] }
  0x30   : > { %5478 = vmatprep.subr.bf16.mxu1 %v290_v35  ;;  %v306_v35 = vld [vmem:[%s6433_s30 + $0x138] sm:$0xff]   ;;  %v433_v9 = vld [vmem:[%s8696_s1 + $0x268] sm:$0xff] }
  0x31   : > { %v445_v24 = vld [vmem:[%s8696_s1 + $0x2c8] sm:$0xff] }
  0x32   : > { %5367 = vmatpush3.bf16.msra.mxu0 %v242_v36  ;;  %v5064_v36 = vcombine.high %v389_v25, %v393_v26  ;;  %v449_v25 = vld [vmem:[%s8696_s1 + $0x2e8] sm:$0xff] }
  0x33   : > { %5479 = vmatpush3.bf16.msra.mxu1 %v274_v37  ;;  %5576 = vmatprep.subr.bf16.mxu0 %v308_v38  ;;  %v338_v37 = vld [vmem:[%s6433_s30 + $0x1b8] sm:$0xff]   ;;  %v396_v38 = vld [vmem:[%s8696_s1 + $0x140] sm:$0xff] }
  0x34   : > { %5688 = vmatprep.subr.bf16.mxu1 %v340_v39  ;;  %v400_v39 = vld [vmem:[%s8696_s1 + $0x160] sm:$0xff] }
  0x35   : > { %1541 = vmatmul.mubr.bf16.vlgmr.msra.gmra.mrb[0].mxu0 %v5029_v45  ;;  %v5072_v45 = vcombine.high %v397_v40, %v401_v41 }
  0x36   : > { %1702 = vmatmul.mubr.bf16.vlgmr.msra.gmra.mrb[0].mxu1 %v5031_v48  ;;  %1548 = vmatprep.mubr.bf16.mxu0 %v5038_v49  ;;  %v405_v48 = vld [vmem:[%s8696_s1 + $0x188] sm:$0xff] }
  0x37   : > { %1709 = vmatprep.mubr.bf16.mxu1 %v5040_v51  ;;  %5577 = vmatpush3.bf16.msra.mxu0 %v292_v44  ;;  %v5070_v44 = vcombine.high %v396_v38, %v400_v39  ;;  %v409_v49 = vld [vmem:[%s8696_s1 + $0x1a8] sm:$0xff]  ;;  %v5071_v51 = vcombine.low %v397_v40, %v401_v41 }
  0x38   : > { %5689 = vmatpush3.bf16.msra.mxu1 %v324_v46  ;;  %5578 = vmatprep.subr.bf16.mxu0 %v310_v47  ;;  %v404_v46 = vld [vmem:[%s8696_s1 + $0x180] sm:$0xff]  ;;  %v5079_v59 = vcombine.low %v405_v48, %v409_v49  ;;  %v461_v40 = vld [vmem:[%s8696_s1 + $0x348] sm:$0xff] }
  0x39   : > { %5690 = vmatprep.subr.bf16.mxu1 %v342_v50  ;;  %v408_v47 = vld [vmem:[%s8696_s1 + $0x1a0] sm:$0xff]  ;;  %v5069_v50 = vcombine.low %v396_v38, %v400_v39  ;;  %v465_v41 = vld [vmem:[%s8696_s1 + $0x368] sm:$0xff] }
  0x3a   : > { %v5077_v58 = vcombine.low %v404_v46, %v408_v47  ;;  %v460_v38 = vld [vmem:[%s8696_s1 + $0x340] sm:$0xff] }
  0x3b   : > { %5579 = vmatpush3.bf16.msra.mxu0 %v294_v52  ;;  %v5078_v52 = vcombine.high %v404_v46, %v408_v47  ;;  %v464_v39 = vld [vmem:[%s8696_s1 + $0x360] sm:$0xff] }
  0x3c   : > { %5691 = vmatpush3.bf16.msra.mxu1 %v326_v53  ;;  %5580 = vmatprep.subr.bf16.mxu0 %v312_v54  ;;  %v5080_v53 = vcombine.high %v405_v48, %v409_v49  ;;  %v412_v54 = vld [vmem:[%s8696_s1 + $0x1c0] sm:$0xff]  ;;  %v469_v48 = vld [vmem:[%s8696_s1 + $0x388] sm:$0xff] }
  0x3d   : > { %1549 = vmatmul.mubr.bf16.gmra.mrb[4].mxu0 %v5037_v63  ;;  %5692 = vmatprep.subr.bf16.mxu1 %v344_v56  ;;  %v413_v56 = vld [vmem:[%s8696_s1 + $0x1c8] sm:$0xff]  ;;  %v424_v63 = vld [vmem:[%s8696_s1 + $0x220] sm:$0xff] }
  0x3e   : > { %1710 = vmatmul.mubr.bf16.gmra.mrb[4].mxu1 %v5039_v1  ;;  %1556 = vmatprep.mubr.bf16.mxu0 %v5046_v2  ;;  %v425_v1 = vld [vmem:[%s8696_s1 + $0x228] sm:$0xff]  ;;  %v5085_v2 = vcombine.low %v412_v54, %v416_v55  ;;  %v468_v46 = vld [vmem:[%s8696_s1 + $0x380] sm:$0xff] }
  0x3f   : > { %1717 = vmatprep.mubr.bf16.mxu1 %v5048_v4  ;;  %5581 = vmatpush3.bf16.msra.mxu0 %v296_v60  ;;  %v5086_v60 = vcombine.high %v412_v54, %v416_v55  ;;  %v472_v47 = vld [vmem:[%s8696_s1 + $0x3a0] sm:$0xff]  ;;  %v473_v49 = vld [vmem:[%s8696_s1 + $0x3a8] sm:$0xff] }
  0x40   : > { %5693 = vmatpush3.bf16.msra.mxu1 %v328_v61  ;;  %5582 = vmatprep.subr.bf16.mxu0 %v314_v62  ;;  %v5088_v61 = vcombine.high %v413_v56, %v417_v57  ;;  %v420_v62 = vld [vmem:[%s8696_s1 + $0x200] sm:$0xff] }
  0x41   : > { %5694 = vmatprep.subr.bf16.mxu1 %v346_v0  ;;  %v421_v0 = vld [vmem:[%s8696_s1 + $0x208] sm:$0xff]  ;;  %v5094_v4 = vcombine.high %v420_v62, %v424_v63  ;;  %v5093_v10 = vcombine.low %v420_v62, %v424_v63  ;;  %v476_v54 = vld [vmem:[%s8696_s1 + $0x3c0] sm:$0xff]  ;;  %v358_v62 = vld [vmem:[%s8696_s1 + $0x10] sm:$0xff] }
  0x42   : > { %v480_v55 = vld [vmem:[%s8696_s1 + $0x3e0] sm:$0xff]  ;;  %v362_v63 = vld [vmem:[%s8696_s1 + $0x30] sm:$0xff] }
  0x43   : > { %5583 = vmatpush3.bf16.msra.mxu0 %v298_v3  ;;  %v5087_v3 = vcombine.low %v413_v56, %v417_v57  ;;  %v477_v56 = vld [vmem:[%s8696_s1 + $0x3c8] sm:$0xff] }
  0x44   : > { %5695 = vmatpush3.bf16.msra.mxu1 %v330_v5  ;;  %5584 = vmatprep.subr.bf16.mxu0 %v316_v6  ;;  %v5096_v5 = vcombine.high %v421_v0, %v425_v1  ;;  %v428_v6 = vld [vmem:[%s8696_s1 + $0x240] sm:$0xff]  ;;  %v481_v57 = vld [vmem:[%s8696_s1 + $0x3e8] sm:$0xff] }
  0x45   : > { %1557 = vmatmul.mubr.bf16.gmra.mrb[8].mxu0 %v5045_v16  ;;  %5696 = vmatprep.subr.bf16.mxu1 %v348_v11  ;;  %v5095_v11 = vcombine.low %v421_v0, %v425_v1  ;;  %v437_v16 = vld [vmem:[%s8696_s1 + $0x288] sm:$0xff]  ;;  %v359_v0 = vld [vmem:[%s8696_s1 + $0x18] sm:$0xff] }
  0x46   : > { %1718 = vmatmul.mubr.bf16.gmra.mrb[8].mxu1 %v5047_v17  ;;  %1564 = vmatprep.mubr.bf16.mxu0 %v5054_v18  ;;  %v441_v17 = vld [vmem:[%s8696_s1 + $0x2a8] sm:$0xff]  ;;  %v5101_v18 = vcombine.low %v428_v6, %v432_v7  ;;  %v363_v1 = vld [vmem:[%s8696_s1 + $0x38] sm:$0xff] }
  0x47   : > { %1725 = vmatprep.mubr.bf16.mxu1 %v5056_v20  ;;  %5585 = vmatpush3.bf16.msra.mxu0 %v300_v12  ;;  %v5102_v12 = vcombine.high %v428_v6, %v432_v7  ;;  %v366_v6 = vld [vmem:[%s8696_s1 + $0x50] sm:$0xff] }
  0x48   : > { %5697 = vmatpush3.bf16.msra.mxu1 %v332_v13  ;;  %5586 = vmatprep.subr.bf16.mxu0 %v318_v14  ;;  %v5104_v13 = vcombine.high %v429_v8, %v433_v9  ;;  %v436_v14 = vld [vmem:[%s8696_s1 + $0x280] sm:$0xff]  ;;  %v370_v7 = vld [vmem:[%s8696_s1 + $0x70] sm:$0xff] }
  0x49   : > { %5698 = vmatprep.subr.bf16.mxu1 %v350_v15  ;;  %v440_v15 = vld [vmem:[%s8696_s1 + $0x2a0] sm:$0xff] }
  0x4a   : > { %v5110_v20 = vcombine.high %v436_v14, %v440_v15  ;;  %v5109_v26 = vcombine.low %v436_v14, %v440_v15  ;;  %v374_v14 = vld [vmem:[%s8696_s1 + $0x90] sm:$0xff] }
  0x4b   : > { %5587 = vmatpush3.bf16.msra.mxu0 %v302_v19  ;;  %v5103_v19 = vcombine.low %v429_v8, %v433_v9  ;;  %v367_v8 = vld [vmem:[%s8696_s1 + $0x58] sm:$0xff]  ;;  %v378_v15 = vld [vmem:[%s8696_s1 + $0xb0] sm:$0xff] }
  0x4c   : > { %5699 = vmatpush3.bf16.msra.mxu1 %v334_v21  ;;  %5588 = vmatprep.subr.bf16.mxu0 %v320_v22  ;;  %v5112_v21 = vcombine.high %v437_v16, %v441_v17  ;;  %v444_v22 = vld [vmem:[%s8696_s1 + $0x2c0] sm:$0xff]  ;;  %v371_v9 = vld [vmem:[%s8696_s1 + $0x78] sm:$0xff] }
  0x4d   : > { %1565 = vmatmul.mubr.bf16.gmra.mrb[12].mxu0 %v5053_v32  ;;  %5700 = vmatprep.subr.bf16.mxu1 %v352_v27  ;;  %v5111_v27 = vcombine.low %v437_v16, %v441_v17  ;;  %v453_v32 = vld [vmem:[%s8696_s1 + $0x308] sm:$0xff]  ;;  %v375_v16 = vld [vmem:[%s8696_s1 + $0x98] sm:$0xff] }
  0x4e   : > { %1726 = vmatmul.mubr.bf16.gmra.mrb[12].mxu1 %v5055_v33  ;;  %1572 = vmatprep.mubr.bf16.mxu0 %v5062_v34  ;;  %v457_v33 = vld [vmem:[%s8696_s1 + $0x328] sm:$0xff]  ;;  %v5117_v34 = vcombine.low %v444_v22, %v448_v23  ;;  %v379_v17 = vld [vmem:[%s8696_s1 + $0xb8] sm:$0xff] }
  0x4f   : > { %1733 = vmatprep.mubr.bf16.mxu1 %v5064_v36  ;;  %5589 = vmatpush3.bf16.msra.mxu0 %v304_v28  ;;  %v5118_v28 = vcombine.high %v444_v22, %v448_v23  ;;  %v382_v22 = vld [vmem:[%s8696_s1 + $0xd0] sm:$0xff] }
  0x50   : > { %5701 = vmatpush3.bf16.msra.mxu1 %v336_v29  ;;  %5590 = vmatprep.subr.bf16.mxu0 %v322_v30  ;;  %v5120_v29 = vcombine.high %v445_v24, %v449_v25  ;;  %v452_v30 = vld [vmem:[%s8696_s1 + $0x300] sm:$0xff]  ;;  %v386_v23 = vld [vmem:[%s8696_s1 + $0xf0] sm:$0xff] }
  0x51   : > { %5702 = vmatprep.subr.bf16.mxu1 %v354_v31  ;;  %v456_v31 = vld [vmem:[%s8696_s1 + $0x320] sm:$0xff] }
  0x52   : > { %v5126_v36 = vcombine.high %v452_v30, %v456_v31 }
  0x53   : > { %5591 = vmatpush3.bf16.msra.mxu0 %v306_v35  ;;  %v5119_v35 = vcombine.low %v445_v24, %v449_v25  ;;  %v383_v24 = vld [vmem:[%s8696_s1 + $0xd8] sm:$0xff] }
  0x54   : > { %5703 = vmatpush3.bf16.msra.mxu1 %v338_v37  ;;  %v5128_v37 = vcombine.high %v453_v32, %v457_v33  ;;  %v387_v25 = vld [vmem:[%s8696_s1 + $0xf8] sm:$0xff] }
  0x55   : > { %1573 = vmatmul.mubr.bf16.gmra.mrb[16].mxu0 %v5061_v42  ;;  %v5125_v42 = vcombine.low %v452_v30, %v456_v31  ;;  %v390_v30 = vld [vmem:[%s8696_s1 + $0x110] sm:$0xff] }
  0x56   : > { %1734 = vmatmul.mubr.bf16.gmra.mrb[16].mxu1 %v5063_v43  ;;  %1580 = vmatprep.mubr.bf16.mxu0 %v5070_v44  ;;  %v5127_v43 = vcombine.low %v453_v32, %v457_v33  ;;  %v5134_v44 = vcombine.high %v460_v38, %v464_v39  ;;  %v394_v31 = vld [vmem:[%s8696_s1 + $0x130] sm:$0xff]  ;;  %v391_v32 = vld [vmem:[%s8696_s1 + $0x118] sm:$0xff] }
  0x57   : > { %1741 = vmatprep.mubr.bf16.mxu1 %v5072_v45  ;;  %v5136_v45 = vcombine.high %v461_v40, %v465_v41  ;;  %v395_v33 = vld [vmem:[%s8696_s1 + $0x138] sm:$0xff] }
  0x5d   : > { %1581 = vmatmul.mubr.bf16.gmra.mrb[20].mxu0 %v5069_v50  ;;  %v5133_v50 = vcombine.low %v460_v38, %v464_v39  ;;  %v398_v38 = vld [vmem:[%s8696_s1 + $0x150] sm:$0xff] }
  0x5e   : > { %1742 = vmatmul.mubr.bf16.gmra.mrb[20].mxu1 %v5071_v51  ;;  %1588 = vmatprep.mubr.bf16.mxu0 %v5078_v52  ;;  %v5135_v51 = vcombine.low %v461_v40, %v465_v41  ;;  %v5142_v52 = vcombine.high %v468_v46, %v472_v47  ;;  %v402_v39 = vld [vmem:[%s8696_s1 + $0x170] sm:$0xff]  ;;  %v399_v40 = vld [vmem:[%s8696_s1 + $0x158] sm:$0xff] }
  0x5f   : > { %1749 = vmatprep.mubr.bf16.mxu1 %v5080_v53  ;;  %v5144_v53 = vcombine.high %v469_v48, %v473_v49  ;;  %v403_v41 = vld [vmem:[%s8696_s1 + $0x178] sm:$0xff] }
  0x65   : > { %1589 = vmatmul.mubr.bf16.gmra.mrb[24].mxu0 %v5077_v58  ;;  %v5141_v58 = vcombine.low %v468_v46, %v472_v47  ;;  %v406_v46 = vld [vmem:[%s8696_s1 + $0x190] sm:$0xff] }
  0x66   : > { %1750 = vmatmul.mubr.bf16.gmra.mrb[24].mxu1 %v5079_v59  ;;  %1596 = vmatprep.mubr.bf16.mxu0 %v5086_v60  ;;  %v5143_v59 = vcombine.low %v469_v48, %v473_v49  ;;  %v5150_v60 = vcombine.high %v476_v54, %v480_v55  ;;  %v410_v47 = vld [vmem:[%s8696_s1 + $0x1b0] sm:$0xff]  ;;  %v407_v48 = vld [vmem:[%s8696_s1 + $0x198] sm:$0xff] }
  0x67   : > { %1757 = vmatprep.mubr.bf16.mxu1 %v5088_v61  ;;  %v5152_v61 = vcombine.high %v477_v56, %v481_v57  ;;  %v411_v49 = vld [vmem:[%s8696_s1 + $0x1b8] sm:$0xff] }
  0x6d   : > { %1597 = vmatmul.mubr.bf16.gmra.mrb[28].mxu0 %v5085_v2  ;;  %v5149_v2 = vcombine.low %v476_v54, %v480_v55  ;;  %v414_v54 = vld [vmem:[%s8696_s1 + $0x1d0] sm:$0xff] }
  0x6e   : > { %1758 = vmatmul.mubr.bf16.gmra.mrb[28].mxu1 %v5087_v3  ;;  %1604 = vmatprep.mubr.bf16.mxu0 %v5094_v4  ;;  %v5151_v3 = vcombine.low %v477_v56, %v481_v57  ;;  %v5034_v4 = vcombine.high %v358_v62, %v362_v63  ;;  %v418_v55 = vld [vmem:[%s8696_s1 + $0x1f0] sm:$0xff]  ;;  %v415_v56 = vld [vmem:[%s8696_s1 + $0x1d8] sm:$0xff] }
  0x6f   : > { %1765 = vmatprep.mubr.bf16.mxu1 %v5096_v5  ;;  %v5036_v5 = vcombine.high %v359_v0, %v363_v1  ;;  %v419_v57 = vld [vmem:[%s8696_s1 + $0x1f8] sm:$0xff] }
  0x75   : > { %1605 = vmatmul.mubr.bf16.gmra.mrb[32].mxu0 %v5093_v10  ;;  %v5033_v10 = vcombine.low %v358_v62, %v362_v63  ;;  %v422_v62 = vld [vmem:[%s8696_s1 + $0x210] sm:$0xff] }
  0x76   : > { %1766 = vmatmul.mubr.bf16.gmra.mrb[32].mxu1 %v5095_v11  ;;  %1612 = vmatprep.mubr.bf16.mxu0 %v5102_v12  ;;  %v5035_v11 = vcombine.low %v359_v0, %v363_v1  ;;  %v5042_v12 = vcombine.high %v366_v6, %v370_v7  ;;  %v426_v63 = vld [vmem:[%s8696_s1 + $0x230] sm:$0xff]  ;;  %v423_v0 = vld [vmem:[%s8696_s1 + $0x218] sm:$0xff] }
  0x77   : > { %1773 = vmatprep.mubr.bf16.mxu1 %v5104_v13  ;;  %v5044_v13 = vcombine.high %v367_v8, %v371_v9  ;;  %v427_v1 = vld [vmem:[%s8696_s1 + $0x238] sm:$0xff] }
  0x7d   : > { %1613 = vmatmul.mubr.bf16.gmra.mrb[36].mxu0 %v5101_v18  ;;  %v5041_v18 = vcombine.low %v366_v6, %v370_v7  ;;  %v430_v6 = vld [vmem:[%s8696_s1 + $0x250] sm:$0xff] }
  0x7e   : > { %1774 = vmatmul.mubr.bf16.gmra.mrb[36].mxu1 %v5103_v19  ;;  %1620 = vmatprep.mubr.bf16.mxu0 %v5110_v20  ;;  %v5043_v19 = vcombine.low %v367_v8, %v371_v9  ;;  %v5050_v20 = vcombine.high %v374_v14, %v378_v15  ;;  %v434_v7 = vld [vmem:[%s8696_s1 + $0x270] sm:$0xff]  ;;  %v431_v8 = vld [vmem:[%s8696_s1 + $0x258] sm:$0xff] }
  0x7f   : > { %1781 = vmatprep.mubr.bf16.mxu1 %v5112_v21  ;;  %v5052_v21 = vcombine.high %v375_v16, %v379_v17  ;;  %v435_v9 = vld [vmem:[%s8696_s1 + $0x278] sm:$0xff] }
  0x85   : > { %1621 = vmatmul.mubr.bf16.gmra.mrb[40].mxu0 %v5109_v26  ;;  %v5049_v26 = vcombine.low %v374_v14, %v378_v15  ;;  %v438_v14 = vld [vmem:[%s8696_s1 + $0x290] sm:$0xff] }
  0x86   : > { %1782 = vmatmul.mubr.bf16.gmra.mrb[40].mxu1 %v5111_v27  ;;  %1628 = vmatprep.mubr.bf16.mxu0 %v5118_v28  ;;  %v5051_v27 = vcombine.low %v375_v16, %v379_v17  ;;  %v5058_v28 = vcombine.high %v382_v22, %v386_v23  ;;  %v442_v15 = vld [vmem:[%s8696_s1 + $0x2b0] sm:$0xff]  ;;  %v439_v16 = vld [vmem:[%s8696_s1 + $0x298] sm:$0xff] }
  0x87   : > { %1789 = vmatprep.mubr.bf16.mxu1 %v5120_v29  ;;  %v5060_v29 = vcombine.high %v383_v24, %v387_v25  ;;  %v443_v17 = vld [vmem:[%s8696_s1 + $0x2b8] sm:$0xff] }
  0x8d   : > { %1629 = vmatmul.mubr.bf16.gmra.mrb[44].mxu0 %v5117_v34  ;;  %v5057_v34 = vcombine.low %v382_v22, %v386_v23  ;;  %v446_v22 = vld [vmem:[%s8696_s1 + $0x2d0] sm:$0xff] }
  0x8e   : > { %1790 = vmatmul.mubr.bf16.gmra.mrb[44].mxu1 %v5119_v35  ;;  %1636 = vmatprep.mubr.bf16.mxu0 %v5126_v36  ;;  %v5059_v35 = vcombine.low %v383_v24, %v387_v25  ;;  %v5066_v36 = vcombine.high %v390_v30, %v394_v31  ;;  %v450_v23 = vld [vmem:[%s8696_s1 + $0x2f0] sm:$0xff]  ;;  %v447_v24 = vld [vmem:[%s8696_s1 + $0x2d8] sm:$0xff] }
  0x8f   : > { %1797 = vmatprep.mubr.bf16.mxu1 %v5128_v37  ;;  %v5068_v37 = vcombine.high %v391_v32, %v395_v33  ;;  %v451_v25 = vld [vmem:[%s8696_s1 + $0x2f8] sm:$0xff] }
  0x95   : > { %1637 = vmatmul.mubr.bf16.gmra.mrb[48].mxu0 %v5125_v42  ;;  %v5065_v42 = vcombine.low %v390_v30, %v394_v31  ;;  %v454_v30 = vld [vmem:[%s8696_s1 + $0x310] sm:$0xff] }
  0x96   : > { %1798 = vmatmul.mubr.bf16.gmra.mrb[48].mxu1 %v5127_v43  ;;  %1644 = vmatprep.mubr.bf16.mxu0 %v5134_v44  ;;  %v5067_v43 = vcombine.low %v391_v32, %v395_v33  ;;  %v5074_v44 = vcombine.high %v398_v38, %v402_v39  ;;  %v458_v31 = vld [vmem:[%s8696_s1 + $0x330] sm:$0xff]  ;;  %v455_v33 = vld [vmem:[%s8696_s1 + $0x318] sm:$0xff] }
  0x97   : > { %1805 = vmatprep.mubr.bf16.mxu1 %v5136_v45  ;;  %v5076_v45 = vcombine.high %v399_v40, %v403_v41 }
  0x9d   : > { %1645 = vmatmul.mubr.bf16.gmra.mrb[52].mxu0 %v5133_v50  ;;  %v5073_v50 = vcombine.low %v398_v38, %v402_v39 }
  0x9e   : > { %1806 = vmatmul.mubr.bf16.gmra.mrb[52].mxu1 %v5135_v51  ;;  %1652 = vmatprep.mubr.bf16.mxu0 %v5142_v52  ;;  %v5075_v51 = vcombine.low %v399_v40, %v403_v41  ;;  %v5082_v52 = vcombine.high %v406_v46, %v410_v47  ;;  %v5123_v41 = vcombine.low %v447_v24, %v451_v25 }
  0x9f   : > { %1813 = vmatprep.mubr.bf16.mxu1 %v5144_v53  ;;  %v5084_v53 = vcombine.high %v407_v48, %v411_v49 }
  0xa5   : > { %1653 = vmatmul.mubr.bf16.gmra.mrb[56].mxu0 %v5141_v58  ;;  %v5081_v58 = vcombine.low %v406_v46, %v410_v47 }
  0xa6   : > { %1814 = vmatmul.mubr.bf16.gmra.mrb[56].mxu1 %v5143_v59  ;;  %1660 = vmatprep.mubr.bf16.mxu0 %v5150_v60  ;;  %v5083_v59 = vcombine.low %v407_v48, %v411_v49  ;;  %v5090_v60 = vcombine.high %v414_v54, %v418_v55 }
  0xa7   : > { %1821 = vmatprep.mubr.bf16.mxu1 %v5152_v61  ;;  %v5092_v61 = vcombine.high %v415_v56, %v419_v57 }
  0xad   : > { %1661 = vmatmul.mubr.bf16.gmra.mrb[60].mxu0 %v5149_v2  ;;  %v5089_v2 = vcombine.low %v414_v54, %v418_v55  ;;  %v463_v55 = vld [vmem:[%s8696_s1 + $0x358] sm:$0xff] }
  0xae   : > { %1822 = vmatmul.mubr.bf16.gmra.mrb[60].mxu1 %v5151_v3  ;;  %1862 = vmatprep.mubr.bf16.mxu0 %v5034_v4  ;;  %v5091_v3 = vcombine.low %v415_v56, %v419_v57  ;;  %v5098_v4 = vcombine.high %v422_v62, %v426_v63  ;;  %v467_v56 = vld [vmem:[%s8696_s1 + $0x378] sm:$0xff] }
  0xaf   : > { %2023 = vmatprep.mubr.bf16.mxu1 %v5036_v5  ;;  %v5100_v5 = vcombine.high %v423_v0, %v427_v1 }
  0xb5   : > { %1863 = vmatmul.mubr.bf16.vlgmr.msra.gmra.mrb[64].mxu0 %v5033_v10  ;;  %v5097_v10 = vcombine.low %v422_v62, %v426_v63 }
  0xb6   : > { %2024 = vmatmul.mubr.bf16.vlgmr.msra.gmra.mrb[64].mxu1 %v5035_v11  ;;  %1870 = vmatprep.mubr.bf16.mxu0 %v5042_v12  ;;  %v5099_v11 = vcombine.low %v423_v0, %v427_v1  ;;  %v5106_v12 = vcombine.high %v430_v6, %v434_v7 }
  0xb7   : > { %2031 = vmatprep.mubr.bf16.mxu1 %v5044_v13  ;;  %v5108_v13 = vcombine.high %v431_v8, %v435_v9 }
  0xbd   : > { %1871 = vmatmul.mubr.bf16.gmra.mrb[68].mxu0 %v5041_v18  ;;  %v5105_v18 = vcombine.low %v430_v6, %v434_v7 }
  0xbe   : > { %2032 = vmatmul.mubr.bf16.gmra.mrb[68].mxu1 %v5043_v19  ;;  %1878 = vmatprep.mubr.bf16.mxu0 %v5050_v20  ;;  %v5107_v19 = vcombine.low %v431_v8, %v435_v9  ;;  %v5114_v20 = vcombine.high %v438_v14, %v442_v15 }
  0xbf   : > { %2039 = vmatprep.mubr.bf16.mxu1 %v5052_v21  ;;  %v5116_v21 = vcombine.high %v439_v16, %v443_v17 }
  0xc5   : > { %1879 = vmatmul.mubr.bf16.gmra.mrb[72].mxu0 %v5049_v26  ;;  %v5113_v26 = vcombine.low %v438_v14, %v442_v15  ;;  %v471_v14 = vld [vmem:[%s8696_s1 + $0x398] sm:$0xff] }
  0xc6   : > { %2040 = vmatmul.mubr.bf16.gmra.mrb[72].mxu1 %v5051_v27  ;;  %1886 = vmatprep.mubr.bf16.mxu0 %v5058_v28  ;;  %v5115_v27 = vcombine.low %v439_v16, %v443_v17  ;;  %v5122_v28 = vcombine.high %v446_v22, %v450_v23  ;;  %v475_v15 = vld [vmem:[%s8696_s1 + $0x3b8] sm:$0xff] }
  0xc7   : > { %2047 = vmatprep.mubr.bf16.mxu1 %v5060_v29  ;;  %v5124_v29 = vcombine.high %v447_v24, %v451_v25 }
  0xcd   : > { %1887 = vmatmul.mubr.bf16.gmra.mrb[76].mxu0 %v5057_v34  ;;  %v459_v34 = vld [vmem:[%s8696_s1 + $0x338] sm:$0xff] }
  0xce   : > { %2048 = vmatmul.mubr.bf16.gmra.mrb[76].mxu1 %v5059_v35  ;;  %1894 = vmatprep.mubr.bf16.mxu0 %v5066_v36  ;;  %v5132_v46 = vcombine.high %v455_v33, %v459_v34  ;;  %v5131_v63 = vcombine.low %v455_v33, %v459_v34  ;;  %v478_v33 = vld [vmem:[%s8696_s1 + $0x3d0] sm:$0xff] }
  0xcf   : > { %2055 = vmatprep.mubr.bf16.mxu1 %v5068_v37  ;;  %v5121_v37 = vcombine.low %v446_v22, %v450_v23  ;;  %v5139_v22 = vcombine.low %v463_v55, %v467_v56  ;;  %v482_v34 = vld [vmem:[%s8696_s1 + $0x3f0] sm:$0xff] }
  0xd5   : > { %1895 = vmatmul.mubr.bf16.gmra.mrb[80].mxu0 %v5065_v42  ;;  %v5130_v42 = vcombine.high %v454_v30, %v458_v31 }
  0xd6   : > { %2056 = vmatmul.mubr.bf16.gmra.mrb[80].mxu1 %v5067_v43  ;;  %1902 = vmatprep.mubr.bf16.mxu0 %v5074_v44 }
  0xd7   : > { %2063 = vmatprep.mubr.bf16.mxu1 %v5076_v45 }
  0xdd   : > { %1903 = vmatmul.mubr.bf16.gmra.mrb[84].mxu0 %v5073_v50 }
  0xde   : > { %2064 = vmatmul.mubr.bf16.gmra.mrb[84].mxu1 %v5075_v51  ;;  %1910 = vmatprep.mubr.bf16.mxu0 %v5082_v52  ;;  %v462_v52 = vld [vmem:[%s8696_s1 + $0x350] sm:$0xff] }
  0xdf   : > { %2071 = vmatprep.mubr.bf16.mxu1 %v5084_v53  ;;  %v466_v53 = vld [vmem:[%s8696_s1 + $0x370] sm:$0xff] }
  0xe0   : > { %v5138_v0 = vcombine.high %v462_v52, %v466_v53 }
  0xe5   : > { %1911 = vmatmul.mubr.bf16.gmra.mrb[88].mxu0 %v5081_v58 }
  0xe6   : > { %2072 = vmatmul.mubr.bf16.gmra.mrb[88].mxu1 %v5083_v59  ;;  %1918 = vmatprep.mubr.bf16.mxu0 %v5090_v60  ;;  %v5129_v59 = vcombine.low %v454_v30, %v458_v31 }
  0xe7   : > { %2079 = vmatprep.mubr.bf16.mxu1 %v5092_v61 }
  0xed   : > { %1919 = vmatmul.mubr.bf16.gmra.mrb[92].mxu0 %v5089_v2 }
  0xee   : > { %2080 = vmatmul.mubr.bf16.gmra.mrb[92].mxu1 %v5091_v3  ;;  %1926 = vmatprep.mubr.bf16.mxu0 %v5098_v4  ;;  %v5140_v4 = vcombine.high %v463_v55, %v467_v56 }
  0xef   : > { %2087 = vmatprep.mubr.bf16.mxu1 %v5100_v5 }
  0xf5   : > { %1927 = vmatmul.mubr.bf16.gmra.mrb[96].mxu0 %v5097_v10  ;;  %v470_v10 = vld [vmem:[%s8696_s1 + $0x390] sm:$0xff] }
  0xf6   : > { %2088 = vmatmul.mubr.bf16.gmra.mrb[96].mxu1 %v5099_v11  ;;  %1934 = vmatprep.mubr.bf16.mxu0 %v5106_v12  ;;  %v474_v11 = vld [vmem:[%s8696_s1 + $0x3b0] sm:$0xff]  ;;  %v6358_v12 = vmov 0  }
  0xf7   : > { %2095 = vmatprep.mubr.bf16.mxu1 %v5108_v13  ;;  %2968 = vmatprep.subr.bf16.mxu0 %v6358_v12  ;;  %v5146_v23 = vcombine.high %v470_v10, %v474_v11 }
  0xf8   : > { %5888 = vmatprep.subr.bf16.mxu1 %v6358_v12 }
  0xfd   : > { %1935 = vmatmul.mubr.bf16.gmra.mrb[100].mxu0 %v5105_v18  ;;  %v5137_v18 = vcombine.low %v462_v52, %v466_v53 }
  0xfe   : > { %2096 = vmatmul.mubr.bf16.gmra.mrb[100].mxu1 %v5107_v19  ;;  %1942 = vmatprep.mubr.bf16.mxu0 %v5114_v20 }
  0xff   : > { %2103 = vmatprep.mubr.bf16.mxu1 %v5116_v21 }
 0x105   : > { %1943 = vmatmul.mubr.bf16.gmra.mrb[104].mxu0 %v5113_v26 }
 0x106   : > { %2104 = vmatmul.mubr.bf16.gmra.mrb[104].mxu1 %v5115_v27  ;;  %1950 = vmatprep.mubr.bf16.mxu0 %v5122_v28  ;;  %v5148_v27 = vcombine.high %v471_v14, %v475_v15 }
 0x107   : > { %2111 = vmatprep.mubr.bf16.mxu1 %v5124_v29 }
 0x108   : > { %v5368_v32 = vpop.f32.mrb[0].mxu0 }
 0x109   : > { %v5480_v35 = vpop.f32.mrb[0].mxu1  ;;  %v5369_v36 = vpop.f32.mrb[1].mxu0 }
 0x10a   : > { %v5370_v38 = vadd.f32 %v5369_v36, %v5368_v32  ;;  %v5481_v39 = vpop.f32.mrb[1].mxu1  ;;  %v5371_v40 = vpop.f32.mrb[2].mxu0  ;;  %v479_v36 = vld [vmem:[%s8696_s1 + $0x3d8] sm:$0xff] }
 0x10b   : > { %v5482_v43 = vadd.f32 %v5481_v39, %v5480_v35  ;;  %v5483_v44 = vpop.f32.mrb[2].mxu1  ;;  %v5372_v45 = vpop.f32.mrb[3].mxu0 }
 0x10c   : > { %v5373_v47 = vadd.f32 %v5372_v45, %v5371_v40  ;;  %v5484_v48 = vpop.f32.mrb[3].mxu1  ;;  %v5145_v40 = vcombine.low %v470_v10, %v474_v11  ;;  %v5154_v45 = vcombine.high %v478_v33, %v482_v34 }
 0x10d   : > { %v6839_v49 = vadd.f32 %v5482_v43, %v5370_v38  ;;  %v5485_v50 = vadd.f32 %v5484_v48, %v5483_v44  ;;  %1951 = vmatmul.mubr.bf16.gmra.mrb[108].mxu0 %v5121_v37  ;;  %v483_v37 = vld [vmem:[%s8696_s1 + $0x3f8] sm:$0xff]  ;;  %v5147_v44 = vcombine.low %v471_v14, %v475_v15 }
 0x10e   : > { %2112 = vmatmul.mubr.bf16.gmra.mrb[108].mxu1 %v5123_v41  ;;  %1958 = vmatprep.mubr.bf16.mxu0 %v5130_v42 }
 0x10f   : > { %v6841_v51 = vadd.f32 %v5485_v50, %v5373_v47  ;;  %2119 = vmatprep.mubr.bf16.mxu1 %v5132_v46  ;;  %v5156_v50 = vcombine.high %v479_v36, %v483_v37 }
 0x110   : > { %v5374_v54 = vpop.f32.mrb[4].mxu0 }
 0x111   : > { %v5486_v57 = vpop.f32.mrb[4].mxu1  ;;  %v5375_v58 = vpop.f32.mrb[5].mxu0 }
 0x112   : > { %v5376_v60 = vadd.f32 %v5375_v58, %v5374_v54  ;;  %v5487_v61 = vpop.f32.mrb[5].mxu1  ;;  %v5377_v62 = vpop.f32.mrb[6].mxu0 }
 0x113   : > { %v5488_v1 = vadd.f32 %v5487_v61, %v5486_v57  ;;  %v5489_v2 = vpop.f32.mrb[6].mxu1  ;;  %v5378_v3 = vpop.f32.mrb[7].mxu0 }
 0x114   : > { %v5379_v5 = vadd.f32 %v5378_v3, %v5377_v62  ;;  %v5490_v6 = vpop.f32.mrb[7].mxu1 }
 0x115   : > { %v6855_v7 = vadd.f32 %v5488_v1, %v5376_v60  ;;  %v5491_v8 = vadd.f32 %v5490_v6, %v5489_v2  ;;  %1959 = vmatmul.mubr.bf16.gmra.mrb[112].mxu0 %v5129_v59  ;;  %v5153_v60 = vcombine.low %v478_v33, %v482_v34 }
 0x116   : > { %2120 = vmatmul.mubr.bf16.gmra.mrb[112].mxu1 %v5131_v63  ;;  %1966 = vmatprep.mubr.bf16.mxu0 %v5138_v0  ;;  %v5155_v0 = vcombine.low %v479_v36, %v483_v37 }
 0x117   : > { %v6857_v9 = vadd.f32 %v5491_v8, %v5379_v5  ;;  %2127 = vmatprep.mubr.bf16.mxu1 %v5140_v4 }
 0x118   : > { %v5380_v13 = vpop.f32.mrb[8].mxu0 }
 0x119   : > { %v5492_v16 = vpop.f32.mrb[8].mxu1  ;;  %v5381_v17 = vpop.f32.mrb[9].mxu0 }
 0x11a   : > { %v5382_v19 = vadd.f32 %v5381_v17, %v5380_v13  ;;  %v5493_v20 = vpop.f32.mrb[9].mxu1  ;;  %v5383_v21 = vpop.f32.mrb[10].mxu0 }
 0x11b   : > { %v5494_v24 = vadd.f32 %v5493_v20, %v5492_v16  ;;  %v5495_v25 = vpop.f32.mrb[10].mxu1  ;;  %v5384_v26 = vpop.f32.mrb[11].mxu0 }
 0x11c   : > { %v5385_v28 = vadd.f32 %v5384_v26, %v5383_v21  ;;  %v5496_v29 = vpop.f32.mrb[11].mxu1 }
 0x11d   : > { %v6873_v30 = vadd.f32 %v5494_v24, %v5382_v19  ;;  %v5497_v31 = vadd.f32 %v5496_v29, %v5495_v25  ;;  %1967 = vmatmul.mubr.bf16.gmra.mrb[116].mxu0 %v5137_v18 }
 0x11e   : > { %2128 = vmatmul.mubr.bf16.gmra.mrb[116].mxu1 %v5139_v22  ;;  %1974 = vmatprep.mubr.bf16.mxu0 %v5146_v23 }
 0x11f   : > { %v6875_v32 = vadd.f32 %v5497_v31, %v5385_v28  ;;  %2135 = vmatprep.mubr.bf16.mxu1 %v5148_v27 }
 0x120   : > { %v5386_v35 = vpop.f32.mrb[12].mxu0 }
 0x121   : > { %v5498_v38 = vpop.f32.mrb[12].mxu1  ;;  %v5387_v39 = vpop.f32.mrb[13].mxu0 }
 0x122   : > { %v5388_v41 = vadd.f32 %v5387_v39, %v5386_v35  ;;  %v5499_v42 = vpop.f32.mrb[13].mxu1  ;;  %v5389_v43 = vpop.f32.mrb[14].mxu0 }
 0x123   : > { %v5500_v46 = vadd.f32 %v5499_v42, %v5498_v38  ;;  %v5501_v47 = vpop.f32.mrb[14].mxu1  ;;  %v5390_v48 = vpop.f32.mrb[15].mxu0 }
 0x124   : > { %v5391_v52 = vadd.f32 %v5390_v48, %v5389_v43  ;;  %v5502_v53 = vpop.f32.mrb[15].mxu1 }
 0x125   : > { %v6889_v54 = vadd.f32 %v5500_v46, %v5388_v41  ;;  %v5503_v55 = vadd.f32 %v5502_v53, %v5501_v47  ;;  %1975 = vmatmul.mubr.bf16.gmra.mrb[120].mxu0 %v5145_v40 }
 0x126   : > { %2136 = vmatmul.mubr.bf16.gmra.mrb[120].mxu1 %v5147_v44  ;;  %1982 = vmatprep.mubr.bf16.mxu0 %v5154_v45 }
 0x127   : > { %v6891_v56 = vadd.f32 %v5503_v55, %v5391_v52  ;;  %2143 = vmatprep.mubr.bf16.mxu1 %v5156_v50 }
 0x128   : > { %v5392_v57 = vpop.f32.mrb[16].mxu0 }
 0x129   : > { %v5504_v58 = vpop.f32.mrb[16].mxu1  ;;  %v5393_v59 = vpop.f32.mrb[17].mxu0 }
 0x12a   : > { %v5394_v61 = vadd.f32 %v5393_v59, %v5392_v57  ;;  %v5505_v62 = vpop.f32.mrb[17].mxu1  ;;  %v5395_v63 = vpop.f32.mrb[18].mxu0 }
 0x12b   : > { %v5506_v1 = vadd.f32 %v5505_v62, %v5504_v58  ;;  %v5507_v2 = vpop.f32.mrb[18].mxu1  ;;  %v5396_v3 = vpop.f32.mrb[19].mxu0 }
 0x12c   : > { %v5397_v4 = vadd.f32 %v5396_v3, %v5395_v63  ;;  %v5508_v5 = vpop.f32.mrb[19].mxu1 }
 0x12d   : > { %v6893_v6 = vadd.f32 %v5506_v1, %v5394_v61  ;;  %v5509_v8 = vadd.f32 %v5508_v5, %v5507_v2  ;;  %1983 = vmatmul.mubr.bf16.gmra.mrb[124].mxu0 %v5153_v60 }
 0x12e   : > { %2144 = vmatmul.mubr.bf16.gmra.mrb[124].mxu1 %v5155_v0 }
 0x12f   : > { %v6895_v10 = vadd.f32 %v5509_v8, %v5397_v4 }
 0x130   : > { %v5398_v11 = vpop.f32.mrb[20].mxu0 }
 0x131   : > { %v5510_v13 = vpop.f32.mrb[20].mxu1  ;;  %v5399_v14 = vpop.f32.mrb[21].mxu0 }
 0x132   : > { %v5400_v15 = vadd.f32 %v5399_v14, %v5398_v11  ;;  %v5511_v16 = vpop.f32.mrb[21].mxu1  ;;  %v5401_v17 = vpop.f32.mrb[22].mxu0 }
 0x133   : > { %v5512_v18 = vadd.f32 %v5511_v16, %v5510_v13  ;;  %v5513_v19 = vpop.f32.mrb[22].mxu1  ;;  %v5402_v20 = vpop.f32.mrb[23].mxu0 }
 0x134   : > { %v5403_v21 = vadd.f32 %v5402_v20, %v5401_v17  ;;  %v5514_v22 = vpop.f32.mrb[23].mxu1 }
 0x135   : > { %v6897_v23 = vadd.f32 %v5512_v18, %v5400_v15  ;;  %v5515_v24 = vadd.f32 %v5514_v22, %v5513_v19 }
 0x137   : > { %v6899_v25 = vadd.f32 %v5515_v24, %v5403_v21 }
 0x138   : > { %v5404_v26 = vpop.f32.mrb[24].mxu0 }
 0x139   : > { %v5516_v27 = vpop.f32.mrb[24].mxu1  ;;  %v5405_v28 = vpop.f32.mrb[25].mxu0 }
 0x13a   : > { %v5406_v29 = vadd.f32 %v5405_v28, %v5404_v26  ;;  %v5517_v31 = vpop.f32.mrb[25].mxu1  ;;  %v5407_v33 = vpop.f32.mrb[26].mxu0 }
 0x13b   : > { %v5518_v34 = vadd.f32 %v5517_v31, %v5516_v27  ;;  %v5519_v35 = vpop.f32.mrb[26].mxu1  ;;  %v5408_v36 = vpop.f32.mrb[27].mxu0 }
 0x13c   : > { %v5409_v37 = vadd.f32 %v5408_v36, %v5407_v33  ;;  %v5520_v38 = vpop.f32.mrb[27].mxu1 }
 0x13d   : > { %v6901_v39 = vadd.f32 %v5518_v34, %v5406_v29  ;;  %v5521_v40 = vadd.f32 %v5520_v38, %v5519_v35 }
 0x13f   : > { %v6903_v41 = vadd.f32 %v5521_v40, %v5409_v37 }
 0x140   : > { %v5410_v42 = vpop.f32.mrb[28].mxu0 }
 0x141   : > { %v5522_v43 = vpop.f32.mrb[28].mxu1  ;;  %v5411_v44 = vpop.f32.mrb[29].mxu0 }
 0x142   : > { %v5412_v45 = vadd.f32 %v5411_v44, %v5410_v42  ;;  %v5523_v46 = vpop.f32.mrb[29].mxu1  ;;  %v5413_v47 = vpop.f32.mrb[30].mxu0 }
 0x143   : > { %v5524_v48 = vadd.f32 %v5523_v46, %v5522_v43  ;;  %v5525_v50 = vpop.f32.mrb[30].mxu1  ;;  %v5414_v52 = vpop.f32.mrb[31].mxu0 }
 0x144   : > { %v5415_v53 = vadd.f32 %v5414_v52, %v5413_v47  ;;  %v5526_v55 = vpop.f32.mrb[31].mxu1 }
 0x145   : > { %v6905_v57 = vadd.f32 %v5524_v48, %v5412_v45  ;;  %v5527_v58 = vadd.f32 %v5526_v55, %v5525_v50 }
 0x147   : > { %v6907_v59 = vadd.f32 %v5527_v58, %v5415_v53 }
 0x148   : > { %v5416_v60 = vpop.f32.mrb[32].mxu0 }
 0x149   : > { %v5528_v61 = vpop.f32.mrb[32].mxu1  ;;  %v5417_v62 = vpop.f32.mrb[33].mxu0 }
 0x14a   : > { %v5418_v63 = vadd.f32 %v5417_v62, %v5416_v60  ;;  %v5529_v0 = vpop.f32.mrb[33].mxu1  ;;  %v5419_v1 = vpop.f32.mrb[34].mxu0 }
 0x14b   : > { %v5530_v2 = vadd.f32 %v5529_v0, %v5528_v61  ;;  %v5531_v3 = vpop.f32.mrb[34].mxu1  ;;  %v5420_v4 = vpop.f32.mrb[35].mxu0 }
 0x14c   : > { %v5421_v5 = vadd.f32 %v5420_v4, %v5419_v1  ;;  %v5532_v8 = vpop.f32.mrb[35].mxu1 }
 0x14d   : > { %v6909_v11 = vadd.f32 %v5530_v2, %v5418_v63  ;;  %v5533_v13 = vadd.f32 %v5532_v8, %v5531_v3 }
 0x14f   : > { %v6911_v14 = vadd.f32 %v5533_v13, %v5421_v5 }
 0x150   : > { %v5422_v15 = vpop.f32.mrb[36].mxu0 }
 0x151   : > { %v5534_v16 = vpop.f32.mrb[36].mxu1  ;;  %v5423_v17 = vpop.f32.mrb[37].mxu0 }
 0x152   : > { %v5424_v18 = vadd.f32 %v5423_v17, %v5422_v15  ;;  %v5535_v19 = vpop.f32.mrb[37].mxu1  ;;  %v5425_v20 = vpop.f32.mrb[38].mxu0 }
 0x153   : > { %v5536_v21 = vadd.f32 %v5535_v19, %v5534_v16  ;;  %v5537_v22 = vpop.f32.mrb[38].mxu1  ;;  %v5426_v24 = vpop.f32.mrb[39].mxu0 }
 0x154   : > { %v5427_v26 = vadd.f32 %v5426_v24, %v5425_v20  ;;  %v5538_v27 = vpop.f32.mrb[39].mxu1 }
 0x155   : > { %v6913_v28 = vadd.f32 %v5536_v21, %v5424_v18  ;;  %v5539_v29 = vadd.f32 %v5538_v27, %v5537_v22 }
 0x157   : > { %v6915_v31 = vadd.f32 %v5539_v29, %v5427_v26 }
 0x158   : > { %v5428_v33 = vpop.f32.mrb[40].mxu0 }
 0x159   : > { %v5540_v34 = vpop.f32.mrb[40].mxu1  ;;  %v5429_v35 = vpop.f32.mrb[41].mxu0 }
 0x15a   : > { %v5430_v36 = vadd.f32 %v5429_v35, %v5428_v33  ;;  %v5541_v37 = vpop.f32.mrb[41].mxu1  ;;  %v5431_v38 = vpop.f32.mrb[42].mxu0 }
 0x15b   : > { %v5542_v40 = vadd.f32 %v5541_v37, %v5540_v34  ;;  %v5543_v42 = vpop.f32.mrb[42].mxu1  ;;  %v5432_v43 = vpop.f32.mrb[43].mxu0 }
 0x15c   : > { %v5433_v44 = vadd.f32 %v5432_v43, %v5431_v38  ;;  %v5544_v45 = vpop.f32.mrb[43].mxu1 }
 0x15d   : > { %v6917_v46 = vadd.f32 %v5542_v40, %v5430_v36  ;;  %v5545_v47 = vadd.f32 %v5544_v45, %v5543_v42 }
 0x15f   : > { %v6919_v48 = vadd.f32 %v5545_v47, %v5433_v44 }
 0x160   : > { %v5434_v50 = vpop.f32.mrb[44].mxu0 }
 0x161   : > { %v5546_v52 = vpop.f32.mrb[44].mxu1  ;;  %v5435_v53 = vpop.f32.mrb[45].mxu0 }
 0x162   : > { %v5436_v55 = vadd.f32 %v5435_v53, %v5434_v50  ;;  %v5547_v58 = vpop.f32.mrb[45].mxu1  ;;  %v5437_v60 = vpop.f32.mrb[46].mxu0 }
 0x163   : > { %v5548_v61 = vadd.f32 %v5547_v58, %v5546_v52  ;;  %v5549_v62 = vpop.f32.mrb[46].mxu1  ;;  %v5438_v63 = vpop.f32.mrb[47].mxu0 }
 0x164   : > { %v5439_v0 = vadd.f32 %v5438_v63, %v5437_v60  ;;  %v5550_v1 = vpop.f32.mrb[47].mxu1 }
 0x165   : > { %v6921_v2 = vadd.f32 %v5548_v61, %v5436_v55  ;;  %v5551_v3 = vadd.f32 %v5550_v1, %v5549_v62 }
 0x167   : > { %v6923_v4 = vadd.f32 %v5551_v3, %v5439_v0 }
 0x168   : > { %v5440_v5 = vpop.f32.mrb[48].mxu0 }
 0x169   : > { %v5552_v8 = vpop.f32.mrb[48].mxu1  ;;  %v5441_v13 = vpop.f32.mrb[49].mxu0 }
 0x16a   : > { %v5442_v15 = vadd.f32 %v5441_v13, %v5440_v5  ;;  %v5553_v16 = vpop.f32.mrb[49].mxu1  ;;  %v5443_v17 = vpop.f32.mrb[50].mxu0 }
 0x16b   : > { %v5554_v18 = vadd.f32 %v5553_v16, %v5552_v8  ;;  %v5555_v19 = vpop.f32.mrb[50].mxu1  ;;  %v5444_v20 = vpop.f32.mrb[51].mxu0 }
 0x16c   : > { %v5445_v21 = vadd.f32 %v5444_v20, %v5443_v17  ;;  %v5556_v22 = vpop.f32.mrb[51].mxu1 }
 0x16d   : > { %v6925_v24 = vadd.f32 %v5554_v18, %v5442_v15  ;;  %v5557_v26 = vadd.f32 %v5556_v22, %v5555_v19 }
 0x16f   : > { %v6927_v27 = vadd.f32 %v5557_v26, %v5445_v21 }
 0x170   : > { %v5446_v29 = vpop.f32.mrb[52].mxu0 }
 0x171   : > { %v5558_v33 = vpop.f32.mrb[52].mxu1  ;;  %v5447_v34 = vpop.f32.mrb[53].mxu0 }
 0x172   : > { %v5448_v35 = vadd.f32 %v5447_v34, %v5446_v29  ;;  %v5559_v36 = vpop.f32.mrb[53].mxu1  ;;  %v5449_v37 = vpop.f32.mrb[54].mxu0 }
 0x173   : > { %v5560_v38 = vadd.f32 %v5559_v36, %v5558_v33  ;;  %v5561_v40 = vpop.f32.mrb[54].mxu1  ;;  %v5450_v42 = vpop.f32.mrb[55].mxu0 }
 0x174   : > { %v5451_v43 = vadd.f32 %v5450_v42, %v5449_v37  ;;  %v5562_v44 = vpop.f32.mrb[55].mxu1 }
 0x175   : > { %v6929_v45 = vadd.f32 %v5560_v38, %v5448_v35  ;;  %v5563_v47 = vadd.f32 %v5562_v44, %v5561_v40 }
 0x177   : > { %v6931_v50 = vadd.f32 %v5563_v47, %v5451_v43 }
 0x178   : > { %v5452_v52 = vpop.f32.mrb[56].mxu0 }
 0x179   : > { %v5564_v53 = vpop.f32.mrb[56].mxu1  ;;  %v5453_v55 = vpop.f32.mrb[57].mxu0 }
 0x17a   : > { %v5454_v58 = vadd.f32 %v5453_v55, %v5452_v52  ;;  %v5565_v60 = vpop.f32.mrb[57].mxu1  ;;  %v5455_v61 = vpop.f32.mrb[58].mxu0 }
 0x17b   : > { %v5566_v62 = vadd.f32 %v5565_v60, %v5564_v53  ;;  %v5567_v63 = vpop.f32.mrb[58].mxu1  ;;  %v5456_v0 = vpop.f32.mrb[59].mxu0 }
 0x17c   : > { %v5457_v1 = vadd.f32 %v5456_v0, %v5455_v61  ;;  %v5568_v3 = vpop.f32.mrb[59].mxu1  ;;  %v6012_v0 = vld [vmem:[%s8697_s2 + $0x4] ss:$8 sps:$4 sm:$0xff]  }
 0x17d   : > { %v6933_v5 = vadd.f32 %v5566_v62, %v5454_v58  ;;  %v5569_v8 = vadd.f32 %v5568_v3, %v5567_v63  ;;  %3000 = vmatprep.mubr.bf16.mxu0 %v6012_v0 }
 0x17f   : > { %v6935_v13 = vadd.f32 %v5569_v8, %v5457_v1 }
 0x180   : > { %v5458_v15 = vpop.f32.mrb[60].mxu0 }
 0x181   : > { %v5570_v16 = vpop.f32.mrb[60].mxu1  ;;  %v5459_v17 = vpop.f32.mrb[61].mxu0 }
 0x182   : > { %v5460_v18 = vadd.f32 %v5459_v17, %v5458_v15  ;;  %v5571_v19 = vpop.f32.mrb[61].mxu1  ;;  %v5461_v20 = vpop.f32.mrb[62].mxu0 }
 0x183   : > { %v5572_v21 = vadd.f32 %v5571_v19, %v5570_v16  ;;  %v5573_v22 = vpop.f32.mrb[62].mxu1  ;;  %v5462_v26 = vpop.f32.mrb[63].mxu0 }
 0x184   : > { %v5463_v29 = vadd.f32 %v5462_v26, %v5461_v20  ;;  %v5574_v33 = vpop.f32.mrb[63].mxu1 }
 0x185   : > { %v6937_v34 = vadd.f32 %v5572_v21, %v5460_v18  ;;  %v5575_v35 = vadd.f32 %v5574_v33, %v5573_v22 }
 0x187   : > { %v6939_v36 = vadd.f32 %v5575_v35, %v5463_v29 }
 0x188   : > { %v5592_v37 = vpop.f32.mrb[64].mxu0 }
 0x189   : > { %v5704_v38 = vpop.f32.mrb[64].mxu1  ;;  %v5593_v40 = vpop.f32.mrb[65].mxu0 }
 0x18a   : > { %v5594_v42 = vadd.f32 %v5593_v40, %v5592_v37  ;;  %v5705_v43 = vpop.f32.mrb[65].mxu1  ;;  %v5595_v44 = vpop.f32.mrb[66].mxu0 }
 0x18b   : > { %v5706_v47 = vadd.f32 %v5705_v43, %v5704_v38  ;;  %v5707_v52 = vpop.f32.mrb[66].mxu1  ;;  %v5596_v53 = vpop.f32.mrb[67].mxu0 }
 0x18c   : > { %v1865_v55 = vadd.f32 %v5594_v42, %v6839_v49  ;;  %v5597_v58 = vadd.f32 %v5596_v53, %v5595_v44  ;;  %v5708_v60 = vpop.f32.mrb[67].mxu1 }
 0x18d   : > { %v5709_v61 = vadd.f32 %v5708_v60, %v5707_v52 }
 0x18e   : > { %v2026_v62 = vadd.f32 %v5706_v47, %v1865_v55  ;;  %v1868_v63 = vadd.f32 %v5597_v58, %v6841_v51 }
 0x190   : > { %v2029_v1 = vadd.f32 %v5709_v61, %v1868_v63  ;;  %v5598_v3 = vpop.f32.mrb[68].mxu0  ;;  %v2152_v16 = vmax.f32 %v2026_v62, 0.0 }
 0x191   : > { %v5710_v8 = vpop.f32.mrb[68].mxu1  ;;  %v5599_v15 = vpop.f32.mrb[69].mxu0 }
 0x192   : > { %v2153_v17 = vmax.f32 %v2029_v1, 0.0  ;;  %v5600_v18 = vadd.f32 %v5599_v15, %v5598_v3  ;;  %v5711_v19 = vpop.f32.mrb[69].mxu1  ;;  %v5601_v49 = vpop.f32.mrb[70].mxu0 }
 0x193   : > { %v5712_v20 = vadd.f32 %v5711_v19, %v5710_v8  ;;  %v5713_v21 = vpop.f32.mrb[70].mxu1  ;;  %v5602_v22 = vpop.f32.mrb[71].mxu0 }
 0x194   : > { %v2312_v26 = vpack.c.bf16 %v2153_v17, %v2152_v16  ;;  %v1873_v51 = vadd.f32 %v5600_v18, %v6855_v7  ;;  %v5603_v29 = vadd.f32 %v5602_v22, %v5601_v49  ;;  %v5714_v33 = vpop.f32.mrb[71].mxu1 }
 0x195   : > { %v5715_v35 = vadd.f32 %v5714_v33, %v5713_v21 }
 0x196   : > { %v2034_v37 = vadd.f32 %v5712_v20, %v1873_v51  ;;  %v1876_v38 = vadd.f32 %v5603_v29, %v6857_v9  ;;  %2969 = vmatpush1.bf16.msra.mxu0 %v2312_v26  ;;  %5904 = vmatpush1.bf16.msra.mxu1 %v2312_v26 }
 0x197   : > { %2970 = vmatprep.subr.bf16.mxu0 %v6358_v12  ;;  %5889 = vmatprep.subr.bf16.mxu1 %v6358_v12 }
 0x198   : > { %v2037_v40 = vadd.f32 %v5715_v35, %v1876_v38  ;;  %v5604_v42 = vpop.f32.mrb[72].mxu0  ;;  %v2154_v47 = vmax.f32 %v2034_v37, 0.0 }
 0x199   : > { %v5716_v43 = vpop.f32.mrb[72].mxu1  ;;  %v5605_v44 = vpop.f32.mrb[73].mxu0 }
 0x19a   : > { %v2155_v52 = vmax.f32 %v2037_v40, 0.0  ;;  %v5606_v53 = vadd.f32 %v5605_v44, %v5604_v42  ;;  %v5717_v7 = vpop.f32.mrb[73].mxu1  ;;  %v5607_v55 = vpop.f32.mrb[74].mxu0 }
 0x19b   : > { %v5718_v58 = vadd.f32 %v5717_v7, %v5716_v43  ;;  %v5719_v60 = vpop.f32.mrb[74].mxu1  ;;  %v5608_v61 = vpop.f32.mrb[75].mxu0 }
 0x19c   : > { %v2313_v62 = vpack.c.bf16 %v2155_v52, %v2154_v47  ;;  %v1881_v9 = vadd.f32 %v5606_v53, %v6873_v30  ;;  %v5609_v63 = vadd.f32 %v5608_v61, %v5607_v55  ;;  %v5720_v0 = vpop.f32.mrb[75].mxu1 }
 0x19d   : > { %v5721_v1 = vadd.f32 %v5720_v0, %v5719_v60 }
 0x19e   : > { %v2042_v3 = vadd.f32 %v5718_v58, %v1881_v9  ;;  %v1884_v8 = vadd.f32 %v5609_v63, %v6875_v32  ;;  %2971 = vmatpush1.bf16.msra.mxu0 %v2313_v62  ;;  %5905 = vmatpush1.bf16.msra.mxu1 %v2313_v62 }
 0x19f   : > { %2972 = vmatprep.subr.bf16.mxu0 %v6358_v12  ;;  %5890 = vmatprep.subr.bf16.mxu1 %v6358_v12 }
 0x1a0   : > { %v2045_v15 = vadd.f32 %v5721_v1, %v1884_v8  ;;  %v5610_v16 = vpop.f32.mrb[76].mxu0  ;;  %v2156_v19 = vmax.f32 %v2042_v3, 0.0 }
 0x1a1   : > { %v5722_v17 = vpop.f32.mrb[76].mxu1  ;;  %v5611_v18 = vpop.f32.mrb[77].mxu0 }
 0x1a2   : > { %v2157_v49 = vmax.f32 %v2045_v15, 0.0  ;;  %v5612_v20 = vadd.f32 %v5611_v18, %v5610_v16  ;;  %v5723_v30 = vpop.f32.mrb[77].mxu1  ;;  %v5613_v21 = vpop.f32.mrb[78].mxu0 }
 0x1a3   : > { %v5724_v22 = vadd.f32 %v5723_v30, %v5722_v17  ;;  %v5725_v26 = vpop.f32.mrb[78].mxu1  ;;  %v5614_v51 = vpop.f32.mrb[79].mxu0 }
 0x1a4   : > { %v2314_v29 = vpack.c.bf16 %v2157_v49, %v2156_v19  ;;  %v1889_v32 = vadd.f32 %v5612_v20, %v6889_v54  ;;  %v5615_v33 = vadd.f32 %v5614_v51, %v5613_v21  ;;  %v5726_v35 = vpop.f32.mrb[79].mxu1 }
 0x1a5   : > { %v5727_v37 = vadd.f32 %v5726_v35, %v5725_v26 }
 0x1a6   : > { %v2050_v38 = vadd.f32 %v5724_v22, %v1889_v32  ;;  %v1892_v40 = vadd.f32 %v5615_v33, %v6891_v56  ;;  %2973 = vmatpush1.bf16.msra.mxu0 %v2314_v29  ;;  %5906 = vmatpush1.bf16.msra.mxu1 %v2314_v29 }
 0x1a7   : > { %2974 = vmatprep.subr.bf16.mxu0 %v6358_v12  ;;  %5891 = vmatprep.subr.bf16.mxu1 %v6358_v12 }
 0x1a8   : > { %v2053_v42 = vadd.f32 %v5727_v37, %v1892_v40  ;;  %v5616_v43 = vpop.f32.mrb[80].mxu0  ;;  %v2158_v52 = vmax.f32 %v2050_v38, 0.0 }
 0x1a9   : > { %v5728_v44 = vpop.f32.mrb[80].mxu1  ;;  %v5617_v47 = vpop.f32.mrb[81].mxu0 }
 0x1aa   : > { %v2159_v53 = vmax.f32 %v2053_v42, 0.0  ;;  %v5618_v7 = vadd.f32 %v5617_v47, %v5616_v43  ;;  %v5729_v54 = vpop.f32.mrb[81].mxu1  ;;  %v5619_v55 = vpop.f32.mrb[82].mxu0 }
 0x1ab   : > { %v5730_v58 = vadd.f32 %v5729_v54, %v5728_v44  ;;  %v5731_v60 = vpop.f32.mrb[82].mxu1  ;;  %v5620_v61 = vpop.f32.mrb[83].mxu0 }
 0x1ac   : > { %v2315_v62 = vpack.c.bf16 %v2159_v53, %v2158_v52  ;;  %v1897_v56 = vadd.f32 %v5618_v7, %v6893_v6  ;;  %v5621_v9 = vadd.f32 %v5620_v61, %v5619_v55  ;;  %v5732_v63 = vpop.f32.mrb[83].mxu1 }
 0x1ad   : > { %v5733_v0 = vadd.f32 %v5732_v63, %v5731_v60 }
 0x1ae   : > { %v2058_v1 = vadd.f32 %v5730_v58, %v1897_v56  ;;  %v1900_v3 = vadd.f32 %v5621_v9, %v6895_v10  ;;  %2975 = vmatpush1.bf16.msra.mxu0 %v2315_v62  ;;  %5907 = vmatpush1.bf16.msra.mxu1 %v2315_v62 }
 0x1af   : > { %2976 = vmatprep.subr.bf16.mxu0 %v6358_v12  ;;  %5892 = vmatprep.subr.bf16.mxu1 %v6358_v12 }
 0x1b0   : > { %v2061_v8 = vadd.f32 %v5733_v0, %v1900_v3  ;;  %v5622_v15 = vpop.f32.mrb[84].mxu0  ;;  %v2160_v18 = vmax.f32 %v2058_v1, 0.0 }
 0x1b1   : > { %v5734_v16 = vpop.f32.mrb[84].mxu1  ;;  %v5623_v17 = vpop.f32.mrb[85].mxu0 }
 0x1b2   : > { %v2161_v19 = vmax.f32 %v2061_v8, 0.0  ;;  %v5624_v49 = vadd.f32 %v5623_v17, %v5622_v15  ;;  %v5735_v6 = vpop.f32.mrb[85].mxu1  ;;  %v5625_v20 = vpop.f32.mrb[86].mxu0 }
 0x1b3   : > { %v5736_v30 = vadd.f32 %v5735_v6, %v5734_v16  ;;  %v5737_v21 = vpop.f32.mrb[86].mxu1  ;;  %v5626_v22 = vpop.f32.mrb[87].mxu0 }
 0x1b4   : > { %v2316_v26 = vpack.c.bf16 %v2161_v19, %v2160_v18  ;;  %v1905_v10 = vadd.f32 %v5624_v49, %v6897_v23  ;;  %v5627_v51 = vadd.f32 %v5626_v22, %v5625_v20  ;;  %v5738_v29 = vpop.f32.mrb[87].mxu1 }
 0x1b5   : > { %v5739_v32 = vadd.f32 %v5738_v29, %v5737_v21 }
 0x1b6   : > { %v2066_v33 = vadd.f32 %v5736_v30, %v1905_v10  ;;  %v1908_v35 = vadd.f32 %v5627_v51, %v6899_v25  ;;  %2977 = vmatpush1.bf16.msra.mxu0 %v2316_v26  ;;  %5908 = vmatpush1.bf16.msra.mxu1 %v2316_v26 }
 0x1b7   : > { %2978 = vmatprep.subr.bf16.mxu0 %v6358_v12  ;;  %5893 = vmatprep.subr.bf16.mxu1 %v6358_v12 }
 0x1b8   : > { %v2069_v37 = vadd.f32 %v5739_v32, %v1908_v35  ;;  %v5628_v38 = vpop.f32.mrb[88].mxu0  ;;  %v2162_v43 = vmax.f32 %v2066_v33, 0.0 }
 0x1b9   : > { %v5740_v40 = vpop.f32.mrb[88].mxu1  ;;  %v5629_v42 = vpop.f32.mrb[89].mxu0 }
 0x1ba   : > { %v2163_v44 = vmax.f32 %v2069_v37, 0.0  ;;  %v5630_v47 = vadd.f32 %v5629_v42, %v5628_v38  ;;  %v5741_v23 = vpop.f32.mrb[89].mxu1  ;;  %v5631_v52 = vpop.f32.mrb[90].mxu0 }
 0x1bb   : > { %v5742_v53 = vadd.f32 %v5741_v23, %v5740_v40  ;;  %v5743_v7 = vpop.f32.mrb[90].mxu1  ;;  %v5632_v54 = vpop.f32.mrb[91].mxu0 }
 0x1bc   : > { %v2317_v55 = vpack.c.bf16 %v2163_v44, %v2162_v43  ;;  %v1913_v25 = vadd.f32 %v5630_v47, %v6901_v39  ;;  %v5633_v58 = vadd.f32 %v5632_v54, %v5631_v52  ;;  %v5744_v60 = vpop.f32.mrb[91].mxu1 }
 0x1bd   : > { %v5745_v61 = vadd.f32 %v5744_v60, %v5743_v7 }
 0x1be   : > { %v2074_v62 = vadd.f32 %v5742_v53, %v1913_v25  ;;  %v1916_v56 = vadd.f32 %v5633_v58, %v6903_v41  ;;  %2979 = vmatpush1.bf16.msra.mxu0 %v2317_v55  ;;  %5909 = vmatpush1.bf16.msra.mxu1 %v2317_v55 }
 0x1bf   : > { %2980 = vmatprep.subr.bf16.mxu0 %v6358_v12  ;;  %5894 = vmatprep.subr.bf16.mxu1 %v6358_v12 }
 0x1c0   : > { %v2077_v9 = vadd.f32 %v5745_v61, %v1916_v56  ;;  %v5634_v63 = vpop.f32.mrb[92].mxu0  ;;  %v2164_v3 = vmax.f32 %v2074_v62, 0.0 }
 0x1c1   : > { %v5746_v0 = vpop.f32.mrb[92].mxu1  ;;  %v5635_v1 = vpop.f32.mrb[93].mxu0 }
 0x1c2   : > { %v2165_v8 = vmax.f32 %v2077_v9, 0.0  ;;  %v5636_v15 = vadd.f32 %v5635_v1, %v5634_v63  ;;  %v5747_v39 = vpop.f32.mrb[93].mxu1  ;;  %v5637_v16 = vpop.f32.mrb[94].mxu0 }
 0x1c3   : > { %v5748_v17 = vadd.f32 %v5747_v39, %v5746_v0  ;;  %v5749_v18 = vpop.f32.mrb[94].mxu1  ;;  %v5638_v19 = vpop.f32.mrb[95].mxu0 }
 0x1c4   : > { %v2318_v49 = vpack.c.bf16 %v2165_v8, %v2164_v3  ;;  %v1921_v41 = vadd.f32 %v5636_v15, %v6905_v57  ;;  %v5639_v6 = vadd.f32 %v5638_v19, %v5637_v16  ;;  %v5750_v20 = vpop.f32.mrb[95].mxu1 }
 0x1c5   : > { %v5751_v30 = vadd.f32 %v5750_v20, %v5749_v18 }
 0x1c6   : > { %v2082_v21 = vadd.f32 %v5748_v17, %v1921_v41  ;;  %v1924_v22 = vadd.f32 %v5639_v6, %v6907_v59  ;;  %2981 = vmatpush1.bf16.msra.mxu0 %v2318_v49  ;;  %5910 = vmatpush1.bf16.msra.mxu1 %v2318_v49 }
 0x1c7   : > { %2982 = vmatprep.subr.bf16.mxu0 %v6358_v12  ;;  %5895 = vmatprep.subr.bf16.mxu1 %v6358_v12 }
 0x1c8   : > { %v2085_v26 = vadd.f32 %v5751_v30, %v1924_v22  ;;  %v5640_v10 = vpop.f32.mrb[96].mxu0  ;;  %v2166_v32 = vmax.f32 %v2082_v21, 0.0 }
 0x1c9   : > { %v5752_v51 = vpop.f32.mrb[96].mxu1  ;;  %v5641_v29 = vpop.f32.mrb[97].mxu0 }
 0x1ca   : > { %v2167_v33 = vmax.f32 %v2085_v26, 0.0  ;;  %v5642_v35 = vadd.f32 %v5641_v29, %v5640_v10  ;;  %v5753_v57 = vpop.f32.mrb[97].mxu1  ;;  %v5643_v37 = vpop.f32.mrb[98].mxu0 }
 0x1cb   : > { %v5754_v38 = vadd.f32 %v5753_v57, %v5752_v51  ;;  %v5755_v40 = vpop.f32.mrb[98].mxu1  ;;  %v5644_v42 = vpop.f32.mrb[99].mxu0 }
 0x1cc   : > { %v2319_v43 = vpack.c.bf16 %v2167_v33, %v2166_v32  ;;  %v1929_v59 = vadd.f32 %v5642_v35, %v6909_v11  ;;  %v5645_v44 = vadd.f32 %v5644_v42, %v5643_v37  ;;  %v5756_v47 = vpop.f32.mrb[99].mxu1 }
 0x1cd   : > { %v5757_v23 = vadd.f32 %v5756_v47, %v5755_v40 }
 0x1ce   : > { %v2090_v52 = vadd.f32 %v5754_v38, %v1929_v59  ;;  %v1932_v53 = vadd.f32 %v5645_v44, %v6911_v14  ;;  %2983 = vmatpush1.bf16.msra.mxu0 %v2319_v43  ;;  %5911 = vmatpush1.bf16.msra.mxu1 %v2319_v43 }
 0x1cf   : > { %2984 = vmatprep.subr.bf16.mxu0 %v6358_v12  ;;  %5896 = vmatprep.subr.bf16.mxu1 %v6358_v12 }
 0x1d0   : > { %v2093_v7 = vadd.f32 %v5757_v23, %v1932_v53  ;;  %v5646_v54 = vpop.f32.mrb[100].mxu0  ;;  %v2168_v58 = vmax.f32 %v2090_v52, 0.0 }
 0x1d1   : > { %v5758_v55 = vpop.f32.mrb[100].mxu1  ;;  %v5647_v25 = vpop.f32.mrb[101].mxu0 }
 0x1d2   : > { %v2169_v60 = vmax.f32 %v2093_v7, 0.0  ;;  %v5648_v61 = vadd.f32 %v5647_v25, %v5646_v54  ;;  %v5759_v11 = vpop.f32.mrb[101].mxu1  ;;  %v5649_v62 = vpop.f32.mrb[102].mxu0 }
 0x1d3   : > { %v5760_v56 = vadd.f32 %v5759_v11, %v5758_v55  ;;  %v5761_v9 = vpop.f32.mrb[102].mxu1  ;;  %v5650_v63 = vpop.f32.mrb[103].mxu0 }
 0x1d4   : > { %v2320_v0 = vpack.c.bf16 %v2169_v60, %v2168_v58  ;;  %v1937_v14 = vadd.f32 %v5648_v61, %v6913_v28  ;;  %v5651_v1 = vadd.f32 %v5650_v63, %v5649_v62  ;;  %v5762_v3 = vpop.f32.mrb[103].mxu1 }
 0x1d5   : > { %v5763_v8 = vadd.f32 %v5762_v3, %v5761_v9 }
 0x1d6   : > { %v2098_v15 = vadd.f32 %v5760_v56, %v1937_v14  ;;  %v1940_v39 = vadd.f32 %v5651_v1, %v6915_v31  ;;  %2985 = vmatpush1.bf16.msra.mxu0 %v2320_v0  ;;  %5912 = vmatpush1.bf16.msra.mxu1 %v2320_v0 }
 0x1d7   : > { %2986 = vmatprep.subr.bf16.mxu0 %v6358_v12  ;;  %5897 = vmatprep.subr.bf16.mxu1 %v6358_v12 }
 0x1d8   : > { %v2101_v16 = vadd.f32 %v5763_v8, %v1940_v39  ;;  %v5652_v17 = vpop.f32.mrb[104].mxu0  ;;  %v2170_v49 = vmax.f32 %v2098_v15, 0.0 }
 0x1d9   : > { %v5764_v18 = vpop.f32.mrb[104].mxu1  ;;  %v5653_v19 = vpop.f32.mrb[105].mxu0 }
 0x1da   : > { %v2171_v41 = vmax.f32 %v2101_v16, 0.0  ;;  %v5654_v6 = vadd.f32 %v5653_v19, %v5652_v17  ;;  %v5765_v28 = vpop.f32.mrb[105].mxu1  ;;  %v5655_v20 = vpop.f32.mrb[106].mxu0 }
 0x1db   : > { %v5766_v30 = vadd.f32 %v5765_v28, %v5764_v18  ;;  %v5767_v21 = vpop.f32.mrb[106].mxu1  ;;  %v5656_v22 = vpop.f32.mrb[107].mxu0 }
 0x1dc   : > { %v2321_v26 = vpack.c.bf16 %v2171_v41, %v2170_v49  ;;  %v1945_v31 = vadd.f32 %v5654_v6, %v6917_v46  ;;  %v5657_v10 = vadd.f32 %v5656_v22, %v5655_v20  ;;  %v5768_v51 = vpop.f32.mrb[107].mxu1 }
 0x1dd   : > { %v5769_v29 = vadd.f32 %v5768_v51, %v5767_v21 }
 0x1de   : > { %v2106_v32 = vadd.f32 %v5766_v30, %v1945_v31  ;;  %v1948_v33 = vadd.f32 %v5657_v10, %v6919_v48  ;;  %2987 = vmatpush1.bf16.msra.mxu0 %v2321_v26  ;;  %5913 = vmatpush1.bf16.msra.mxu1 %v2321_v26 }
 0x1df   : > { %2988 = vmatprep.subr.bf16.mxu0 %v6358_v12  ;;  %5898 = vmatprep.subr.bf16.mxu1 %v6358_v12 }
 0x1e0   : > { %v2109_v35 = vadd.f32 %v5769_v29, %v1948_v33  ;;  %v5658_v57 = vpop.f32.mrb[108].mxu0  ;;  %v2172_v40 = vmax.f32 %v2106_v32, 0.0 }
 0x1e1   : > { %v5770_v37 = vpop.f32.mrb[108].mxu1  ;;  %v5659_v38 = vpop.f32.mrb[109].mxu0 }
 0x1e2   : > { %v2173_v42 = vmax.f32 %v2109_v35, 0.0  ;;  %v5660_v43 = vadd.f32 %v5659_v38, %v5658_v57  ;;  %v5771_v46 = vpop.f32.mrb[109].mxu1  ;;  %v5661_v59 = vpop.f32.mrb[110].mxu0 }
 0x1e3   : > { %v5772_v44 = vadd.f32 %v5771_v46, %v5770_v37  ;;  %v5773_v47 = vpop.f32.mrb[110].mxu1  ;;  %v5662_v23 = vpop.f32.mrb[111].mxu0 }
 0x1e4   : > { %v2322_v52 = vpack.c.bf16 %v2173_v42, %v2172_v40  ;;  %v1953_v48 = vadd.f32 %v5660_v43, %v6921_v2  ;;  %v5663_v53 = vadd.f32 %v5662_v23, %v5661_v59  ;;  %v5774_v7 = vpop.f32.mrb[111].mxu1 }
 0x1e5   : > { %v5775_v54 = vadd.f32 %v5774_v7, %v5773_v47 }
 0x1e6   : > { %v2114_v55 = vadd.f32 %v5772_v44, %v1953_v48  ;;  %v1956_v25 = vadd.f32 %v5663_v53, %v6923_v4  ;;  %2989 = vmatpush1.bf16.msra.mxu0 %v2322_v52  ;;  %5914 = vmatpush1.bf16.msra.mxu1 %v2322_v52 }
 0x1e7   : > { %2990 = vmatprep.subr.bf16.mxu0 %v6358_v12  ;;  %5899 = vmatprep.subr.bf16.mxu1 %v6358_v12 }
 0x1e8   : > { %v2117_v58 = vadd.f32 %v5775_v54, %v1956_v25  ;;  %v5664_v60 = vpop.f32.mrb[112].mxu0  ;;  %v2174_v62 = vmax.f32 %v2114_v55, 0.0 }
 0x1e9   : > { %v5776_v61 = vpop.f32.mrb[112].mxu1  ;;  %v5665_v11 = vpop.f32.mrb[113].mxu0 }
 0x1ea   : > { %v2175_v56 = vmax.f32 %v2117_v58, 0.0  ;;  %v5666_v9 = vadd.f32 %v5665_v11, %v5664_v60  ;;  %v5777_v2 = vpop.f32.mrb[113].mxu1  ;;  %v5667_v63 = vpop.f32.mrb[114].mxu0 }
 0x1eb   : > { %v5778_v0 = vadd.f32 %v5777_v2, %v5776_v61  ;;  %v5779_v14 = vpop.f32.mrb[114].mxu1  ;;  %v5668_v1 = vpop.f32.mrb[115].mxu0 }
 0x1ec   : > { %v2323_v3 = vpack.c.bf16 %v2175_v56, %v2174_v62  ;;  %v1961_v4 = vadd.f32 %v5666_v9, %v6925_v24  ;;  %v5669_v8 = vadd.f32 %v5668_v1, %v5667_v63  ;;  %v5780_v15 = vpop.f32.mrb[115].mxu1 }
 0x1ed   : > { %v5781_v39 = vadd.f32 %v5780_v15, %v5779_v14 }
 0x1ee   : > { %v2122_v16 = vadd.f32 %v5778_v0, %v1961_v4  ;;  %v1964_v17 = vadd.f32 %v5669_v8, %v6927_v27  ;;  %2991 = vmatpush1.bf16.msra.mxu0 %v2323_v3  ;;  %5915 = vmatpush1.bf16.msra.mxu1 %v2323_v3 }
 0x1ef   : > { %2992 = vmatprep.subr.bf16.mxu0 %v6358_v12  ;;  %5900 = vmatprep.subr.bf16.mxu1 %v6358_v12 }
 0x1f0   : > { %v2125_v18 = vadd.f32 %v5781_v39, %v1964_v17  ;;  %v5670_v19 = vpop.f32.mrb[116].mxu0  ;;  %v2176_v6 = vmax.f32 %v2122_v16, 0.0 }
 0x1f1   : > { %v5782_v49 = vpop.f32.mrb[116].mxu1  ;;  %v5671_v41 = vpop.f32.mrb[117].mxu0 }
 0x1f2   : > { %v2177_v28 = vmax.f32 %v2125_v18, 0.0  ;;  %v5672_v20 = vadd.f32 %v5671_v41, %v5670_v19  ;;  %v5783_v24 = vpop.f32.mrb[117].mxu1  ;;  %v5673_v30 = vpop.f32.mrb[118].mxu0  ;;  %v6016_v18 = vld [vmem:[%s8697_s2 + $0x24] ss:$8 sps:$4 sm:$0xff]  }
 0x1f3   : > { %v5784_v21 = vadd.f32 %v5783_v24, %v5782_v49  ;;  %v5785_v22 = vpop.f32.mrb[118].mxu1  ;;  %v5674_v26 = vpop.f32.mrb[119].mxu0  ;;  %v6018_v19 = vld [vmem:[%s8697_s2 + $0x20] ss:$8 sps:$4 sm:$0xff]   ;;  %v6019_v49 = vld [vmem:[%s8697_s2 + $0x34] ss:$8 sps:$4 sm:$0xff]  }
 0x1f4   : > { %v2324_v31 = vpack.c.bf16 %v2177_v28, %v2176_v6  ;;  %v1969_v27 = vadd.f32 %v5672_v20, %v6929_v45  ;;  %v5675_v10 = vadd.f32 %v5674_v26, %v5673_v30  ;;  %v5786_v51 = vpop.f32.mrb[119].mxu1  ;;  %v6021_v41 = vld [vmem:[%s8697_s2 + $0x30] ss:$8 sps:$4 sm:$0xff]   ;;  %v6022_v6 = vld [vmem:[%s8697_s2 + $0x44] ss:$8 sps:$4 sm:$0xff]  }
 0x1f5   : > { %v5787_v29 = vadd.f32 %v5786_v51, %v5785_v22  ;;  %v6024_v28 = vld [vmem:[%s8697_s2 + $0x40] ss:$8 sps:$4 sm:$0xff]   ;;  %v6025_v20 = vld [vmem:[%s8697_s2 + $0x54] ss:$8 sps:$4 sm:$0xff]   ;;  %v6027_v24 = vld [vmem:[%s8697_s2 + $0x50] ss:$8 sps:$4 sm:$0xff]  }
 0x1f6   : > { %v2130_v32 = vadd.f32 %v5784_v21, %v1969_v27  ;;  %v1972_v33 = vadd.f32 %v5675_v10, %v6931_v50  ;;  %2993 = vmatpush1.bf16.msra.mxu0 %v2324_v31  ;;  %5916 = vmatpush1.bf16.msra.mxu1 %v2324_v31  ;;  %v6028_v30 = vld [vmem:[%s8697_s2 + $0x64] ss:$8 sps:$4 sm:$0xff]   ;;  %v6030_v21 = vld [vmem:[%s8697_s2 + $0x60] ss:$8 sps:$4 sm:$0xff]   ;;  %v6031_v22 = vld [vmem:[%s8697_s2 + $0x74] ss:$8 sps:$4 sm:$0xff]  }
 0x1f7   : > { %2994 = vmatprep.subr.bf16.mxu0 %v6358_v12  ;;  %5901 = vmatprep.subr.bf16.mxu1 %v6358_v12  ;;  %v6033_v26 = vld [vmem:[%s8697_s2 + $0x70] ss:$8 sps:$4 sm:$0xff]   ;;  %v6034_v31 = vld [vmem:[%s8697_s2 + $0x84] ss:$8 sps:$4 sm:$0xff]   ;;  %v6036_v27 = vld [vmem:[%s8697_s2 + $0x80] ss:$8 sps:$4 sm:$0xff]  }
 0x1f8   : > { %v2133_v35 = vadd.f32 %v5787_v29, %v1972_v33  ;;  %v5676_v57 = vpop.f32.mrb[120].mxu0  ;;  %v2178_v40 = vmax.f32 %v2130_v32, 0.0  ;;  %v6037_v10 = vld [vmem:[%s8697_s2 + $0x94] ss:$8 sps:$4 sm:$0xff]   ;;  %v6039_v51 = vld [vmem:[%s8697_s2 + $0x90] ss:$8 sps:$4 sm:$0xff]  }
 0x1f9   : > { %v5788_v37 = vpop.f32.mrb[120].mxu1  ;;  %v5677_v38 = vpop.f32.mrb[121].mxu0  ;;  %v6040_v29 = vld [vmem:[%s8697_s2 + $0xa4] ss:$8 sps:$4 sm:$0xff]   ;;  %v6042_v32 = vld [vmem:[%s8697_s2 + $0xa0] ss:$8 sps:$4 sm:$0xff]  }
 0x1fa   : > { %v2179_v42 = vmax.f32 %v2133_v35, 0.0  ;;  %v5678_v43 = vadd.f32 %v5677_v38, %v5676_v57  ;;  %v5789_v45 = vpop.f32.mrb[121].mxu1  ;;  %v5679_v46 = vpop.f32.mrb[122].mxu0  ;;  %v6043_v33 = vld [vmem:[%s8697_s2 + $0xb4] ss:$8 sps:$4 sm:$0xff]  }
 0x1fb   : > { %v5790_v59 = vadd.f32 %v5789_v45, %v5788_v37  ;;  %v5791_v44 = vpop.f32.mrb[122].mxu1  ;;  %v5680_v47 = vpop.f32.mrb[123].mxu0  ;;  %v6093_v35 = vld [vmem:[%s8697_s2 + $0x274] ss:$8 sps:$4 sm:$0xff]   ;;  %v6091_v57 = vld [vmem:[%s8697_s2 + $0x270] ss:$8 sps:$4 sm:$0xff]  }
 0x1fc   : > { %v2325_v23 = vpack.c.bf16 %v2179_v42, %v2178_v40  ;;  %v1977_v50 = vadd.f32 %v5678_v43, %v6933_v5  ;;  %v5681_v52 = vadd.f32 %v5680_v47, %v5679_v46  ;;  %v5792_v48 = vpop.f32.mrb[123].mxu1  ;;  %3312 = vmatprep.mubr.bf16.mxu1 %v6093_v35  ;;  %v6045_v37 = vld [vmem:[%s8697_s2 + $0xb0] ss:$8 sps:$4 sm:$0xff]   ;;  %v6046_v38 = vld [vmem:[%s8697_s2 + $0xc4] ss:$8 sps:$4 sm:$0xff]  }
 0x1fd   : > { %v5793_v53 = vadd.f32 %v5792_v48, %v5791_v44  ;;  %v6097_v40 = vld [vmem:[%s8697_s2 + $0x284] ss:$8 sps:$4 sm:$0xff]   ;;  %v6099_v42 = vld [vmem:[%s8697_s2 + $0x280] ss:$8 sps:$4 sm:$0xff]   ;;  %v6049_v45 = vld [vmem:[%s8697_s2 + $0xd4] ss:$8 sps:$4 sm:$0xff]  }
 0x1fe   : > { %v2138_v7 = vadd.f32 %v5790_v59, %v1977_v50  ;;  %v1980_v54 = vadd.f32 %v5681_v52, %v6935_v13  ;;  %2995 = vmatpush1.bf16.msra.mxu0 %v2325_v23  ;;  %5917 = vmatpush1.bf16.msra.mxu1 %v2325_v23  ;;  %v6048_v43 = vld [vmem:[%s8697_s2 + $0xc0] ss:$8 sps:$4 sm:$0xff]   ;;  %v6103_v46 = vld [vmem:[%s8697_s2 + $0x294] ss:$8 sps:$4 sm:$0xff]   ;;  %v6105_v59 = vld [vmem:[%s8697_s2 + $0x290] ss:$8 sps:$4 sm:$0xff]  }
 0x1ff   : > { %2996 = vmatprep.subr.bf16.mxu0 %v6358_v12  ;;  %5902 = vmatprep.subr.bf16.mxu1 %v6358_v12  ;;  %v6051_v44 = vld [vmem:[%s8697_s2 + $0xd0] ss:$8 sps:$4 sm:$0xff]   ;;  %v6052_v47 = vld [vmem:[%s8697_s2 + $0xe4] ss:$8 sps:$4 sm:$0xff]   ;;  %v6111_v50 = vld [vmem:[%s8697_s2 + $0x2a0] ss:$8 sps:$4 sm:$0xff]  }
 0x200   : > { %v2141_v55 = vadd.f32 %v5793_v53, %v1980_v54  ;;  %v5682_v25 = vpop.f32.mrb[124].mxu0  ;;  %v2180_v61 = vmax.f32 %v2138_v7, 0.0  ;;  %v6109_v23 = vld [vmem:[%s8697_s2 + $0x2a4] ss:$8 sps:$4 sm:$0xff]   ;;  %v6054_v52 = vld [vmem:[%s8697_s2 + $0xe0] ss:$8 sps:$4 sm:$0xff]  }
 0x201   : > { %v5794_v58 = vpop.f32.mrb[124].mxu1  ;;  %v5683_v60 = vpop.f32.mrb[125].mxu0  ;;  %v6055_v48 = vld [vmem:[%s8697_s2 + $0xf4] ss:$8 sps:$4 sm:$0xff]   ;;  %v6117_v7 = vld [vmem:[%s8697_s2 + $0x2b0] ss:$8 sps:$4 sm:$0xff]  }
 0x202   : > { %v2181_v11 = vmax.f32 %v2141_v55, 0.0  ;;  %v5684_v62 = vadd.f32 %v5683_v60, %v5682_v25  ;;  %v5795_v5 = vpop.f32.mrb[125].mxu1  ;;  %v5685_v56 = vpop.f32.mrb[126].mxu0  ;;  %v6115_v53 = vld [vmem:[%s8697_s2 + $0x2b4] ss:$8 sps:$4 sm:$0xff]  }
 0x203   : > { %v5796_v9 = vadd.f32 %v5795_v5, %v5794_v58  ;;  %v5797_v2 = vpop.f32.mrb[126].mxu1  ;;  %v5686_v63 = vpop.f32.mrb[127].mxu0  ;;  %v6057_v54 = vld [vmem:[%s8697_s2 + $0xf0] ss:$8 sps:$4 sm:$0xff]   ;;  %v6058_v55 = vld [vmem:[%s8697_s2 + $0x104] ss:$8 sps:$4 sm:$0xff]  }
 0x204   : > { %v2326_v0 = vpack.c.bf16 %v2181_v11, %v2180_v61  ;;  %v1985_v13 = vadd.f32 %v5684_v62, %v6937_v34  ;;  %v5687_v14 = vadd.f32 %v5686_v63, %v5685_v56  ;;  %v5798_v1 = vpop.f32.mrb[127].mxu1  ;;  %v6010_v34 = vld [vmem:[%s8697_s2] ss:$8 sps:$4 sm:$0xff]   ;;  %v6121_v25 = vld [vmem:[%s8697_s2 + $0x2c4] ss:$8 sps:$4 sm:$0xff]  }
 0x205   : > { %v5799_v3 = vadd.f32 %v5798_v1, %v5797_v2  ;;  %v6123_v58 = vld [vmem:[%s8697_s2 + $0x2c0] ss:$8 sps:$4 sm:$0xff]   ;;  %v6061_v61 = vld [vmem:[%s8697_s2 + $0x114] ss:$8 sps:$4 sm:$0xff]   ;;  %v6129_v62 = vld [vmem:[%s8697_s2 + $0x2d0] ss:$8 sps:$4 sm:$0xff]  }
 0x206   : > { %v2146_v4 = vadd.f32 %v5796_v9, %v1985_v13  ;;  %v1988_v8 = vadd.f32 %v5687_v14, %v6939_v36  ;;  %2997 = vmatpush1.bf16.msra.mxu0 %v2326_v0  ;;  %5918 = vmatpush1.bf16.msra.mxu1 %v2326_v0  ;;  %v6013_v36 = vld [vmem:[%s8697_s2 + $0x14] ss:$8 sps:$4 sm:$0xff]   ;;  %v6060_v60 = vld [vmem:[%s8697_s2 + $0x100] ss:$8 sps:$4 sm:$0xff]   ;;  %v6063_v5 = vld [vmem:[%s8697_s2 + $0x110] ss:$8 sps:$4 sm:$0xff]  }
 0x207   : > { %2998 = vmatprep.subr.bf16.mxu0 %v6358_v12  ;;  %5903 = vmatprep.subr.bf16.mxu1 %v6358_v12  ;;  %v6015_v12 = vld [vmem:[%s8697_s2 + $0x10] ss:$8 sps:$4 sm:$0xff]   ;;  %v6127_v11 = vld [vmem:[%s8697_s2 + $0x2d4] ss:$8 sps:$4 sm:$0xff]   ;;  %v6064_v56 = vld [vmem:[%s8697_s2 + $0x124] ss:$8 sps:$4 sm:$0xff]  }
 0x208   : > { %v2149_v15 = vadd.f32 %v5799_v3, %v1988_v8  ;;  %v2182_v39 = vmax.f32 %v2146_v4, 0.0  ;;  %v6133_v9 = vld [vmem:[%s8697_s2 + $0x2e4] ss:$8 sps:$4 sm:$0xff]   ;;  %v6135_v2 = vld [vmem:[%s8697_s2 + $0x2e0] ss:$8 sps:$4 sm:$0xff]  }
 0x209   : > { %v6066_v63 = vld [vmem:[%s8697_s2 + $0x120] ss:$8 sps:$4 sm:$0xff]   ;;  %v6067_v0 = vld [vmem:[%s8697_s2 + $0x134] ss:$8 sps:$4 sm:$0xff]   ;;  %v6141_v14 = vld [vmem:[%s8697_s2 + $0x2f0] ss:$8 sps:$4 sm:$0xff]  }
 0x20a   : > { %v2183_v16 = vmax.f32 %v2149_v15, 0.0  ;;  %v6139_v13 = vld [vmem:[%s8697_s2 + $0x2f4] ss:$8 sps:$4 sm:$0xff]   ;;  %v6069_v1 = vld [vmem:[%s8697_s2 + $0x130] ss:$8 sps:$4 sm:$0xff]  }
 0x20b   : > { %v6070_v3 = vld [vmem:[%s8697_s2 + $0x144] ss:$8 sps:$4 sm:$0xff]   ;;  %v6147_v8 = vld [vmem:[%s8697_s2 + $0x300] ss:$8 sps:$4 sm:$0xff]   ;;  %v6175_v35 = vld [vmem:[%s8697_s2 + $0x374] ss:$8 sps:$4 sm:$0xff]  }
 0x20c   : > { %v2327_v17 = vpack.c.bf16 %v2183_v16, %v2182_v39  ;;  %v6145_v4 = vld [vmem:[%s8697_s2 + $0x304] ss:$8 sps:$4 sm:$0xff]   ;;  %v6072_v15 = vld [vmem:[%s8697_s2 + $0x140] ss:$8 sps:$4 sm:$0xff]   ;;  %v6073_v39 = vld [vmem:[%s8697_s2 + $0x154] ss:$8 sps:$4 sm:$0xff]  }
 0x20d   : > { %v6151_v16 = vld [vmem:[%s8697_s2 + $0x314] ss:$8 sps:$4 sm:$0xff]  }
 0x20e   : > { %2999 = vmatpush1.bf16.msra.mxu0 %v2327_v17  ;;  %5919 = vmatpush1.bf16.msra.mxu1 %v2327_v17  ;;  %v6153_v17 = vld [vmem:[%s8697_s2 + $0x310] ss:$8 sps:$4 sm:$0xff]  }
 0x211   : > { %3001 = vmatmul.mubr.bf16.vlgmr.msra.gmra.mrb[128].mxu0 %v6010_v34  ;;  %3313 = vmatmul.mubr.bf16.vlgmr.msra.gmra.mrb[128].mxu1 %v6091_v57  ;;  %v6075_v34 = vld [vmem:[%s8697_s2 + $0x150] ss:$8 sps:$4 sm:$0xff]   ;;  %v6270_v57 = vld [vmem:[%s6433_s30] sm:$0xff]  }
 0x212   : > { %3008 = vmatprep.mubr.bf16.mxu0 %v6013_v36  ;;  %3320 = vmatprep.mubr.bf16.mxu1 %v6097_v40  ;;  %v6076_v36 = vld [vmem:[%s8697_s2 + $0x164] ss:$8 sps:$4 sm:$0xff]   ;;  %v3770_v40 = vunpack.c.h.bf16 %v6270_v57 }
 0x219   : > { %3009 = vmatmul.mubr.bf16.gmra.mrb[132].mxu0 %v6015_v12  ;;  %3321 = vmatmul.mubr.bf16.gmra.mrb[132].mxu1 %v6099_v42  ;;  %v6157_v12 = vld [vmem:[%s8697_s2 + $0x324] ss:$8 sps:$4 sm:$0xff]  }
 0x21a   : > { %3016 = vmatprep.mubr.bf16.mxu0 %v6016_v18  ;;  %3328 = vmatprep.mubr.bf16.mxu1 %v6103_v46  ;;  %v6159_v18 = vld [vmem:[%s8697_s2 + $0x320] ss:$8 sps:$4 sm:$0xff]  }
 0x221   : > { %3017 = vmatmul.mubr.bf16.gmra.mrb[136].mxu0 %v6018_v19  ;;  %3329 = vmatmul.mubr.bf16.gmra.mrb[136].mxu1 %v6105_v59  ;;  %v6078_v19 = vld [vmem:[%s8697_s2 + $0x160] ss:$8 sps:$4 sm:$0xff]   ;;  %v6096_v59 = vld [vmem:[%s8697_s2 + $0x1b0] ss:$8 sps:$4 sm:$0xff]  }
 0x222   : > { %3024 = vmatprep.mubr.bf16.mxu0 %v6019_v49  ;;  %3336 = vmatprep.mubr.bf16.mxu1 %v6109_v23  ;;  %v6079_v49 = vld [vmem:[%s8697_s2 + $0x174] ss:$8 sps:$4 sm:$0xff]   ;;  %v3898_v23 = vmul.f32 0.5, %v3770_v40  ;;  %v6198_v40 = vld [vmem:[%s8697_s2 + $0x3e0] ss:$8 sps:$4 sm:$0xff]  }
 0x229   : > { %3025 = vmatmul.mubr.bf16.gmra.mrb[140].mxu0 %v6021_v41  ;;  %3337 = vmatmul.mubr.bf16.gmra.mrb[140].mxu1 %v6111_v50  ;;  %v6163_v41 = vld [vmem:[%s8697_s2 + $0x334] ss:$8 sps:$4 sm:$0xff]  }
 0x22a   : > { %3032 = vmatprep.mubr.bf16.mxu0 %v6022_v6  ;;  %3344 = vmatprep.mubr.bf16.mxu1 %v6115_v53  ;;  %v6165_v6 = vld [vmem:[%s8697_s2 + $0x330] ss:$8 sps:$4 sm:$0xff]   ;;  %v6178_v53 = vld [vmem:[%s8697_s2 + $0x384] ss:$8 sps:$4 sm:$0xff]  }
 0x231   : > { %3033 = vmatmul.mubr.bf16.gmra.mrb[144].mxu0 %v6024_v28  ;;  %3345 = vmatmul.mubr.bf16.gmra.mrb[144].mxu1 %v6117_v7  ;;  %v6081_v28 = vld [vmem:[%s8697_s2 + $0x170] ss:$8 sps:$4 sm:$0xff]  }
 0x232   : > { %3040 = vmatprep.mubr.bf16.mxu0 %v6025_v20  ;;  %3352 = vmatprep.mubr.bf16.mxu1 %v6121_v25  ;;  %v6082_v20 = vld [vmem:[%s8697_s2 + $0x184] ss:$8 sps:$4 sm:$0xff]  }
 0x239   : > { %3041 = vmatmul.mubr.bf16.gmra.mrb[148].mxu0 %v6027_v24  ;;  %3353 = vmatmul.mubr.bf16.gmra.mrb[148].mxu1 %v6123_v58  ;;  %v6166_v24 = vld [vmem:[%s8697_s2 + $0x344] ss:$8 sps:$4 sm:$0xff]  }
 0x23a   : > { %3048 = vmatprep.mubr.bf16.mxu0 %v6028_v30  ;;  %3360 = vmatprep.mubr.bf16.mxu1 %v6127_v11  ;;  %v6168_v30 = vld [vmem:[%s8697_s2 + $0x340] ss:$8 sps:$4 sm:$0xff]  }
 0x241   : > { %3049 = vmatmul.mubr.bf16.gmra.mrb[152].mxu0 %v6030_v21  ;;  %3361 = vmatmul.mubr.bf16.gmra.mrb[152].mxu1 %v6129_v62  ;;  %v6084_v21 = vld [vmem:[%s8697_s2 + $0x180] ss:$8 sps:$4 sm:$0xff]   ;;  %v6106_v62 = vld [vmem:[%s8697_s2 + $0x1d4] ss:$8 sps:$4 sm:$0xff]  }
 0x242   : > { %3056 = vmatprep.mubr.bf16.mxu0 %v6031_v22  ;;  %3368 = vmatprep.mubr.bf16.mxu1 %v6133_v9  ;;  %v6085_v22 = vld [vmem:[%s8697_s2 + $0x194] ss:$8 sps:$4 sm:$0xff]   ;;  %v6183_v9 = vld [vmem:[%s8697_s2 + $0x390] ss:$8 sps:$4 sm:$0xff]  }
 0x249   : > { %3057 = vmatmul.mubr.bf16.gmra.mrb[156].mxu0 %v6033_v26  ;;  %3369 = vmatmul.mubr.bf16.gmra.mrb[156].mxu1 %v6135_v2  ;;  %v6169_v26 = vld [vmem:[%s8697_s2 + $0x354] ss:$8 sps:$4 sm:$0xff]  }
 0x24a   : > { %3064 = vmatprep.mubr.bf16.mxu0 %v6034_v31  ;;  %3376 = vmatprep.mubr.bf16.mxu1 %v6139_v13  ;;  %v6171_v31 = vld [vmem:[%s8697_s2 + $0x350] ss:$8 sps:$4 sm:$0xff]  }
 0x251   : > { %3065 = vmatmul.mubr.bf16.gmra.mrb[160].mxu0 %v6036_v27  ;;  %3377 = vmatmul.mubr.bf16.gmra.mrb[160].mxu1 %v6141_v14  ;;  %v6087_v27 = vld [vmem:[%s8697_s2 + $0x190] ss:$8 sps:$4 sm:$0xff]   ;;  %v6112_v14 = vld [vmem:[%s8697_s2 + $0x1e4] ss:$8 sps:$4 sm:$0xff]  }
 0x252   : > { %3072 = vmatprep.mubr.bf16.mxu0 %v6037_v10  ;;  %3384 = vmatprep.mubr.bf16.mxu1 %v6145_v4  ;;  %v6088_v10 = vld [vmem:[%s8697_s2 + $0x1a4] ss:$8 sps:$4 sm:$0xff]   ;;  %v6186_v4 = vld [vmem:[%s8697_s2 + $0x3a0] ss:$8 sps:$4 sm:$0xff]  }
 0x259   : > { %3073 = vmatmul.mubr.bf16.gmra.mrb[164].mxu0 %v6039_v51  ;;  %3385 = vmatmul.mubr.bf16.gmra.mrb[164].mxu1 %v6147_v8  ;;  %v6172_v51 = vld [vmem:[%s8697_s2 + $0x364] ss:$8 sps:$4 sm:$0xff]  }
 0x25a   : > { %3080 = vmatprep.mubr.bf16.mxu0 %v6040_v29  ;;  %3392 = vmatprep.mubr.bf16.mxu1 %v6151_v16  ;;  %v6174_v29 = vld [vmem:[%s8697_s2 + $0x360] ss:$8 sps:$4 sm:$0xff]  }
 0x261   : > { %3081 = vmatmul.mubr.bf16.gmra.mrb[168].mxu0 %v6042_v32  ;;  %3393 = vmatmul.mubr.bf16.gmra.mrb[168].mxu1 %v6153_v17  ;;  %v6090_v32 = vld [vmem:[%s8697_s2 + $0x1a0] ss:$8 sps:$4 sm:$0xff]   ;;  %v6118_v17 = vld [vmem:[%s8697_s2 + $0x1f4] ss:$8 sps:$4 sm:$0xff]  }
 0x262   : > { %3088 = vmatprep.mubr.bf16.mxu0 %v6043_v33  ;;  %3400 = vmatprep.mubr.bf16.mxu1 %v6157_v12  ;;  %v6094_v33 = vld [vmem:[%s8697_s2 + $0x1b4] ss:$8 sps:$4 sm:$0xff]   ;;  %v6189_v12 = vld [vmem:[%s8697_s2 + $0x3b0] ss:$8 sps:$4 sm:$0xff]  }
 0x269   : > { %3089 = vmatmul.mubr.bf16.gmra.mrb[172].mxu0 %v6045_v37  ;;  %3401 = vmatmul.mubr.bf16.gmra.mrb[172].mxu1 %v6159_v18  ;;  %v3769_v37 = vunpack.c.l.bf16 %v6270_v57  ;;  %v6138_v57 = vld [vmem:[%s8697_s2 + $0x224] ss:$8 sps:$4 sm:$0xff]  }
 0x26a   : > { %3096 = vmatprep.mubr.bf16.mxu0 %v6046_v38  ;;  %3408 = vmatprep.mubr.bf16.mxu1 %v6163_v41  ;;  %v6177_v38 = vld [vmem:[%s8697_s2 + $0x370] ss:$8 sps:$4 sm:$0xff]  }
 0x271   : > { %3097 = vmatmul.mubr.bf16.gmra.mrb[176].mxu0 %v6048_v43  ;;  %3409 = vmatmul.mubr.bf16.gmra.mrb[176].mxu1 %v6165_v6  ;;  %v3897_v43 = vmul.f32 0.5, %v3769_v37  ;;  %v6126_v6 = vld [vmem:[%s8697_s2 + $0x204] ss:$8 sps:$4 sm:$0xff]  }
 0x272   : > { %3104 = vmatprep.mubr.bf16.mxu0 %v6049_v45  ;;  %3416 = vmatprep.mubr.bf16.mxu1 %v6166_v24  ;;  %v6192_v24 = vld [vmem:[%s8697_s2 + $0x3c0] ss:$8 sps:$4 sm:$0xff]  }
 0x279   : > { %3105 = vmatmul.mubr.bf16.gmra.mrb[180].mxu0 %v6051_v44  ;;  %3417 = vmatmul.mubr.bf16.gmra.mrb[180].mxu1 %v6168_v30 }
 0x27a   : > { %3112 = vmatprep.mubr.bf16.mxu0 %v6052_v47  ;;  %3424 = vmatprep.mubr.bf16.mxu1 %v6169_v26  ;;  %v6100_v47 = vld [vmem:[%s8697_s2 + $0x1c4] ss:$8 sps:$4 sm:$0xff]  }
 0x281   : > { %3113 = vmatmul.mubr.bf16.gmra.mrb[184].mxu0 %v6054_v52  ;;  %3425 = vmatmul.mubr.bf16.gmra.mrb[184].mxu1 %v6171_v31  ;;  %v6132_v31 = vld [vmem:[%s8697_s2 + $0x214] ss:$8 sps:$4 sm:$0xff]  }
 0x282   : > { %3120 = vmatprep.mubr.bf16.mxu0 %v6055_v48  ;;  %3432 = vmatprep.mubr.bf16.mxu1 %v6172_v51  ;;  %v6195_v51 = vld [vmem:[%s8697_s2 + $0x3d0] ss:$8 sps:$4 sm:$0xff]  }
 0x289   : > { %3121 = vmatmul.mubr.bf16.gmra.mrb[188].mxu0 %v6057_v54  ;;  %3433 = vmatmul.mubr.bf16.gmra.mrb[188].mxu1 %v6174_v29 }
 0x28a   : > { %3128 = vmatprep.mubr.bf16.mxu0 %v6058_v55  ;;  %3440 = vmatprep.mubr.bf16.mxu1 %v6175_v35  ;;  %v6180_v55 = vld [vmem:[%s8697_s2 + $0x380] ss:$8 sps:$4 sm:$0xff]  }
 0x291   : > { %3129 = vmatmul.mubr.bf16.gmra.mrb[192].mxu0 %v6060_v60  ;;  %3441 = vmatmul.mubr.bf16.gmra.mrb[192].mxu1 %v6177_v38  ;;  %v6196_v38 = vld [vmem:[%s8697_s2 + $0x3e4] ss:$8 sps:$4 sm:$0xff]  }
 0x292   : > { %3136 = vmatprep.mubr.bf16.mxu0 %v6061_v61  ;;  %3448 = vmatprep.mubr.bf16.mxu1 %v6178_v53  ;;  %v6102_v61 = vld [vmem:[%s8697_s2 + $0x1c0] ss:$8 sps:$4 sm:$0xff]  }
 0x299   : > { %3137 = vmatmul.mubr.bf16.gmra.mrb[196].mxu0 %v6063_v5  ;;  %3449 = vmatmul.mubr.bf16.gmra.mrb[196].mxu1 %v6180_v55 }
 0x29a   : > { %3144 = vmatprep.mubr.bf16.mxu0 %v6064_v56  ;;  %v6181_v56 = vld [vmem:[%s8697_s2 + $0x394] ss:$8 sps:$4 sm:$0xff]  }
 0x29b   : > { %3456 = vmatprep.mubr.bf16.mxu1 %v6181_v56 }
 0x2a1   : > { %3145 = vmatmul.mubr.bf16.gmra.mrb[200].mxu0 %v6066_v63  ;;  %3457 = vmatmul.mubr.bf16.gmra.mrb[200].mxu1 %v6183_v9 }
 0x2a2   : > { %3152 = vmatprep.mubr.bf16.mxu0 %v6067_v0  ;;  %v6108_v0 = vld [vmem:[%s8697_s2 + $0x1d0] ss:$8 sps:$4 sm:$0xff]  }
 0x2a9   : > { %3153 = vmatmul.mubr.bf16.gmra.mrb[204].mxu0 %v6069_v1 }
 0x2aa   : > { %3160 = vmatprep.mubr.bf16.mxu0 %v6070_v3  ;;  %v6184_v3 = vld [vmem:[%s8697_s2 + $0x3a4] ss:$8 sps:$4 sm:$0xff]  }
 0x2ab   : > { %3464 = vmatprep.mubr.bf16.mxu1 %v6184_v3 }
 0x2ac   : > { %3465 = vmatmul.mubr.bf16.gmra.mrb[204].mxu1 %v6186_v4 }
 0x2b1   : > { %3161 = vmatmul.mubr.bf16.gmra.mrb[208].mxu0 %v6072_v15 }
 0x2b2   : > { %3168 = vmatprep.mubr.bf16.mxu0 %v6073_v39  ;;  %v6114_v39 = vld [vmem:[%s8697_s2 + $0x1e0] ss:$8 sps:$4 sm:$0xff]  }
 0x2b9   : > { %3169 = vmatmul.mubr.bf16.gmra.mrb[212].mxu0 %v6075_v34 }
 0x2ba   : > { %3176 = vmatprep.mubr.bf16.mxu0 %v6076_v36  ;;  %v6187_v36 = vld [vmem:[%s8697_s2 + $0x3b4] ss:$8 sps:$4 sm:$0xff]  }
 0x2bb   : > { %3472 = vmatprep.mubr.bf16.mxu1 %v6187_v36  ;;  %v6148_v36 = vld [vmem:[%s8697_s2 + $0x240] ss:$8 sps:$4 sm:$0xff]  }
 0x2bc   : > { %3473 = vmatmul.mubr.bf16.gmra.mrb[208].mxu1 %v6189_v12 }
 0x2c1   : > { %3177 = vmatmul.mubr.bf16.gmra.mrb[216].mxu0 %v6078_v19 }
 0x2c2   : > { %3184 = vmatprep.mubr.bf16.mxu0 %v6079_v49  ;;  %v6120_v49 = vld [vmem:[%s8697_s2 + $0x1f0] ss:$8 sps:$4 sm:$0xff]  }
 0x2c9   : > { %3185 = vmatmul.mubr.bf16.gmra.mrb[220].mxu0 %v6081_v28 }
 0x2ca   : > { %3192 = vmatprep.mubr.bf16.mxu0 %v6082_v20  ;;  %v6190_v20 = vld [vmem:[%s8697_s2 + $0x3c4] ss:$8 sps:$4 sm:$0xff]  }
 0x2cb   : > { %3480 = vmatprep.mubr.bf16.mxu1 %v6190_v20 }
 0x2cc   : > { %3481 = vmatmul.mubr.bf16.gmra.mrb[212].mxu1 %v6192_v24 }
 0x2d1   : > { %3193 = vmatmul.mubr.bf16.gmra.mrb[224].mxu0 %v6084_v21 }
 0x2d2   : > { %3200 = vmatprep.mubr.bf16.mxu0 %v6085_v22  ;;  %v6124_v22 = vld [vmem:[%s8697_s2 + $0x200] ss:$8 sps:$4 sm:$0xff]  }
 0x2d9   : > { %3201 = vmatmul.mubr.bf16.gmra.mrb[228].mxu0 %v6087_v27 }
 0x2da   : > { %3208 = vmatprep.mubr.bf16.mxu0 %v6088_v10  ;;  %v6193_v10 = vld [vmem:[%s8697_s2 + $0x3d4] ss:$8 sps:$4 sm:$0xff]  }
 0x2db   : > { %3488 = vmatprep.mubr.bf16.mxu1 %v6193_v10 }
 0x2dc   : > { %3489 = vmatmul.mubr.bf16.gmra.mrb[216].mxu1 %v6195_v51 }
 0x2dd   : > { %3496 = vmatprep.mubr.bf16.mxu1 %v6196_v38 }
 0x2e1   : > { %3209 = vmatmul.mubr.bf16.gmra.mrb[232].mxu0 %v6090_v32 }
 0x2e2   : > { %3216 = vmatprep.mubr.bf16.mxu0 %v6094_v33  ;;  %v6130_v33 = vld [vmem:[%s8697_s2 + $0x210] ss:$8 sps:$4 sm:$0xff]  }
 0x2e4   : > { %v3002_v42 = vpop.f32.mrb[128].mxu0  ;;  %3497 = vmatmul.mubr.bf16.gmra.mrb[220].mxu1 %v6198_v40 }
 0x2e5   : > { %v3513_v45 = vmax.f32 %v3002_v42, 0.0  ;;  %v3004_v46 = vpop.f32.mrb[129].mxu0 }
 0x2e6   : > { %v3005_v44 = vpop.f32.mrb[130].mxu0 }
 0x2e7   : > { %v3641_v50 = vmul.f32 0.5, %v3513_v45  ;;  %v3514_v52 = vmax.f32 %v3005_v44, 0.0  ;;  %v3007_v48 = vpop.f32.mrb[131].mxu0  ;;  %v6136_v45 = vld [vmem:[%s8697_s2 + $0x220] ss:$8 sps:$4 sm:$0xff]  }
 0x2e9   : > { %v7280_v7 = vadd.f32 %v3897_v43, %v3641_v50  ;;  %v3642_v54 = vmul.f32 0.5, %v3514_v52  ;;  %3217 = vmatmul.mubr.bf16.gmra.mrb[236].mxu0 %v6096_v59  ;;  %v6144_v59 = vld [vmem:[%s8697_s2 + $0x234] ss:$8 sps:$4 sm:$0xff]   ;;  %v6201_v52 = vld [vmem:[%s8697_s2 + $0x3f0] ss:$8 sps:$4 sm:$0xff]  }
 0x2ea   : > { %3224 = vmatprep.mubr.bf16.mxu0 %v6100_v47  ;;  %v6199_v47 = vld [vmem:[%s8697_s2 + $0x3f4] ss:$8 sps:$4 sm:$0xff]  }
 0x2eb   : > { %8788 = vst [vmem:[#allocation2_spill] sm:$0xff] %v7280_v7  ;;  %v7285_v25 = vadd.f32 %v3898_v23, %v3642_v54  ;;  %v6271_v23 = vld [vmem:[%s6433_s30 + $0x40] sm:$0xff]   ;;  %3504 = vmatprep.mubr.bf16.mxu1 %v6199_v47  ;;  %v4153_v47 = vmul.f32 %v7280_v7, %v7280_v7 }
 0x2ec   : > { %v7287_v58 = vpop.f32.mrb[132].mxu0  ;;  %v3785_v50 = vunpack.c.l.bf16 %v6271_v23  ;;  %v3786_v48 = vunpack.c.h.bf16 %v6271_v23  ;;  %3505 = vmatmul.mubr.bf16.gmra.mrb[224].mxu1 %v6201_v52  ;;  %v6274_v23 = vld [vmem:[%s6433_s30 + $0x18] sm:$0xff]  }
 0x2ed   : > { %8789 = vst [vmem:[#allocation3_spill] sm:$0xff] %v7285_v25  ;;  %v3012_v60 = vpop.f32.mrb[133].mxu0  ;;  %v4154_v38 = vmul.f32 %v7285_v25, %v7285_v25 }
 0x2ee   : > { %v7292_v11 = vpop.f32.mrb[134].mxu0  ;;  %v3913_v54 = vmul.f32 0.5, %v3785_v50  ;;  %v3914_v56 = vmul.f32 0.5, %v3786_v48  ;;  %v3775_v50 = vunpack.c.l.bf16 %v6274_v23 }
 0x2ef   : > { %v3015_v5 = vpop.f32.mrb[135].mxu0  ;;  %v3516_v20 = vmax.f32 %v7292_v11, 0.0 }
 0x2f0   : > { %v6150_v5 = vld [vmem:[%s8697_s2 + $0x244] ss:$8 sps:$4 sm:$0xff]  }
 0x2f1   : > { %3225 = vmatmul.mubr.bf16.gmra.mrb[240].mxu0 %v6102_v61  ;;  %v6142_v61 = vld [vmem:[%s8697_s2 + $0x230] ss:$8 sps:$4 sm:$0xff]   ;;  %v3644_v10 = vmul.f32 0.5, %v3516_v20 }
 0x2f2   : > { %3232 = vmatprep.mubr.bf16.mxu0 %v6106_v62 }
 0x2f4   : > { %v7303_v2 = vpop.f32.mrb[136].mxu0 }
 0x2f5   : > { %v3020_v63 = vpop.f32.mrb[137].mxu0 }
 0x2f6   : > { %v7308_v13 = vpop.f32.mrb[138].mxu0 }
 0x2f7   : > { %v3023_v1 = vpop.f32.mrb[139].mxu0 }
 0x2f9   : > { %3233 = vmatmul.mubr.bf16.gmra.mrb[244].mxu0 %v6108_v0 }
 0x2fa   : > { %3240 = vmatprep.mubr.bf16.mxu0 %v6112_v14 }
 0x2fc   : > { %v7319_v8 = vpop.f32.mrb[140].mxu0 }
 0x2fd   : > { %v3028_v15 = vpop.f32.mrb[141].mxu0 }
 0x2fe   : > { %v7324_v16 = vpop.f32.mrb[142].mxu0  ;;  %v3515_v15 = vmax.f32 %v7287_v58, 0.0  ;;  %v6273_v58 = vld [vmem:[%s6433_s30 + $0x10] sm:$0xff]  }
 0x2ff   : > { %v3031_v34 = vpop.f32.mrb[143].mxu0 }
 0x301   : > { %3241 = vmatmul.mubr.bf16.gmra.mrb[248].mxu0 %v6114_v39  ;;  %v6272_v39 = vld [vmem:[%s6433_s30 + $0x8] sm:$0xff]  }
 0x302   : > { %3248 = vmatprep.mubr.bf16.mxu0 %v6118_v17  ;;  %v3771_v17 = vunpack.c.l.bf16 %v6272_v39  ;;  %v3772_v24 = vunpack.c.h.bf16 %v6272_v39 }
 0x304   : > { %v7335_v18 = vpop.f32.mrb[144].mxu0  ;;  %v3900_v51 = vmul.f32 0.5, %v3772_v24 }
 0x305   : > { %v3036_v19 = vpop.f32.mrb[145].mxu0  ;;  %v3521_v24 = vmax.f32 %v7335_v18, 0.0 }
 0x306   : > { %v7340_v41 = vpop.f32.mrb[146].mxu0  ;;  %v6156_v19 = vld [vmem:[%s8697_s2 + $0x254] ss:$8 sps:$4 sm:$0xff]  }
 0x307   : > { %v3039_v28 = vpop.f32.mrb[147].mxu0 }
 0x308   : > { %v3899_v28 = vmul.f32 0.5, %v3771_v17  ;;  %v6160_v17 = vld [vmem:[%s8697_s2 + $0x260] ss:$8 sps:$4 sm:$0xff]  }
 0x309   : > { %3249 = vmatmul.mubr.bf16.gmra.mrb[252].mxu0 %v6120_v49 }
 0x30a   : > { %3256 = vmatprep.mubr.bf16.mxu0 %v6126_v6  ;;  %v3643_v6 = vmul.f32 0.5, %v3515_v15  ;;  %v3520_v15 = vmax.f32 %v7324_v16, 0.0 }
 0x30c   : > { %v7351_v30 = vpop.f32.mrb[148].mxu0 }
 0x30d   : > { %v3044_v21 = vpop.f32.mrb[149].mxu0 }
 0x30e   : > { %v7356_v26 = vpop.f32.mrb[150].mxu0  ;;  %v3773_v21 = vunpack.c.l.bf16 %v6273_v58 }
 0x30f   : > { %v3047_v27 = vpop.f32.mrb[151].mxu0 }
 0x310   : > { %v7427_v27 = vadd.f32 %v3899_v28, %v3643_v6  ;;  %v3901_v11 = vmul.f32 0.5, %v3773_v21 }
 0x311   : > { %3257 = vmatmul.mubr.bf16.gmra.mrb[0].mxu0 %v6124_v22  ;;  %v3517_v22 = vmax.f32 %v7303_v2, 0.0  ;;  %v7437_v2 = vpop.f32.mrb[128].mxu1 }
 0x312   : > { %3264 = vmatprep.mubr.bf16.mxu0 %v6132_v31  ;;  %8792 = vst [vmem:[#allocation6_spill] sm:$0xff] %v7427_v27  ;;  %v4155_v48 = vmul.f32 %v7427_v27, %v7427_v27 }
 0x313   : > { %v3645_v40 = vmul.f32 0.5, %v3517_v22 }
 0x314   : > { %v7367_v29 = vpop.f32.mrb[152].mxu0 }
 0x315   : > { %v3052_v32 = vpop.f32.mrb[153].mxu0 }
 0x316   : > { %v7372_v35 = vpop.f32.mrb[154].mxu0 }
 0x317   : > { %v3055_v37 = vpop.f32.mrb[155].mxu0 }
 0x318   : > { %v6162_v37 = vld [vmem:[%s8697_s2 + $0x264] ss:$8 sps:$4 sm:$0xff]  }
 0x319   : > { %3265 = vmatmul.mubr.bf16.gmra.mrb[4].mxu0 %v6130_v33  ;;  %v6154_v33 = vld [vmem:[%s8697_s2 + $0x250] ss:$8 sps:$4 sm:$0xff]  }
 0x31a   : > { %3272 = vmatprep.mubr.bf16.mxu0 %v6138_v57 }
 0x31c   : > { %v7383_v42 = vpop.f32.mrb[156].mxu0 }
 0x31d   : > { %v3060_v43 = vpop.f32.mrb[157].mxu0 }
 0x31e   : > { %v7388_v46 = vpop.f32.mrb[158].mxu0  ;;  %v3518_v43 = vmax.f32 %v7308_v13, 0.0 }
 0x31f   : > { %v3063_v44 = vpop.f32.mrb[159].mxu0 }
 0x320   : > { %v3316_v44 = vpop.f32.mrb[129].mxu1 }
 0x321   : > { %3273 = vmatmul.mubr.bf16.gmra.mrb[8].mxu0 %v6136_v45  ;;  %v3774_v45 = vunpack.c.h.bf16 %v6273_v58  ;;  %v7445_v52 = vpop.f32.mrb[130].mxu1  ;;  %v6276_v44 = vld [vmem:[%s6433_s30 + $0x28] sm:$0xff]  }
 0x322   : > { %3280 = vmatprep.mubr.bf16.mxu0 %v6144_v59  ;;  %v3319_v13 = vpop.f32.mrb[131].mxu1 }
 0x323   : > { %v7468_v6 = vpop.f32.mrb[132].mxu1 }
 0x324   : > { %v3066_v53 = vpop.f32.mrb[160].mxu0  ;;  %v3324_v58 = vpop.f32.mrb[133].mxu1 }
 0x325   : > { %v3529_v55 = vmax.f32 %v3066_v53, 0.0  ;;  %v3068_v60 = vpop.f32.mrb[161].mxu0  ;;  %v7449_v53 = vadd.f32 %v3900_v51, %v3644_v10  ;;  %v7475_v22 = vpop.f32.mrb[134].mxu1 }
 0x326   : > { %v3069_v62 = vpop.f32.mrb[162].mxu0  ;;  %v7453_v60 = vadd.f32 %v3901_v11, %v3645_v40  ;;  %v3327_v11 = vpop.f32.mrb[135].mxu1 }
 0x327   : > { %v3657_v9 = vmul.f32 0.5, %v3529_v55  ;;  %v3530_v63 = vmax.f32 %v3069_v62, 0.0  ;;  %v3071_v0 = vpop.f32.mrb[163].mxu0  ;;  %8793 = vst [vmem:[#allocation7_spill] sm:$0xff] %v7449_v53  ;;  %v4283_v55 = vsel %vm4281_vm0, %v4154_v38, 0.0  ;;  %v3902_v62 = vmul.f32 0.5, %v3774_v45 }
 0x328   : > { %8794 = vst [vmem:[#allocation8_spill] sm:$0xff] %v7453_v60  ;;  %v4285_v0 = vsel %vm4281_vm0, %v4155_v48, 0.0  ;;  %v4157_v28 = vmul.f32 %v7453_v60, %v7453_v60  ;;  %v3522_v45 = vmax.f32 %v7340_v41, 0.0 }
 0x329   : > { %v7406_v14 = vadd.f32 %v3913_v54, %v3657_v9  ;;  %v3658_v1 = vmul.f32 0.5, %v3530_v63  ;;  %3281 = vmatmul.mubr.bf16.gmra.mrb[12].mxu0 %v6142_v61  ;;  %v3519_v54 = vmax.f32 %v7319_v8, 0.0  ;;  %v3646_v61 = vmul.f32 0.5, %v3518_v43 }
 0x32a   : > { %3288 = vmatprep.mubr.bf16.mxu0 %v6150_v5  ;;  %v4282_v5 = vsel %vm4281_vm0, %v4153_v47, 0.0  ;;  %v3776_v9 = vunpack.c.h.bf16 %v6274_v23  ;;  %v4156_v8 = vmul.f32 %v7449_v53, %v7449_v53  ;;  %v4289_v40 = vsel %vm4281_vm0, %v4157_v28, 0.0 }
 0x32b   : > { %8790 = vst [vmem:[#allocation4_spill] sm:$0xff] %v7406_v14  ;;  %v7408_v3 = vadd.f32 %v3914_v56, %v3658_v1  ;;  %v3903_v56 = vmul.f32 0.5, %v3775_v50  ;;  %v3647_v1 = vmul.f32 0.5, %v3519_v54  ;;  %v7472_v20 = vadd.f32 %v3902_v62, %v3646_v61  ;;  %v7494_v62 = vpop.f32.mrb[136].mxu1 }
 0x32c   : > { %v7410_v4 = vpop.f32.mrb[164].mxu0  ;;  %v4287_v10 = vsel %vm4281_vm0, %v4156_v8, 0.0  ;;  %v3649_v43 = vmul.f32 0.5, %v3521_v24  ;;  %v3779_v47 = vunpack.c.l.bf16 %v6276_v44  ;;  %v3523_v54 = vmax.f32 %v7351_v30, 0.0  ;;  %v3332_v8 = vpop.f32.mrb[137].mxu1  ;;  %v6277_v24 = vld [vmem:[%s6433_s30 + $0x30] sm:$0xff]  }
 0x32d   : > { %8791 = vst [vmem:[#allocation5_spill] sm:$0xff] %v7408_v3  ;;  %v3076_v34 = vpop.f32.mrb[165].mxu0  ;;  %8795 = vst [vmem:[#allocation9_spill] sm:$0xff] %v7472_v20  ;;  %v7478_v51 = vadd.f32 %v3903_v56, %v3647_v1  ;;  %v4158_v18 = vmul.f32 %v7472_v20, %v7472_v20  ;;  %v3650_v56 = vmul.f32 0.5, %v3522_v45 }
 0x32e   : > { %v7417_v12 = vpop.f32.mrb[166].mxu0  ;;  %v4284_v34 = vadd.f32 %v4283_v55, %v4282_v5  ;;  %v3907_v1 = vmul.f32 0.5, %v3779_v47 }
 0x32f   : > { %v3079_v49 = vpop.f32.mrb[167].mxu0  ;;  %8796 = vst [vmem:[#allocation10_spill] sm:$0xff] %v7478_v51  ;;  %v4159_v50 = vmul.f32 %v7478_v51, %v7478_v51  ;;  %v4291_v41 = vsel %vm4281_vm0, %v4158_v18, 0.0 }
 0x330   : > { %v4286_v21 = vadd.f32 %v4285_v0, %v4284_v34  ;;  %v3651_v34 = vmul.f32 0.5, %v3523_v54 }
 0x331   : > { %3289 = vmatmul.mubr.bf16.gmra.mrb[16].mxu0 %v6148_v36  ;;  %v6275_v36 = vld [vmem:[%s6433_s30 + $0x20] sm:$0xff]   ;;  %v4293_v30 = vsel %vm4281_vm0, %v4159_v50, 0.0  ;;  %v3526_v50 = vmax.f32 %v7372_v35, 0.0 }
 0x332   : > { %3296 = vmatprep.mubr.bf16.mxu0 %v6156_v19  ;;  %v3777_v19 = vunpack.c.l.bf16 %v6275_v36  ;;  %v3778_v38 = vunpack.c.h.bf16 %v6275_v36  ;;  %v3524_v36 = vmax.f32 %v7356_v26, 0.0 }
 0x333   : > { %v3654_v35 = vmul.f32 0.5, %v3526_v50 }
 0x334   : > { %v7425_v31 = vpop.f32.mrb[168].mxu0  ;;  %v3652_v26 = vmul.f32 0.5, %v3524_v36 }
 0x335   : > { %v3084_v32 = vpop.f32.mrb[169].mxu0 }
 0x336   : > { %v7432_v57 = vpop.f32.mrb[170].mxu0  ;;  %v3648_v32 = vmul.f32 0.5, %v3520_v15  ;;  %v3780_v15 = vunpack.c.h.bf16 %v6276_v44 }
 0x337   : > { %v3087_v59 = vpop.f32.mrb[171].mxu0 }
 0x338   : > { %v4288_v59 = vadd.f32 %v4287_v10, %v4286_v21  ;;  %v3525_v10 = vmax.f32 %v7367_v29, 0.0 }
 0x339   : > { %3297 = vmatmul.mubr.bf16.gmra.mrb[20].mxu0 %v6154_v33  ;;  %v3904_v33 = vmul.f32 0.5, %v3776_v9  ;;  %v3906_v9 = vmul.f32 0.5, %v3778_v38  ;;  %v3908_v38 = vmul.f32 0.5, %v3780_v15 }
 0x33a   : > { %3304 = vmatprep.mubr.bf16.mxu0 %v6162_v37  ;;  %v3905_v37 = vmul.f32 0.5, %v3777_v19  ;;  %v4290_v55 = vadd.f32 %v4289_v40, %v4288_v59  ;;  %v3653_v47 = vmul.f32 0.5, %v3525_v10 }
 0x33b   : > { %v7489_v48 = vadd.f32 %v3904_v33, %v3648_v32  ;;  %v7508_v21 = vadd.f32 %v3906_v9, %v3650_v56  ;;  %v7529_v8 = vadd.f32 %v3908_v38, %v3652_v26 }
 0x33c   : > { %v7456_v63 = vpop.f32.mrb[172].mxu0  ;;  %v7497_v5 = vadd.f32 %v3905_v37, %v3649_v43  ;;  %v4292_v28 = vadd.f32 %v4291_v41, %v4290_v55  ;;  %v7514_v37 = vadd.f32 %v3907_v1, %v3651_v34  ;;  %v3782_v43 = vunpack.c.h.bf16 %v6277_v24  ;;  %v6278_v41 = vld [vmem:[%s6433_s30 + $0x38] sm:$0xff]  }
 0x33d   : > { %v3092_v39 = vpop.f32.mrb[173].mxu0  ;;  %8797 = vst [vmem:[#allocation11_spill] sm:$0xff] %v7489_v48  ;;  %8799 = vst [vmem:[#allocation13_spill] sm:$0xff] %v7508_v21  ;;  %v4162_v29 = vmul.f32 %v7508_v21, %v7508_v21  ;;  %v3783_v56 = vunpack.c.l.bf16 %v6278_v41  ;;  %v3527_v1 = vmax.f32 %v7383_v42, 0.0  ;;  %v3528_v42 = vmax.f32 %v7388_v46, 0.0 }
 0x33e   : > { %v7466_v49 = vpop.f32.mrb[174].mxu0  ;;  %8798 = vst [vmem:[#allocation12_spill] sm:$0xff] %v7497_v5  ;;  %v7499_v39 = vpop.f32.mrb[138].mxu1  ;;  %v4161_v58 = vmul.f32 %v7497_v5, %v7497_v5  ;;  %v4294_v32 = vadd.f32 %v4293_v30, %v4292_v28  ;;  %8800 = vst [vmem:[#allocation14_spill] sm:$0xff] %v7514_v37  ;;  %v3910_v36 = vmul.f32 0.5, %v3782_v43  ;;  %v3784_v28 = vunpack.c.h.bf16 %v6278_v41 }
 0x33f   : > { %v3095_v16 = vpop.f32.mrb[175].mxu0  ;;  %v3335_v19 = vpop.f32.mrb[139].mxu1  ;;  %8801 = vst [vmem:[#allocation15_spill] sm:$0xff] %v7529_v8  ;;  %v3655_v10 = vmul.f32 0.5, %v3527_v1  ;;  %v3531_v1 = vmax.f32 %v7410_v4, 0.0 }
 0x340   : > { %v3781_v16 = vunpack.c.l.bf16 %v6277_v24  ;;  %v7518_v59 = vpop.f32.mrb[140].mxu1  ;;  %v4297_v44 = vsel %vm4281_vm0, %v4161_v58, 0.0  ;;  %v3911_v19 = vmul.f32 0.5, %v3783_v56  ;;  %v4164_v58 = vmul.f32 %v7529_v8, %v7529_v8 }
 0x341   : > { %3305 = vmatmul.mubr.bf16.gmra.mrb[24].mxu0 %v6160_v17  ;;  %v4160_v17 = vmul.f32 %v7489_v48, %v7489_v48 }
 0x342   : > { %v3909_v18 = vmul.f32 0.5, %v3781_v16  ;;  %v4303_v50 = vsel %vm4281_vm0, %v4164_v58, 0.0  ;;  %v7552_v46 = vadd.f32 %v3911_v19, %v3655_v10 }
 0x343   : > { %v4295_v11 = vsel %vm4281_vm0, %v4160_v17, 0.0  ;;  %v4299_v17 = vsel %vm4281_vm0, %v4162_v29, 0.0 }
 0x344   : > { %v7485_v23 = vpop.f32.mrb[176].mxu0  ;;  %v4296_v55 = vadd.f32 %v4295_v11, %v4294_v32  ;;  %v7533_v34 = vadd.f32 %v3909_v18, %v3653_v47  ;;  %v7547_v18 = vadd.f32 %v3910_v36, %v3654_v35  ;;  %8804 = vst [vmem:[#allocation18_spill] sm:$0xff] %v7552_v46  ;;  %v4167_v35 = vmul.f32 %v7552_v46, %v7552_v46 }
 0x345   : > { %v3100_v13 = vpop.f32.mrb[177].mxu0 }
 0x346   : > { %v7492_v61 = vpop.f32.mrb[178].mxu0  ;;  %v3340_v13 = vpop.f32.mrb[141].mxu1  ;;  %v4298_v30 = vadd.f32 %v4297_v44, %v4296_v55  ;;  %8802 = vst [vmem:[#allocation16_spill] sm:$0xff] %v7533_v34  ;;  %8803 = vst [vmem:[#allocation17_spill] sm:$0xff] %v7547_v18  ;;  %v4166_v56 = vmul.f32 %v7547_v18, %v7547_v18 }
 0x347   : > { %v3103_v0 = vpop.f32.mrb[179].mxu0  ;;  %v7525_v9 = vpop.f32.mrb[142].mxu1  ;;  %v3912_v13 = vmul.f32 0.5, %v3784_v28 }
 0x348   : > { %v4163_v0 = vmul.f32 %v7514_v37, %v7514_v37  ;;  %v3343_v15 = vpop.f32.mrb[143].mxu1  ;;  %v4300_v11 = vadd.f32 %v4299_v17, %v4298_v30  ;;  %v4307_v10 = vsel %vm4281_vm0, %v4166_v56, 0.0 }
 0x349   : > { %v7543_v38 = vpop.f32.mrb[144].mxu1  ;;  %v6279_v15 = vld [vmem:[%s6433_s30 + $0x48] sm:$0xff]  }
 0x34a   : > { %v4301_v16 = vsel %vm4281_vm0, %v4163_v0, 0.0  ;;  %v3348_v44 = vpop.f32.mrb[145].mxu1  ;;  %v3787_v30 = vunpack.c.l.bf16 %v6279_v15 }
 0x34b   : > { %v4302_v29 = vadd.f32 %v4301_v16, %v4300_v11  ;;  %v7549_v47 = vpop.f32.mrb[146].mxu1 }
 0x34c   : > { %v7511_v33 = vpop.f32.mrb[180].mxu0  ;;  %v3351_v55 = vpop.f32.mrb[147].mxu1  ;;  %v3915_v44 = vmul.f32 0.5, %v3787_v30 }
 0x34d   : > { %v3108_v40 = vpop.f32.mrb[181].mxu0  ;;  %v4304_v0 = vadd.f32 %v4303_v50, %v4302_v29  ;;  %v7567_v58 = vpop.f32.mrb[148].mxu1  ;;  %v4309_v50 = vsel %vm4281_vm0, %v4167_v35, 0.0  ;;  %v3788_v55 = vunpack.c.h.bf16 %v6279_v15 }
 0x34e   : > { %v7516_v45 = vpop.f32.mrb[182].mxu0  ;;  %v4165_v40 = vmul.f32 %v7533_v34, %v7533_v34  ;;  %v3356_v4 = vpop.f32.mrb[149].mxu1 }
 0x34f   : > { %v3111_v54 = vpop.f32.mrb[183].mxu0  ;;  %v7571_v29 = vpop.f32.mrb[150].mxu1 }
 0x350   : > { %v3656_v54 = vmul.f32 0.5, %v3528_v42  ;;  %v4305_v41 = vsel %vm4281_vm0, %v4165_v40, 0.0 }
 0x351   : > { %v4306_v28 = vadd.f32 %v4305_v41, %v4304_v0  ;;  %v3359_v41 = vpop.f32.mrb[151].mxu1  ;;  %v4169_v0 = vmul.f32 %v7406_v14, %v7406_v14 }
 0x352   : > { %v7563_v36 = vadd.f32 %v3912_v13, %v3656_v54  ;;  %v3532_v13 = vmax.f32 %v7417_v12, 0.0  ;;  %v3916_v12 = vmul.f32 0.5, %v3788_v55  ;;  %v4170_v41 = vmul.f32 %v7408_v3, %v7408_v3 }
 0x353   : > { %v4308_v56 = vadd.f32 %v4307_v10, %v4306_v28  ;;  %v4313_v10 = vsel %vm4281_vm0, %v4169_v0, 0.0  ;;  %v6282_v0 = vld [vmem:[%s6433_s30 + $0x58] sm:$0xff]  }
 0x354   : > { %v7535_v24 = vpop.f32.mrb[184].mxu0  ;;  %8805 = vst [vmem:[#allocation19_spill] sm:$0xff] %v7563_v36  ;;  %v4168_v54 = vmul.f32 %v7563_v36, %v7563_v36  ;;  %v3660_v18 = vmul.f32 0.5, %v3532_v13  ;;  %v3792_v5 = vunpack.c.h.bf16 %v6282_v0 }
 0x355   : > { %v3116_v32 = vpop.f32.mrb[185].mxu0 }
 0x356   : > { %v7541_v26 = vpop.f32.mrb[186].mxu0  ;;  %v6280_v32 = vld [vmem:[%s6433_s30 + $0x80] sm:$0xff]   ;;  %v4311_v36 = vsel %vm4281_vm0, %v4168_v54, 0.0 }
 0x357   : > { %v3119_v43 = vpop.f32.mrb[187].mxu0  ;;  %v3801_v11 = vunpack.c.l.bf16 %v6280_v32  ;;  %v3802_v40 = vunpack.c.h.bf16 %v6280_v32  ;;  %v4310_v32 = vadd.f32 %v4309_v50, %v4308_v56 }
 0x358   : > { %v3659_v43 = vmul.f32 0.5, %v3531_v1  ;;  %v3533_v1 = vmax.f32 %v7425_v31, 0.0 }
 0x359   : > { %v3929_v30 = vmul.f32 0.5, %v3801_v11  ;;  %v3930_v4 = vmul.f32 0.5, %v3802_v40  ;;  %v7587_v40 = vpop.f32.mrb[152].mxu1  ;;  %v4312_v56 = vadd.f32 %v4311_v36, %v4310_v32  ;;  %v4315_v36 = vsel %vm4281_vm0, %v4170_v41, 0.0  ;;  %v6283_v41 = vld [vmem:[%s6433_s30 + $0x60] sm:$0xff]  }
 0x35a   : > { %v7581_v46 = vadd.f32 %v3915_v44, %v3659_v43  ;;  %v3661_v43 = vmul.f32 0.5, %v3533_v1  ;;  %v3534_v44 = vmax.f32 %v7432_v57, 0.0  ;;  %v3364_v55 = vpop.f32.mrb[153].mxu1  ;;  %v3794_v48 = vunpack.c.h.bf16 %v6283_v41 }
 0x35b   : > { %v7593_v8 = vpop.f32.mrb[154].mxu1 }
 0x35c   : > { %v7559_v17 = vpop.f32.mrb[188].mxu0  ;;  %8806 = vst [vmem:[#allocation20_spill] sm:$0xff] %v7581_v46  ;;  %v3367_v57 = vpop.f32.mrb[155].mxu1 }
 0x35d   : > { %v3124_v19 = vpop.f32.mrb[189].mxu0 }
 0x35e   : > { %v7565_v16 = vpop.f32.mrb[190].mxu0  ;;  %v6281_v19 = vld [vmem:[%s6433_s30 + $0x50] sm:$0xff]  }
 0x35f   : > { %v3127_v42 = vpop.f32.mrb[191].mxu0  ;;  %v3790_v31 = vunpack.c.h.bf16 %v6281_v19 }
 0x360   : > { %v3789_v42 = vunpack.c.l.bf16 %v6281_v19  ;;  %v3535_v19 = vmax.f32 %v7456_v63, 0.0 }
 0x362   : > { %v3917_v34 = vmul.f32 0.5, %v3789_v42  ;;  %v7595_v42 = vadd.f32 %v3916_v12, %v3660_v18  ;;  %v3663_v12 = vmul.f32 0.5, %v3535_v19 }
 0x364   : > { %v3130_v35 = vpop.f32.mrb[192].mxu0  ;;  %8807 = vst [vmem:[#allocation21_spill] sm:$0xff] %v7595_v42  ;;  %v7601_v32 = vadd.f32 %v3917_v34, %v3661_v43  ;;  %v3793_v34 = vunpack.c.l.bf16 %v6283_v41 }
 0x365   : > { %v3545_v15 = vmax.f32 %v3130_v35, 0.0  ;;  %v3132_v28 = vpop.f32.mrb[193].mxu0  ;;  %v4171_v35 = vmul.f32 %v7581_v46, %v7581_v46 }
 0x366   : > { %v3133_v11 = vpop.f32.mrb[194].mxu0  ;;  %v3791_v28 = vunpack.c.l.bf16 %v6282_v0  ;;  %8809 = vst [vmem:[#allocation23_spill] sm:$0xff] %v7601_v32 }
 0x367   : > { %v3673_v50 = vmul.f32 0.5, %v3545_v15  ;;  %v3546_v54 = vmax.f32 %v3133_v11, 0.0  ;;  %v3135_v13 = vpop.f32.mrb[195].mxu0  ;;  %v4314_v15 = vadd.f32 %v4313_v10, %v4312_v56  ;;  %v3918_v11 = vmul.f32 0.5, %v3790_v31 }
 0x368   : > { %v3662_v13 = vmul.f32 0.5, %v3534_v44  ;;  %v3919_v21 = vmul.f32 0.5, %v3791_v28  ;;  %v4317_v63 = vsel %vm4281_vm0, %v4171_v35, 0.0  ;;  %v3536_v10 = vmax.f32 %v7466_v49, 0.0 }
 0x369   : > { %v7598_v37 = vadd.f32 %v3929_v30, %v3673_v50  ;;  %v3674_v1 = vmul.f32 0.5, %v3546_v54  ;;  %v4172_v30 = vmul.f32 %v7595_v42, %v7595_v42  ;;  %v4316_v50 = vadd.f32 %v4315_v36, %v4314_v15 }
 0x36a   : > { %v4173_v44 = vmul.f32 %v7601_v32, %v7601_v32  ;;  %v7618_v54 = vadd.f32 %v3918_v11, %v3662_v13  ;;  %v3537_v56 = vmax.f32 %v7485_v23, 0.0  ;;  %v3664_v57 = vmul.f32 0.5, %v3536_v10 }
 0x36b   : > { %8808 = vst [vmem:[#allocation22_spill] sm:$0xff] %v7598_v37  ;;  %v7603_v55 = vadd.f32 %v3930_v4, %v3674_v1  ;;  %v7614_v4 = vpop.f32.mrb[156].mxu1  ;;  %v4318_v28 = vadd.f32 %v4317_v63, %v4316_v50  ;;  %v4319_v19 = vsel %vm4281_vm0, %v4172_v30, 0.0  ;;  %v7624_v1 = vadd.f32 %v3919_v21, %v3663_v12  ;;  %v6284_v50 = vld [vmem:[%s6433_s30 + $0x68] sm:$0xff]  }
 0x36c   : > { %v7605_v18 = vpop.f32.mrb[196].mxu0  ;;  %8811 = vst [vmem:[#allocation25_spill] sm:$0xff] %v7618_v54  ;;  %v3372_v0 = vpop.f32.mrb[157].mxu1  ;;  %v3920_v15 = vmul.f32 0.5, %v3792_v5  ;;  %v4321_v11 = vsel %vm4281_vm0, %v4173_v44, 0.0  ;;  %v4174_v23 = vmul.f32 %v7618_v54, %v7618_v54  ;;  %v3665_v13 = vmul.f32 0.5, %v3537_v56 }
 0x36d   : > { %8810 = vst [vmem:[#allocation24_spill] sm:$0xff] %v7603_v55  ;;  %v3140_v31 = vpop.f32.mrb[197].mxu0  ;;  %v7621_v49 = vpop.f32.mrb[158].mxu1  ;;  %8812 = vst [vmem:[#allocation26_spill] sm:$0xff] %v7624_v1  ;;  %v4320_v63 = vadd.f32 %v4319_v19, %v4318_v28  ;;  %v3795_v0 = vunpack.c.l.bf16 %v6284_v50  ;;  %v4175_v21 = vmul.f32 %v7624_v1, %v7624_v1  ;;  %v3539_v30 = vmax.f32 %v7511_v33, 0.0 }
 0x36e   : > { %v7612_v43 = vpop.f32.mrb[198].mxu0  ;;  %v3375_v36 = vpop.f32.mrb[159].mxu1  ;;  %v3921_v31 = vmul.f32 0.5, %v3793_v34  ;;  %v7635_v5 = vadd.f32 %v3920_v15, %v3664_v57  ;;  %v3922_v28 = vmul.f32 0.5, %v3794_v48  ;;  %v3796_v57 = vunpack.c.h.bf16 %v6284_v50 }
 0x36f   : > { %v3143_v35 = vpop.f32.mrb[199].mxu0  ;;  %v4322_v10 = vadd.f32 %v4321_v11, %v4320_v63  ;;  %v7640_v34 = vpop.f32.mrb[160].mxu1  ;;  %v3923_v1 = vmul.f32 0.5, %v3795_v0  ;;  %v4325_v33 = vsel %vm4281_vm0, %v4175_v21, 0.0  ;;  %v3667_v63 = vmul.f32 0.5, %v3539_v30 }
 0x370   : > { %v3538_v35 = vmax.f32 %v7492_v61, 0.0  ;;  %8813 = vst [vmem:[#allocation27_spill] sm:$0xff] %v7635_v5  ;;  %v4323_v61 = vsel %vm4281_vm0, %v4174_v23, 0.0  ;;  %v7643_v44 = vadd.f32 %v3921_v31, %v3665_v13  ;;  %v3380_v36 = vpop.f32.mrb[161].mxu1  ;;  %v4176_v11 = vmul.f32 %v7635_v5, %v7635_v5  ;;  %v6285_v31 = vld [vmem:[%s6433_s30 + $0x70] sm:$0xff]  }
 0x371   : > { %v7645_v15 = vpop.f32.mrb[162].mxu1  ;;  %v4324_v23 = vadd.f32 %v4323_v61, %v4322_v10  ;;  %v3797_v13 = vunpack.c.l.bf16 %v6285_v31  ;;  %v3541_v50 = vmax.f32 %v7535_v24, 0.0  ;;  %v7660_v30 = vadd.f32 %v3923_v1, %v3667_v63 }
 0x372   : > { %8814 = vst [vmem:[#allocation28_spill] sm:$0xff] %v7643_v44  ;;  %v3666_v56 = vmul.f32 0.5, %v3538_v35  ;;  %v3383_v20 = vpop.f32.mrb[163].mxu1  ;;  %v4177_v48 = vmul.f32 %v7643_v44, %v7643_v44  ;;  %v4327_v21 = vsel %vm4281_vm0, %v4176_v11, 0.0  ;;  %v3798_v36 = vunpack.c.h.bf16 %v6285_v31 }
 0x373   : > { %v4326_v0 = vadd.f32 %v4325_v33, %v4324_v23  ;;  %8816 = vst [vmem:[#allocation30_spill] sm:$0xff] %v7660_v30  ;;  %v3924_v20 = vmul.f32 0.5, %v3796_v57  ;;  %v3925_v61 = vmul.f32 0.5, %v3797_v13  ;;  %v7664_v44 = vpop.f32.mrb[164].mxu1  ;;  %v3542_v33 = vmax.f32 %v7541_v26, 0.0 }
 0x374   : > { %v7631_v51 = vpop.f32.mrb[200].mxu0  ;;  %v7654_v35 = vadd.f32 %v3922_v28, %v3666_v56  ;;  %v4329_v56 = vsel %vm4281_vm0, %v4177_v48, 0.0  ;;  %v3669_v28 = vmul.f32 0.5, %v3541_v50  ;;  %v3388_v1 = vpop.f32.mrb[165].mxu1  ;;  %v4179_v31 = vmul.f32 %v7660_v30, %v7660_v30 }
 0x375   : > { %v3148_v12 = vpop.f32.mrb[201].mxu0  ;;  %v4328_v63 = vadd.f32 %v4327_v21, %v4326_v0  ;;  %v7671_v23 = vpop.f32.mrb[166].mxu1  ;;  %v3543_v48 = vmax.f32 %v7559_v17, 0.0  ;;  %v3670_v26 = vmul.f32 0.5, %v3542_v33  ;;  %v3544_v17 = vmax.f32 %v7565_v16, 0.0 }
 0x376   : > { %v7638_v41 = vpop.f32.mrb[202].mxu0  ;;  %v3540_v12 = vmax.f32 %v7516_v45, 0.0  ;;  %8815 = vst [vmem:[#allocation29_spill] sm:$0xff] %v7654_v35  ;;  %v4178_v24 = vmul.f32 %v7654_v35, %v7654_v35  ;;  %v7679_v35 = vadd.f32 %v3925_v61, %v3669_v28  ;;  %v4333_v54 = vsel %vm4281_vm0, %v4179_v31, 0.0 }
 0x377   : > { %v3151_v19 = vpop.f32.mrb[203].mxu0  ;;  %v4330_v60 = vadd.f32 %v4329_v56, %v4328_v63 }
 0x378   : > { %v3668_v45 = vmul.f32 0.5, %v3540_v12  ;;  %v6286_v12 = vld [vmem:[%s6433_s30 + $0x78] sm:$0xff]   ;;  %v4331_v50 = vsel %vm4281_vm0, %v4178_v24, 0.0  ;;  %8818 = vst [vmem:[#allocation32_spill] sm:$0xff] %v7679_v35 }
 0x379   : > { %v3799_v57 = vunpack.c.l.bf16 %v6286_v12  ;;  %v3800_v21 = vunpack.c.h.bf16 %v6286_v12  ;;  %v4332_v56 = vadd.f32 %v4331_v50, %v4330_v60  ;;  %v3672_v60 = vmul.f32 0.5, %v3544_v17 }
 0x37a   : > { %v7675_v13 = vadd.f32 %v3924_v20, %v3668_v45  ;;  %v3671_v20 = vmul.f32 0.5, %v3543_v48 }
 0x37b   : > { %v3927_v0 = vmul.f32 0.5, %v3799_v57  ;;  %v4334_v12 = vadd.f32 %v4333_v54, %v4332_v56  ;;  %v3928_v48 = vmul.f32 0.5, %v3800_v21 }
 0x37c   : > { %v7657_v19 = vpop.f32.mrb[204].mxu0  ;;  %8817 = vst [vmem:[#allocation31_spill] sm:$0xff] %v7675_v13  ;;  %v4180_v45 = vmul.f32 %v7675_v13, %v7675_v13 }
 0x37d   : > { %v3156_v10 = vpop.f32.mrb[205].mxu0  ;;  %v7698_v16 = vadd.f32 %v3927_v0, %v3671_v20  ;;  %v7708_v56 = vadd.f32 %v3928_v48, %v3672_v60  ;;  %v3547_v0 = vmax.f32 %v7605_v18, 0.0 }
 0x37e   : > { %v7662_v5 = vpop.f32.mrb[206].mxu0  ;;  %v3391_v10 = vpop.f32.mrb[167].mxu1  ;;  %v4335_v31 = vsel %vm4281_vm0, %v4180_v45, 0.0 }
 0x37f   : > { %v3159_v11 = vpop.f32.mrb[207].mxu0  ;;  %v7689_v61 = vpop.f32.mrb[168].mxu1  ;;  %8820 = vst [vmem:[#allocation34_spill] sm:$0xff] %v7698_v16  ;;  %v4183_v54 = vmul.f32 %v7698_v16, %v7698_v16  ;;  %8821 = vst [vmem:[#allocation35_spill] sm:$0xff] %v7708_v56  ;;  %v4184_v18 = vmul.f32 %v7708_v56, %v7708_v56  ;;  %v3675_v48 = vmul.f32 0.5, %v3547_v0  ;;  %v4185_v16 = vmul.f32 %v7598_v37, %v7598_v37 }
 0x380   : > { %v3926_v11 = vmul.f32 0.5, %v3798_v36  ;;  %v4181_v36 = vmul.f32 %v7679_v35, %v7679_v35  ;;  %v3396_v33 = vpop.f32.mrb[169].mxu1  ;;  %v4336_v35 = vadd.f32 %v4335_v31, %v4334_v12 }
 0x381   : > { %v7695_v57 = vpop.f32.mrb[170].mxu1  ;;  %v4341_v60 = vsel %vm4281_vm0, %v4183_v54, 0.0  ;;  %v4343_v54 = vsel %vm4281_vm0, %v4184_v18, 0.0 }
 0x382   : > { %v7693_v24 = vadd.f32 %v3926_v11, %v3670_v26  ;;  %v3399_v50 = vpop.f32.mrb[171].mxu1  ;;  %v6287_v26 = vld [vmem:[%s6433_s30 + $0x88] sm:$0xff]  }
 0x383   : > { %v3803_v11 = vunpack.c.l.bf16 %v6287_v26  ;;  %v7713_v17 = vpop.f32.mrb[172].mxu1  ;;  %v3804_v50 = vunpack.c.h.bf16 %v6287_v26 }
 0x384   : > { %v7681_v1 = vpop.f32.mrb[208].mxu0  ;;  %8819 = vst [vmem:[#allocation33_spill] sm:$0xff] %v7693_v24  ;;  %v4182_v13 = vmul.f32 %v7693_v24, %v7693_v24  ;;  %v3404_v12 = vpop.f32.mrb[173].mxu1 }
 0x385   : > { %v3164_v10 = vpop.f32.mrb[209].mxu0  ;;  %v3931_v31 = vmul.f32 0.5, %v3803_v11  ;;  %v7716_v24 = vpop.f32.mrb[174].mxu1  ;;  %v3932_v56 = vmul.f32 0.5, %v3804_v50  ;;  %v3551_v50 = vmax.f32 %v7657_v19, 0.0 }
 0x386   : > { %v7687_v63 = vpop.f32.mrb[210].mxu0  ;;  %v4337_v10 = vsel %vm4281_vm0, %v4181_v36, 0.0  ;;  %v4339_v36 = vsel %vm4281_vm0, %v4182_v13, 0.0  ;;  %v3549_v13 = vmax.f32 %v7631_v51, 0.0  ;;  %v4345_v51 = vsel %vm4281_vm0, %v4185_v16, 0.0 }
 0x387   : > { %v3167_v28 = vpop.f32.mrb[211].mxu0  ;;  %v4338_v21 = vadd.f32 %v4337_v10, %v4336_v35  ;;  %v3548_v35 = vmax.f32 %v7612_v43, 0.0  ;;  %v3407_v10 = vpop.f32.mrb[175].mxu1  ;;  %v7729_v30 = vadd.f32 %v3931_v31, %v3675_v48 }
 0x388   : > { %v7734_v37 = vpop.f32.mrb[176].mxu1 }
 0x389   : > { %8822 = vst [vmem:[#allocation36_spill] sm:$0xff] %v7729_v30  ;;  %v3676_v0 = vmul.f32 0.5, %v3548_v35  ;;  %v3412_v48 = vpop.f32.mrb[177].mxu1  ;;  %v6289_v35 = vld [vmem:[%s6433_s30 + $0x98] sm:$0xff]  }
 0x38b   : > { %v7745_v53 = vadd.f32 %v3932_v56, %v3676_v0 }
 0x38c   : > { %v7704_v28 = vpop.f32.mrb[212].mxu0 }
 0x38d   : > { %v3172_v45 = vpop.f32.mrb[213].mxu0  ;;  %8823 = vst [vmem:[#allocation37_spill] sm:$0xff] %v7745_v53  ;;  %v4188_v56 = vmul.f32 %v7745_v53, %v7745_v53  ;;  %v3555_v3 = vmax.f32 %v7704_v28, 0.0 }
 0x38e   : > { %v7711_v20 = vpop.f32.mrb[214].mxu0  ;;  %v4340_v45 = vadd.f32 %v4339_v36, %v4338_v21  ;;  %v3550_v21 = vmax.f32 %v7638_v41, 0.0  ;;  %v7741_v41 = vpop.f32.mrb[178].mxu1 }
 0x38f   : > { %v3175_v33 = vpop.f32.mrb[215].mxu0  ;;  %v3415_v16 = vpop.f32.mrb[179].mxu1 }
 0x390   : > { %v6288_v33 = vld [vmem:[%s6433_s30 + $0x90] sm:$0xff]   ;;  %v4342_v26 = vadd.f32 %v4341_v60, %v4340_v45  ;;  %v4186_v60 = vmul.f32 %v7603_v55, %v7603_v55  ;;  %v3677_v45 = vmul.f32 0.5, %v3549_v13  ;;  %v3678_v42 = vmul.f32 0.5, %v3550_v21 }
 0x391   : > { %v3805_v11 = vunpack.c.l.bf16 %v6288_v33  ;;  %v3806_v36 = vunpack.c.h.bf16 %v6288_v33  ;;  %v4187_v33 = vmul.f32 %v7729_v30, %v7729_v30 }
 0x392   : > { %v4344_v32 = vadd.f32 %v4343_v54, %v4342_v26  ;;  %v4347_v13 = vsel %vm4281_vm0, %v4186_v60, 0.0  ;;  %v3679_v26 = vmul.f32 0.5, %v3551_v50  ;;  %v3552_v54 = vmax.f32 %v7662_v5, 0.0 }
 0x393   : > { %v3933_v18 = vmul.f32 0.5, %v3805_v11  ;;  %v3934_v55 = vmul.f32 0.5, %v3806_v36  ;;  %v4349_v30 = vsel %vm4281_vm0, %v4187_v33, 0.0  ;;  %v3553_v60 = vmax.f32 %v7681_v1, 0.0 }
 0x394   : > { %v7726_v12 = vpop.f32.mrb[216].mxu0  ;;  %v4346_v27 = vadd.f32 %v4345_v51, %v4344_v32  ;;  %v7760_v51 = vpop.f32.mrb[180].mxu1  ;;  %v3680_v16 = vmul.f32 0.5, %v3552_v54 }
 0x395   : > { %v3180_v43 = vpop.f32.mrb[217].mxu0  ;;  %v7748_v11 = vadd.f32 %v3933_v18, %v3677_v45  ;;  %v7756_v21 = vadd.f32 %v3934_v55, %v3678_v42  ;;  %v6290_v45 = vld [vmem:[%s6433_s30 + $0xa0] sm:$0xff]  }
 0x396   : > { %v7732_v10 = vpop.f32.mrb[218].mxu0  ;;  %v3807_v43 = vunpack.c.l.bf16 %v6289_v35  ;;  %v4348_v0 = vadd.f32 %v4347_v13, %v4346_v27  ;;  %v3809_v18 = vunpack.c.l.bf16 %v6290_v45  ;;  %v6291_v55 = vld [vmem:[%s6433_s30 + $0xc0] sm:$0xff]   ;;  %v3810_v46 = vunpack.c.h.bf16 %v6290_v45 }
 0x397   : > { %v3183_v31 = vpop.f32.mrb[219].mxu0  ;;  %8824 = vst [vmem:[#allocation38_spill] sm:$0xff] %v7748_v11  ;;  %8825 = vst [vmem:[#allocation39_spill] sm:$0xff] %v7756_v21  ;;  %v4189_v5 = vmul.f32 %v7748_v11, %v7748_v11  ;;  %v3817_v13 = vunpack.c.l.bf16 %v6291_v55  ;;  %v3818_v11 = vunpack.c.h.bf16 %v6291_v55  ;;  %v4190_v1 = vmul.f32 %v7756_v21, %v7756_v21 }
 0x398   : > { %v3935_v19 = vmul.f32 0.5, %v3807_v43  ;;  %v3808_v31 = vunpack.c.h.bf16 %v6289_v35  ;;  %v3420_v35 = vpop.f32.mrb[181].mxu1  ;;  %v4350_v43 = vadd.f32 %v4349_v30, %v4348_v0  ;;  %v3681_v30 = vmul.f32 0.5, %v3553_v60 }
 0x399   : > { %v7768_v42 = vpop.f32.mrb[182].mxu1  ;;  %v6292_v35 = vld [vmem:[%s6433_s30 + $0xa8] sm:$0xff]   ;;  %v3945_v55 = vmul.f32 0.5, %v3817_v13  ;;  %v3946_v14 = vmul.f32 0.5, %v3818_v11  ;;  %v4355_v60 = vsel %vm4281_vm0, %v4190_v1, 0.0 }
 0x39a   : > { %v7766_v33 = vadd.f32 %v3935_v19, %v3679_v26  ;;  %v3936_v27 = vmul.f32 0.5, %v3808_v31  ;;  %v3423_v53 = vpop.f32.mrb[183].mxu1  ;;  %v3937_v26 = vmul.f32 0.5, %v3809_v18  ;;  %v3554_v19 = vmax.f32 %v7687_v63, 0.0 }
 0x39b   : > { %v3938_v18 = vmul.f32 0.5, %v3810_v46  ;;  %v3683_v46 = vmul.f32 0.5, %v3555_v3 }
 0x39c   : > { %v7751_v48 = vpop.f32.mrb[220].mxu0  ;;  %8826 = vst [vmem:[#allocation40_spill] sm:$0xff] %v7766_v33  ;;  %v4191_v31 = vmul.f32 %v7766_v33, %v7766_v33  ;;  %v7778_v0 = vadd.f32 %v3936_v27, %v3680_v16  ;;  %v3682_v16 = vmul.f32 0.5, %v3554_v19 }
 0x39d   : > { %v3188_v32 = vpop.f32.mrb[221].mxu0 }
 0x39e   : > { %v7758_v36 = vpop.f32.mrb[222].mxu0  ;;  %v4351_v32 = vsel %vm4281_vm0, %v4188_v56, 0.0  ;;  %8827 = vst [vmem:[#allocation41_spill] sm:$0xff] %v7778_v0  ;;  %v3811_v56 = vunpack.c.l.bf16 %v6292_v35  ;;  %v4357_v28 = vsel %vm4281_vm0, %v4191_v31, 0.0  ;;  %v4192_v11 = vmul.f32 %v7778_v0, %v7778_v0 }
 0x39f   : > { %v3191_v50 = vpop.f32.mrb[223].mxu0  ;;  %v4352_v54 = vadd.f32 %v4351_v32, %v4350_v43  ;;  %v7783_v43 = vpop.f32.mrb[184].mxu1  ;;  %v7785_v32 = vadd.f32 %v3937_v26, %v3681_v30 }
 0x3a0   : > { %v4353_v50 = vsel %vm4281_vm0, %v4189_v5, 0.0  ;;  %v3428_v13 = vpop.f32.mrb[185].mxu1 }
 0x3a1   : > { %v4354_v5 = vadd.f32 %v4353_v50, %v4352_v54  ;;  %8828 = vst [vmem:[#allocation42_spill] sm:$0xff] %v7785_v32  ;;  %v3939_v50 = vmul.f32 0.5, %v3811_v56  ;;  %v3812_v54 = vunpack.c.h.bf16 %v6292_v35  ;;  %v7790_v1 = vpop.f32.mrb[186].mxu1  ;;  %v4193_v31 = vmul.f32 %v7785_v32, %v7785_v32 }
 0x3a2   : > { %v3431_v19 = vpop.f32.mrb[187].mxu1  ;;  %v3557_v56 = vmax.f32 %v7726_v12, 0.0 }
 0x3a4   : > { %v3194_v53 = vpop.f32.mrb[224].mxu0 }
 0x3a5   : > { %v3561_v21 = vmax.f32 %v3194_v53, 0.0  ;;  %v3196_v45 = vpop.f32.mrb[225].mxu0  ;;  %v3556_v53 = vmax.f32 %v7711_v20, 0.0  ;;  %v4359_v20 = vsel %vm4281_vm0, %v4192_v11, 0.0 }
 0x3a6   : > { %v3197_v63 = vpop.f32.mrb[226].mxu0  ;;  %v6293_v45 = vld [vmem:[%s6433_s30 + $0xb0] sm:$0xff]  }
 0x3a7   : > { %v3689_v27 = vmul.f32 0.5, %v3561_v21  ;;  %v3562_v33 = vmax.f32 %v3197_v63, 0.0  ;;  %v3199_v25 = vpop.f32.mrb[227].mxu0  ;;  %v4356_v21 = vadd.f32 %v4355_v60, %v4354_v5  ;;  %v7798_v63 = vadd.f32 %v3938_v18, %v3682_v16  ;;  %v7810_v18 = vpop.f32.mrb[188].mxu1 }
 0x3a8   : > { %v3813_v25 = vunpack.c.l.bf16 %v6293_v45  ;;  %v3940_v5 = vmul.f32 0.5, %v3812_v54  ;;  %v3814_v19 = vunpack.c.h.bf16 %v6293_v45  ;;  %v3685_v16 = vmul.f32 0.5, %v3557_v56 }
 0x3a9   : > { %v7793_v30 = vadd.f32 %v3945_v55, %v3689_v27  ;;  %v3690_v26 = vmul.f32 0.5, %v3562_v33  ;;  %8830 = vst [vmem:[#allocation44_spill] sm:$0xff] %v7798_v63  ;;  %v4358_v13 = vadd.f32 %v4357_v28, %v4356_v21  ;;  %v7806_v33 = vadd.f32 %v3939_v50, %v3683_v46  ;;  %v3436_v50 = vpop.f32.mrb[189].mxu1 }
 0x3aa   : > { %v3684_v55 = vmul.f32 0.5, %v3556_v53  ;;  %v3941_v27 = vmul.f32 0.5, %v3813_v25  ;;  %v4194_v12 = vmul.f32 %v7798_v63, %v7798_v63  ;;  %v3558_v28 = vmax.f32 %v7732_v10, 0.0  ;;  %v6294_v53 = vld [vmem:[%s6433_s30 + $0xb8] sm:$0xff]  }
 0x3ab   : > { %8829 = vst [vmem:[#allocation43_spill] sm:$0xff] %v7793_v30  ;;  %v7801_v35 = vadd.f32 %v3946_v14, %v3690_v26  ;;  %8832 = vst [vmem:[#allocation46_spill] sm:$0xff] %v7806_v33  ;;  %v4361_v14 = vsel %vm4281_vm0, %v4193_v31, 0.0  ;;  %v4360_v46 = vadd.f32 %v4359_v20, %v4358_v13  ;;  %v3815_v54 = vunpack.c.l.bf16 %v6294_v53  ;;  %v7817_v26 = vpop.f32.mrb[190].mxu1 }
 0x3ac   : > { %v7803_v3 = vpop.f32.mrb[228].mxu0  ;;  %v4195_v21 = vmul.f32 %v7806_v33, %v7806_v33  ;;  %v7821_v45 = vadd.f32 %v3940_v5, %v3684_v55  ;;  %v3559_v25 = vmax.f32 %v7751_v48, 0.0  ;;  %v3439_v31 = vpop.f32.mrb[191].mxu1  ;;  %v4363_v56 = vsel %vm4281_vm0, %v4194_v12, 0.0 }
 0x3ad   : > { %8831 = vst [vmem:[#allocation45_spill] sm:$0xff] %v7801_v35  ;;  %v3204_v60 = vpop.f32.mrb[229].mxu0  ;;  %v7825_v63 = vadd.f32 %v3941_v27, %v3685_v16  ;;  %v3686_v10 = vmul.f32 0.5, %v3558_v28  ;;  %v3943_v13 = vmul.f32 0.5, %v3815_v54  ;;  %v3816_v20 = vunpack.c.h.bf16 %v6294_v53  ;;  %v7833_v27 = vpop.f32.mrb[192].mxu1 }
 0x3ae   : > { %v7808_v32 = vpop.f32.mrb[230].mxu0  ;;  %8833 = vst [vmem:[#allocation47_spill] sm:$0xff] %v7821_v45  ;;  %v4362_v60 = vadd.f32 %v4361_v14, %v4360_v46  ;;  %v4365_v0 = vsel %vm4281_vm0, %v4195_v21, 0.0  ;;  %v4196_v33 = vmul.f32 %v7821_v45, %v7821_v45  ;;  %v3687_v55 = vmul.f32 0.5, %v3559_v25  ;;  %v3444_v28 = vpop.f32.mrb[193].mxu1 }
 0x3af   : > { %v3207_v11 = vpop.f32.mrb[231].mxu0  ;;  %8834 = vst [vmem:[#allocation48_spill] sm:$0xff] %v7825_v63  ;;  %v3560_v5 = vmax.f32 %v7758_v36, 0.0  ;;  %v7839_v53 = vpop.f32.mrb[194].mxu1  ;;  %v3944_v25 = vmul.f32 0.5, %v3816_v20 }
 0x3b0   : > { %v3942_v11 = vmul.f32 0.5, %v3814_v19  ;;  %v4364_v31 = vadd.f32 %v4363_v56, %v4362_v60  ;;  %v4197_v19 = vmul.f32 %v7825_v63, %v7825_v63  ;;  %v4367_v54 = vsel %vm4281_vm0, %v4196_v33, 0.0  ;;  %v3447_v60 = vpop.f32.mrb[195].mxu1 }
 0x3b1   : > { %v7842_v36 = vadd.f32 %v3943_v13, %v3687_v55  ;;  %v3688_v21 = vmul.f32 0.5, %v3560_v5  ;;  %v3563_v33 = vmax.f32 %v7803_v3, 0.0  ;;  %v7855_v5 = vpop.f32.mrb[196].mxu1 }
 0x3b2   : > { %v7837_v12 = vadd.f32 %v3942_v11, %v3686_v10  ;;  %v4366_v46 = vadd.f32 %v4365_v0, %v4364_v31  ;;  %v4369_v56 = vsel %vm4281_vm0, %v4197_v19, 0.0  ;;  %v6295_v10 = vld [vmem:[%s6433_s30 + $0xc8] sm:$0xff]   ;;  %8838 = vst [vmem:[#allocation52_spill] sm:$0xff] %v7855_v5 }
 0x3b3   : > { %8836 = vst [vmem:[#allocation50_spill] sm:$0xff] %v7842_v36  ;;  %v3819_v11 = vunpack.c.l.bf16 %v6295_v10  ;;  %v4199_v0 = vmul.f32 %v7842_v36, %v7842_v36  ;;  %v7850_v31 = vadd.f32 %v3944_v25, %v3688_v21  ;;  %v3820_v60 = vunpack.c.h.bf16 %v6295_v10  ;;  %v6296_v36 = vld [vmem:[%s6433_s30 + $0xd0] sm:$0xff]  }
 0x3b4   : > { %v3210_v50 = vpop.f32.mrb[232].mxu0  ;;  %8835 = vst [vmem:[#allocation49_spill] sm:$0xff] %v7837_v12  ;;  %v4368_v63 = vadd.f32 %v4367_v54, %v4366_v46  ;;  %v3452_v46 = vpop.f32.mrb[197].mxu1  ;;  %v3691_v25 = vmul.f32 0.5, %v3563_v33  ;;  %v3821_v45 = vunpack.c.l.bf16 %v6296_v36 }
 0x3b5   : > { %v3212_v48 = vpop.f32.mrb[233].mxu0  ;;  %8837 = vst [vmem:[#allocation51_spill] sm:$0xff] %v7850_v31  ;;  %v3947_v54 = vmul.f32 0.5, %v3819_v11  ;;  %v4373_v21 = vsel %vm4281_vm0, %v4199_v0, 0.0  ;;  %v4200_v3 = vmul.f32 %v7850_v31, %v7850_v31  ;;  %v3948_v31 = vmul.f32 0.5, %v3820_v60 }
 0x3b6   : > { %v7831_v14 = vpop.f32.mrb[234].mxu0  ;;  %v4198_v48 = vmul.f32 %v7837_v12, %v7837_v12  ;;  %v4370_v20 = vadd.f32 %v4369_v56, %v4368_v63  ;;  %v7858_v12 = vpop.f32.mrb[198].mxu1  ;;  %v3564_v63 = vmax.f32 %v7808_v32, 0.0  ;;  %v3822_v32 = vunpack.c.h.bf16 %v6296_v36 }
 0x3b7   : > { %v3215_v16 = vpop.f32.mrb[235].mxu0  ;;  %8839 = vst [vmem:[#allocation53_spill] sm:$0xff] %v7858_v12  ;;  %v3455_v56 = vpop.f32.mrb[199].mxu1  ;;  %v4375_v46 = vsel %vm4281_vm0, %v4200_v3, 0.0  ;;  %v7868_v0 = vadd.f32 %v3947_v54, %v3691_v25  ;;  %v3949_v12 = vmul.f32 0.5, %v3821_v45  ;;  %v3566_v3 = vmax.f32 %v7831_v14, 0.0 }
 0x3b8   : > { %v4371_v19 = vsel %vm4281_vm0, %v4198_v48, 0.0  ;;  %v4201_v48 = vmul.f32 %v7793_v30, %v7793_v30  ;;  %v3692_v7 = vmul.f32 0.5, %v3564_v63  ;;  %v6297_v63 = vld [vmem:[%s6433_s30 + $0xd8] sm:$0xff]  }
 0x3b9   : > { %8840 = vst [vmem:[#allocation54_spill] sm:$0xff] %v7868_v0  ;;  %v3823_v60 = vunpack.c.l.bf16 %v6297_v63  ;;  %v4203_v45 = vmul.f32 %v7868_v0, %v7868_v0  ;;  %v3694_v14 = vmul.f32 0.5, %v3566_v3 }
 0x3ba   : > { %v7883_v36 = vadd.f32 %v3948_v31, %v3692_v7 }
 0x3bc   : > { %v3218_v16 = vpop.f32.mrb[236].mxu0  ;;  %8843 = vst [vmem:[#allocation57_spill] sm:$0xff] %v7883_v36  ;;  %v4204_v0 = vmul.f32 %v7883_v36, %v7883_v36 }
 0x3bd   : > { %v3220_v13 = vpop.f32.mrb[237].mxu0  ;;  %v3567_v30 = vmax.f32 %v3218_v16, 0.0 }
 0x3be   : > { %v7853_v55 = vpop.f32.mrb[238].mxu0  ;;  %v4372_v13 = vadd.f32 %v4371_v19, %v4370_v20  ;;  %v7872_v20 = vpop.f32.mrb[200].mxu1  ;;  %v4377_v19 = vsel %vm4281_vm0, %v4201_v48, 0.0 }
 0x3bf   : > { %v3223_v28 = vpop.f32.mrb[239].mxu0  ;;  %8841 = vst [vmem:[#allocation55_spill] sm:$0xff] %v7872_v20  ;;  %v3460_v54 = vpop.f32.mrb[201].mxu1  ;;  %v3695_v7 = vmul.f32 0.5, %v3567_v30  ;;  %v3568_v16 = vmax.f32 %v7853_v55, 0.0  ;;  %v4383_v55 = vsel %vm4281_vm0, %v4204_v0, 0.0 }
 0x3c0   : > { %v3565_v28 = vmax.f32 %v3210_v50, 0.0  ;;  %v4374_v11 = vadd.f32 %v4373_v21, %v4372_v13  ;;  %v4202_v50 = vmul.f32 %v7801_v35, %v7801_v35 }
 0x3c2   : > { %v3693_v21 = vmul.f32 0.5, %v3565_v28  ;;  %v4376_v25 = vadd.f32 %v4375_v46, %v4374_v11  ;;  %v4379_v28 = vsel %vm4281_vm0, %v4202_v50, 0.0  ;;  %v3951_v11 = vmul.f32 0.5, %v3823_v60 }
 0x3c3   : > { %v3824_v46 = vunpack.c.h.bf16 %v6297_v63 }
 0x3c4   : > { %v3226_v10 = vpop.f32.mrb[240].mxu0  ;;  %v4378_v20 = vadd.f32 %v4377_v19, %v4376_v25  ;;  %v7886_v35 = vadd.f32 %v3949_v12, %v3693_v21  ;;  %v6298_v19 = vld [vmem:[%s6433_s30 + $0xe0] sm:$0xff]  }
 0x3c5   : > { %v3228_v33 = vpop.f32.mrb[241].mxu0  ;;  %v3825_v25 = vunpack.c.l.bf16 %v6298_v19  ;;  %v3569_v3 = vmax.f32 %v3226_v10, 0.0  ;;  %v3826_v5 = vunpack.c.h.bf16 %v6298_v19 }
 0x3c6   : > { %v7870_v56 = vpop.f32.mrb[242].mxu0  ;;  %v7879_v33 = vpop.f32.mrb[202].mxu1  ;;  %8844 = vst [vmem:[#allocation58_spill] sm:$0xff] %v7886_v35 }
 0x3c7   : > { %v3231_v13 = vpop.f32.mrb[243].mxu0  ;;  %8842 = vst [vmem:[#allocation56_spill] sm:$0xff] %v7879_v33  ;;  %v3463_v48 = vpop.f32.mrb[203].mxu1  ;;  %v4381_v33 = vsel %vm4281_vm0, %v4203_v45, 0.0 }
 0x3c8   : > { %v3950_v13 = vmul.f32 0.5, %v3822_v32  ;;  %v4380_v48 = vadd.f32 %v4379_v28, %v4378_v20  ;;  %v7893_v12 = vpop.f32.mrb[204].mxu1  ;;  %v4205_v32 = vmul.f32 %v7886_v35, %v7886_v35  ;;  %v7902_v20 = vadd.f32 %v3951_v11, %v3695_v7 }
 0x3c9   : > { %8845 = vst [vmem:[#allocation59_spill] sm:$0xff] %v7893_v12  ;;  %v3468_v60 = vpop.f32.mrb[205].mxu1  ;;  %v3696_v28 = vmul.f32 0.5, %v3568_v16  ;;  %v3953_v12 = vmul.f32 0.5, %v3825_v25 }
 0x3ca   : > { %v7897_v21 = vadd.f32 %v3950_v13, %v3694_v14  ;;  %v4382_v45 = vadd.f32 %v4381_v33, %v4380_v48  ;;  %v7899_v30 = vpop.f32.mrb[206].mxu1  ;;  %8848 = vst [vmem:[#allocation62_spill] sm:$0xff] %v7902_v20  ;;  %v4385_v35 = vsel %vm4281_vm0, %v4205_v32, 0.0  ;;  %v3697_v14 = vmul.f32 0.5, %v3569_v3  ;;  %v6299_v48 = vld [vmem:[%s6433_s30 + $0xe8] sm:$0xff]  }
 0x3cb   : > { %8847 = vst [vmem:[#allocation61_spill] sm:$0xff] %v7899_v30  ;;  %v3471_v36 = vpop.f32.mrb[207].mxu1  ;;  %v3570_v13 = vmax.f32 %v7870_v56, 0.0  ;;  %v4207_v0 = vmul.f32 %v7902_v20, %v7902_v20  ;;  %v3954_v3 = vmul.f32 0.5, %v3826_v5  ;;  %v3828_v30 = vunpack.c.h.bf16 %v6299_v48 }
 0x3cc   : > { %v3234_v54 = vpop.f32.mrb[244].mxu0  ;;  %8846 = vst [vmem:[#allocation60_spill] sm:$0xff] %v7897_v21  ;;  %v4206_v10 = vmul.f32 %v7897_v21, %v7897_v21  ;;  %v4384_v33 = vadd.f32 %v4383_v55, %v4382_v45  ;;  %v7913_v19 = vpop.f32.mrb[208].mxu1  ;;  %v7916_v32 = vadd.f32 %v3953_v12, %v3697_v14 }
 0x3cd   : > { %v3236_v31 = vpop.f32.mrb[245].mxu0  ;;  %v3571_v36 = vmax.f32 %v3234_v54, 0.0  ;;  %v3698_v56 = vmul.f32 0.5, %v3570_v13  ;;  %v3476_v55 = vpop.f32.mrb[209].mxu1  ;;  %v4389_v54 = vsel %vm4281_vm0, %v4207_v0, 0.0 }
 0x3ce   : > { %v3237_v50 = vpop.f32.mrb[246].mxu0  ;;  %v3952_v31 = vmul.f32 0.5, %v3824_v46  ;;  %v4386_v7 = vadd.f32 %v4385_v35, %v4384_v33  ;;  %v4387_v25 = vsel %vm4281_vm0, %v4206_v10, 0.0  ;;  %8850 = vst [vmem:[#allocation64_spill] sm:$0xff] %v7916_v32  ;;  %v7918_v20 = vpop.f32.mrb[210].mxu1  ;;  %v6300_v10 = vld [vmem:[%s6433_s30 + $0xf0] sm:$0xff]   ;;  %v4209_v5 = vmul.f32 %v7916_v32, %v7916_v32 }
 0x3cf   : > { %v3239_v63 = vpop.f32.mrb[247].mxu0  ;;  %8851 = vst [vmem:[#allocation65_spill] sm:$0xff] %v7918_v20  ;;  %v3479_v33 = vpop.f32.mrb[211].mxu1  ;;  %v3829_v12 = vunpack.c.l.bf16 %v6300_v10  ;;  %v7926_v14 = vadd.f32 %v3954_v3, %v3698_v56 }
 0x3d0   : > { %v3827_v63 = vunpack.c.l.bf16 %v6299_v48  ;;  %v7911_v11 = vadd.f32 %v3952_v31, %v3696_v28  ;;  %v3699_v28 = vmul.f32 0.5, %v3571_v36  ;;  %v3572_v31 = vmax.f32 %v3237_v50, 0.0 }
 0x3d1   : > { %8852 = vst [vmem:[#allocation66_spill] sm:$0xff] %v7926_v14  ;;  %v3956_v36 = vmul.f32 0.5, %v3828_v30  ;;  %v3957_v33 = vmul.f32 0.5, %v3829_v12  ;;  %v4393_v32 = vsel %vm4281_vm0, %v4209_v5, 0.0 }
 0x3d2   : > { %8849 = vst [vmem:[#allocation63_spill] sm:$0xff] %v7911_v11  ;;  %v3955_v21 = vmul.f32 0.5, %v3827_v63  ;;  %v4208_v35 = vmul.f32 %v7911_v11, %v7911_v11  ;;  %v3700_v55 = vmul.f32 0.5, %v3572_v31  ;;  %v7931_v11 = vpop.f32.mrb[212].mxu1 }
 0x3d3   : > { %8854 = vst [vmem:[#allocation68_spill] sm:$0xff] %v7931_v11 }
 0x3d4   : > { %v3242_v60 = vpop.f32.mrb[248].mxu0  ;;  %v7929_v0 = vadd.f32 %v3955_v21, %v3699_v28  ;;  %v6301_v21 = vld [vmem:[%s6433_s30 + $0xf8] sm:$0xff]  }
 0x3d5   : > { %v3244_v46 = vpop.f32.mrb[249].mxu0  ;;  %v3573_v13 = vmax.f32 %v3242_v60, 0.0  ;;  %v4210_v60 = vmul.f32 %v7926_v14, %v7926_v14  ;;  %v3831_v28 = vunpack.c.l.bf16 %v6301_v21 }
 0x3d6   : > { %v3245_v16 = vpop.f32.mrb[250].mxu0  ;;  %v4388_v46 = vadd.f32 %v4387_v25, %v4386_v7  ;;  %8853 = vst [vmem:[#allocation67_spill] sm:$0xff] %v7929_v0  ;;  %v3830_v7 = vunpack.c.h.bf16 %v6300_v10  ;;  %v4211_v30 = vmul.f32 %v7929_v0, %v7929_v0  ;;  %v7941_v10 = vadd.f32 %v3956_v36, %v3700_v55 }
 0x3d7   : > { %v3247_v45 = vpop.f32.mrb[251].mxu0  ;;  %v3701_v56 = vmul.f32 0.5, %v3573_v13  ;;  %v3574_v3 = vmax.f32 %v3245_v16, 0.0  ;;  %v4395_v14 = vsel %vm4281_vm0, %v4210_v60, 0.0 }
 0x3d8   : > { %v4390_v48 = vadd.f32 %v4389_v54, %v4388_v46  ;;  %v4391_v45 = vsel %vm4281_vm0, %v4208_v35, 0.0  ;;  %v3484_v35 = vpop.f32.mrb[213].mxu1  ;;  %8856 = vst [vmem:[#allocation70_spill] sm:$0xff] %v7941_v10  ;;  %v4212_v0 = vmul.f32 %v7941_v10, %v7941_v10 }
 0x3d9   : > { %v7937_v31 = vpop.f32.mrb[214].mxu1  ;;  %v7944_v13 = vadd.f32 %v3957_v33, %v3701_v56  ;;  %v3702_v16 = vmul.f32 0.5, %v3574_v3 }
 0x3da   : > { %v4392_v46 = vadd.f32 %v4391_v45, %v4390_v48  ;;  %8855 = vst [vmem:[#allocation69_spill] sm:$0xff] %v7937_v31  ;;  %v3487_v5 = vpop.f32.mrb[215].mxu1  ;;  %v3959_v48 = vmul.f32 0.5, %v3831_v28  ;;  %v3832_v45 = vunpack.c.h.bf16 %v6301_v21  ;;  %v4397_v31 = vsel %vm4281_vm0, %v4211_v30, 0.0 }
 0x3db   : > { %8857 = vst [vmem:[#allocation71_spill] sm:$0xff] %v7944_v13  ;;  %v6302_v5 = vld [vmem:[%s6433_s30 + $0x100] sm:$0xff]   ;;  %v7950_v60 = vpop.f32.mrb[216].mxu1  ;;  %v4213_v33 = vmul.f32 %v7944_v13, %v7944_v13 }
 0x3dc   : > { %v3250_v63 = vpop.f32.mrb[252].mxu0  ;;  %8858 = vst [vmem:[#allocation72_spill] sm:$0xff] %v7950_v60  ;;  %v3492_v21 = vpop.f32.mrb[217].mxu1  ;;  %v3834_v60 = vunpack.c.h.bf16 %v6302_v5 }
 0x3dd   : > { %v3252_v50 = vpop.f32.mrb[253].mxu0  ;;  %v3575_v12 = vmax.f32 %v3250_v63, 0.0  ;;  %v7956_v30 = vpop.f32.mrb[218].mxu1  ;;  %v4401_v13 = vsel %vm4281_vm0, %v4213_v33, 0.0 }
 0x3de   : > { %v3253_v25 = vpop.f32.mrb[254].mxu0  ;;  %v4394_v50 = vadd.f32 %v4393_v32, %v4392_v46  ;;  %v3833_v32 = vunpack.c.l.bf16 %v6302_v5  ;;  %8860 = vst [vmem:[#allocation74_spill] sm:$0xff] %v7956_v30 }
 0x3df   : > { %v3255_v54 = vpop.f32.mrb[255].mxu0  ;;  %v3703_v55 = vmul.f32 0.5, %v3575_v12  ;;  %v3576_v36 = vmax.f32 %v3253_v25, 0.0  ;;  %v4399_v25 = vsel %vm4281_vm0, %v4212_v0, 0.0 }
 0x3e0   : > { %v3958_v54 = vmul.f32 0.5, %v3830_v7  ;;  %v4396_v11 = vadd.f32 %v4395_v14, %v4394_v50  ;;  %v3960_v50 = vmul.f32 0.5, %v3832_v45  ;;  %v3961_v10 = vmul.f32 0.5, %v3833_v32 }
 0x3e1   : > { %v7959_v14 = vadd.f32 %v3959_v48, %v3703_v55  ;;  %v3704_v12 = vmul.f32 0.5, %v3576_v36 }
 0x3e2   : > { %v7954_v7 = vadd.f32 %v3958_v54, %v3702_v16  ;;  %v4398_v28 = vadd.f32 %v4397_v31, %v4396_v11  ;;  %v6303_v31 = vld [vmem:[%s6433_s30 + $0x108] sm:$0xff]  }
 0x3e3   : > { %8861 = vst [vmem:[#allocation75_spill] sm:$0xff] %v7959_v14  ;;  %v3835_v21 = vunpack.c.l.bf16 %v6303_v31  ;;  %v4215_v0 = vmul.f32 %v7959_v14, %v7959_v14  ;;  %v7967_v48 = vadd.f32 %v3960_v50, %v3704_v12  ;;  %v3836_v30 = vunpack.c.h.bf16 %v6303_v31 }
 0x3e4   : > { %v3258_v35 = vpop.f32.mrb[0].mxu0  ;;  %8859 = vst [vmem:[#allocation73_spill] sm:$0xff] %v7954_v7  ;;  %v4214_v16 = vmul.f32 %v7954_v7, %v7954_v7 }
 0x3e5   : > { %v3260_v63 = vpop.f32.mrb[1].mxu0  ;;  %v3577_v56 = vmax.f32 %v3258_v35, 0.0  ;;  %8862 = vst [vmem:[#allocation76_spill] sm:$0xff] %v7967_v48  ;;  %v3963_v7 = vmul.f32 0.5, %v3835_v21  ;;  %v4405_v12 = vsel %vm4281_vm0, %v4215_v0, 0.0  ;;  %v3964_v31 = vmul.f32 0.5, %v3836_v30 }
 0x3e6   : > { %v3261_v46 = vpop.f32.mrb[2].mxu0  ;;  %v3495_v63 = vpop.f32.mrb[219].mxu1  ;;  %v4403_v33 = vsel %vm4281_vm0, %v4214_v16, 0.0  ;;  %v6304_v16 = vld [vmem:[%s6433_s30 + $0x110] sm:$0xff]  }
 0x3e7   : > { %v3263_v3 = vpop.f32.mrb[3].mxu0  ;;  %v3705_v54 = vmul.f32 0.5, %v3577_v56  ;;  %v3578_v35 = vmax.f32 %v3261_v46, 0.0  ;;  %v7969_v32 = vpop.f32.mrb[220].mxu1 }
 0x3e8   : > { %v4400_v3 = vadd.f32 %v4399_v25, %v4398_v28  ;;  %8863 = vst [vmem:[#allocation77_spill] sm:$0xff] %v7969_v32  ;;  %v3962_v28 = vmul.f32 0.5, %v3834_v60  ;;  %v3500_v63 = vpop.f32.mrb[221].mxu1 }
 0x3e9   : > { %v7972_v56 = vadd.f32 %v3961_v10, %v3705_v54  ;;  %v3706_v46 = vmul.f32 0.5, %v3578_v35  ;;  %v7974_v14 = vpop.f32.mrb[222].mxu1  ;;  %v3837_v10 = vunpack.c.l.bf16 %v6304_v16 }
 0x3ea   : > { %v4402_v36 = vadd.f32 %v4401_v13, %v4400_v3  ;;  %8865 = vst [vmem:[#allocation79_spill] sm:$0xff] %v7974_v14  ;;  %v4216_v13 = vmul.f32 %v7967_v48, %v7967_v48  ;;  %v6308_v14 = vld [vmem:[%s6433_s30 + $0x140] sm:$0xff]  }
 0x3eb   : > { %8864 = vst [vmem:[#allocation78_spill] sm:$0xff] %v7972_v56  ;;  %v4217_v60 = vmul.f32 %v7972_v56, %v7972_v56  ;;  %v7982_v54 = vadd.f32 %v3962_v28, %v3706_v46 }
 0x3ec   : > { %v3266_v11 = vpop.f32.mrb[4].mxu0 }
 0x3ed   : > { %v3579_v45 = vmax.f32 %v3266_v11, 0.0  ;;  %v3268_v55 = vpop.f32.mrb[5].mxu0  ;;  %v3503_v11 = vpop.f32.mrb[223].mxu1  ;;  %8866 = vst [vmem:[#allocation80_spill] sm:$0xff] %v7982_v54  ;;  %v4409_v56 = vsel %vm4281_vm0, %v4217_v60, 0.0  ;;  %v4218_v46 = vmul.f32 %v7982_v54, %v7982_v54 }
 0x3ee   : > { %v3269_v5 = vpop.f32.mrb[6].mxu0  ;;  %v4404_v55 = vadd.f32 %v4403_v33, %v4402_v36  ;;  %v3838_v33 = vunpack.c.h.bf16 %v6304_v16  ;;  %v7987_v11 = vpop.f32.mrb[224].mxu1  ;;  %v6305_v16 = vld [vmem:[%s6433_s30 + $0x118] sm:$0xff]  }
 0x3ef   : > { %v3271_v25 = vpop.f32.mrb[7].mxu0  ;;  %v3707_v50 = vmul.f32 0.5, %v3579_v45  ;;  %v3580_v3 = vmax.f32 %v3269_v5, 0.0  ;;  %v3965_v5 = vmul.f32 0.5, %v3837_v10  ;;  %8868 = vst [vmem:[#allocation82_spill] sm:$0xff] %v7987_v11  ;;  %v3839_v10 = vunpack.c.l.bf16 %v6305_v16 }
 0x3f0   : > { %v4406_v35 = vadd.f32 %v4405_v12, %v4404_v55  ;;  %v4407_v25 = vsel %vm4281_vm0, %v4216_v13, 0.0  ;;  %v3508_v13 = vpop.f32.mrb[225].mxu1  ;;  %v4411_v60 = vsel %vm4281_vm0, %v4218_v46, 0.0 }
 0x3f1   : > { %v7985_v0 = vadd.f32 %v3963_v7, %v3707_v50  ;;  %v3708_v63 = vmul.f32 0.5, %v3580_v3  ;;  %v7992_v50 = vpop.f32.mrb[226].mxu1  ;;  %v3840_v13 = vunpack.c.h.bf16 %v6305_v16 }
 0x3f2   : > { %v4408_v7 = vadd.f32 %v4407_v25, %v4406_v35  ;;  %8869 = vst [vmem:[#allocation83_spill] sm:$0xff] %v7992_v50 }
 0x3f3   : > { %8867 = vst [vmem:[#allocation81_spill] sm:$0xff] %v7985_v0  ;;  %v4219_v3 = vmul.f32 %v7985_v0, %v7985_v0  ;;  %v7996_v55 = vadd.f32 %v3964_v31, %v3708_v63  ;;  %v3967_v63 = vmul.f32 0.5, %v3839_v10  ;;  %v6306_v10 = vld [vmem:[%s6433_s30 + $0x120] sm:$0xff]  }
 0x3f4   : > { %v3274_v21 = vpop.f32.mrb[8].mxu0 }
 0x3f5   : > { %v3581_v48 = vmax.f32 %v3274_v21, 0.0  ;;  %v3276_v45 = vpop.f32.mrb[9].mxu0  ;;  %8870 = vst [vmem:[#allocation84_spill] sm:$0xff] %v7996_v55  ;;  %v3511_v21 = vpop.f32.mrb[227].mxu1  ;;  %v4413_v35 = vsel %vm4281_vm0, %v4219_v3, 0.0  ;;  %v4220_v25 = vmul.f32 %v7996_v55, %v7996_v55 }
 0x3f6   : > { %v3277_v36 = vpop.f32.mrb[10].mxu0  ;;  %v4410_v45 = vadd.f32 %v4409_v56, %v4408_v7  ;;  %v3968_v7 = vmul.f32 0.5, %v3840_v13 }
 0x3f7   : > { %v3709_v30 = vmul.f32 0.5, %v3581_v48  ;;  %v3582_v28 = vmax.f32 %v3277_v36, 0.0  ;;  %v3279_v12 = vpop.f32.mrb[11].mxu0  ;;  %v3966_v36 = vmul.f32 0.5, %v3838_v33  ;;  %v4415_v3 = vsel %vm4281_vm0, %v4220_v25, 0.0 }
 0x3f8   : > { %v4412_v54 = vadd.f32 %v4411_v60, %v4410_v45  ;;  %v3591_v45 = vmax.f32 %v7437_v2, 0.0 }
 0x3f9   : > { %v8000_v11 = vadd.f32 %v3965_v5, %v3709_v30  ;;  %v3710_v48 = vmul.f32 0.5, %v3582_v28 }
 0x3fa   : > { %v4414_v28 = vadd.f32 %v4413_v35, %v4412_v54  ;;  %v3592_v54 = vmax.f32 %v7445_v52, 0.0 }
 0x3fb   : > { %8871 = vst [vmem:[#allocation85_spill] sm:$0xff] %v8000_v11  ;;  %v4221_v56 = vmul.f32 %v8000_v11, %v8000_v11  ;;  %v8007_v5 = vadd.f32 %v3966_v36, %v3710_v48  ;;  %v3842_v36 = vunpack.c.h.bf16 %v6306_v10 }
 0x3fc   : > { %v3282_v12 = vpop.f32.mrb[12].mxu0  ;;  %v4416_v13 = vadd.f32 %v4415_v3, %v4414_v28 }
 0x3fd   : > { %v3583_v31 = vmax.f32 %v3282_v12, 0.0  ;;  %v3284_v0 = vpop.f32.mrb[13].mxu0  ;;  %8872 = vst [vmem:[#allocation86_spill] sm:$0xff] %v8007_v5  ;;  %v4417_v60 = vsel %vm4281_vm0, %v4221_v56, 0.0  ;;  %v4222_v48 = vmul.f32 %v8007_v5, %v8007_v5  ;;  %v3970_v55 = vmul.f32 0.5, %v3842_v36 }
 0x3fe   : > { %v3285_v21 = vpop.f32.mrb[14].mxu0  ;;  %v3841_v0 = vunpack.c.l.bf16 %v6306_v10  ;;  %v3593_v10 = vmax.f32 %v7468_v6, 0.0  ;;  %v4418_v5 = vadd.f32 %v4417_v60, %v4416_v13  ;;  %v3720_v13 = vmul.f32 0.5, %v3592_v54 }
 0x3ff   : > { %v3711_v33 = vmul.f32 0.5, %v3583_v31  ;;  %v3584_v46 = vmax.f32 %v3285_v21, 0.0  ;;  %v3287_v30 = vpop.f32.mrb[15].mxu0  ;;  %v6307_v31 = vld [vmem:[%s6433_s30 + $0x138] sm:$0xff]   ;;  %v4419_v52 = vsel %vm4281_vm0, %v4222_v48, 0.0 }
 0x400   : > { %v3847_v21 = vunpack.c.l.bf16 %v6307_v31  ;;  %v3969_v2 = vmul.f32 0.5, %v3841_v0  ;;  %v3848_v30 = vunpack.c.h.bf16 %v6307_v31  ;;  %v6309_v0 = vld [vmem:[%s6433_s30 + $0x128] sm:$0xff]  }
 0x401   : > { %v8010_v16 = vadd.f32 %v3967_v63, %v3711_v33  ;;  %v3712_v12 = vmul.f32 0.5, %v3584_v46  ;;  %v3719_v46 = vmul.f32 0.5, %v3591_v45  ;;  %v3844_v36 = vunpack.c.h.bf16 %v6309_v0 }
 0x402   : > { %v3975_v48 = vmul.f32 0.5, %v3847_v21 }
 0x403   : > { %8873 = vst [vmem:[#allocation87_spill] sm:$0xff] %v8010_v16  ;;  %v4223_v25 = vmul.f32 %v8010_v16, %v8010_v16  ;;  %v8021_v63 = vadd.f32 %v3968_v7, %v3712_v12  ;;  %v3849_v16 = vunpack.c.l.bf16 %v6308_v14  ;;  %v3594_v7 = vmax.f32 %v7475_v22, 0.0 }
 0x404   : > { %v3290_v35 = vpop.f32.mrb[16].mxu0  ;;  %v3850_v12 = vunpack.c.h.bf16 %v6308_v14 }
 0x405   : > { %8874 = vst [vmem:[#allocation88_spill] sm:$0xff] %v8021_v63  ;;  %v3585_v33 = vmax.f32 %v3290_v35, 0.0  ;;  %v3292_v56 = vpop.f32.mrb[17].mxu0  ;;  %v3843_v35 = vunpack.c.l.bf16 %v6309_v0  ;;  %v4421_v45 = vsel %vm4281_vm0, %v4223_v25, 0.0  ;;  %v4224_v6 = vmul.f32 %v8021_v63, %v8021_v63 }
 0x406   : > { %v3293_v11 = vpop.f32.mrb[18].mxu0  ;;  %v3977_v56 = vmul.f32 0.5, %v3849_v16  ;;  %v3722_v25 = vmul.f32 0.5, %v3594_v7  ;;  %v3978_v32 = vmul.f32 0.5, %v3850_v12 }
 0x407   : > { %v3713_v28 = vmul.f32 0.5, %v3585_v33  ;;  %v3586_v3 = vmax.f32 %v3293_v11, 0.0  ;;  %v3295_v50 = vpop.f32.mrb[19].mxu0  ;;  %v4420_v11 = vadd.f32 %v4419_v52, %v4418_v5  ;;  %v3721_v33 = vmul.f32 0.5, %v3593_v10  ;;  %v6310_v10 = vld [vmem:[%s6433_s30 + $0x148] sm:$0xff]  }
 0x408   : > { %v3976_v50 = vmul.f32 0.5, %v3848_v30  ;;  %v3971_v21 = vmul.f32 0.5, %v3843_v35  ;;  %v8038_v5 = vadd.f32 %v3975_v48, %v3719_v46  ;;  %v3595_v30 = vmax.f32 %v7494_v62, 0.0 }
 0x409   : > { %v8031_v60 = vadd.f32 %v3969_v2, %v3713_v28  ;;  %v3714_v31 = vmul.f32 0.5, %v3586_v3  ;;  %v4422_v20 = vadd.f32 %v4421_v45, %v4420_v11  ;;  %v4423_v2 = vsel %vm4281_vm0, %v4224_v6, 0.0  ;;  %v6311_v11 = vld [vmem:[%s6433_s30 + $0x130] sm:$0xff]  }
 0x40a   : > { %8876 = vst [vmem:[#allocation90_spill] sm:$0xff] %v8038_v5  ;;  %v3851_v52 = vunpack.c.l.bf16 %v6310_v10  ;;  %v8047_v35 = vadd.f32 %v3977_v56, %v3721_v33  ;;  %v8049_v46 = vadd.f32 %v3978_v32, %v3722_v25  ;;  %v3596_v6 = vmax.f32 %v7499_v39, 0.0 }
 0x40b   : > { %v4225_v22 = vmul.f32 %v8031_v60, %v8031_v60  ;;  %v8035_v14 = vadd.f32 %v3970_v55, %v3714_v31  ;;  %v3972_v55 = vmul.f32 0.5, %v3844_v36  ;;  %v4424_v62 = vadd.f32 %v4423_v2, %v4422_v20 }
 0x40c   : > { %v3298_v63 = vpop.f32.mrb[20].mxu0  ;;  %v3845_v36 = vunpack.c.l.bf16 %v6311_v11  ;;  %v3846_v32 = vunpack.c.h.bf16 %v6311_v11  ;;  %v4231_v39 = vmul.f32 %v8038_v5, %v8038_v5  ;;  %v4233_v33 = vmul.f32 %v8047_v35, %v8047_v35 }
 0x40d   : > { %8875 = vst [vmem:[#allocation89_spill] sm:$0xff] %v8035_v14  ;;  %v3587_v28 = vmax.f32 %v3298_v63, 0.0  ;;  %v3300_v54 = vpop.f32.mrb[21].mxu0  ;;  %v4425_v16 = vsel %vm4281_vm0, %v4225_v22, 0.0  ;;  %v4226_v7 = vmul.f32 %v8035_v14, %v8035_v14  ;;  %v8045_v63 = vadd.f32 %v3976_v50, %v3720_v13 }
 0x40e   : > { %v3301_v3 = vpop.f32.mrb[22].mxu0  ;;  %v3723_v22 = vmul.f32 0.5, %v3595_v30  ;;  %v3979_v54 = vmul.f32 0.5, %v3851_v52  ;;  %v3852_v14 = vunpack.c.h.bf16 %v6310_v10  ;;  %v3973_v30 = vmul.f32 0.5, %v3845_v36 }
 0x40f   : > { %v3715_v12 = vmul.f32 0.5, %v3587_v28  ;;  %v3588_v0 = vmax.f32 %v3301_v3, 0.0  ;;  %v3303_v45 = vpop.f32.mrb[23].mxu0  ;;  %8877 = vst [vmem:[#allocation91_spill] sm:$0xff] %v8045_v63  ;;  %v4426_v28 = vadd.f32 %v4425_v16, %v4424_v62  ;;  %v4427_v3 = vsel %vm4281_vm0, %v4226_v7, 0.0 }
 0x410   : > { %v4232_v20 = vmul.f32 %v8045_v63, %v8045_v63  ;;  %v4234_v52 = vmul.f32 %v8049_v46, %v8049_v46  ;;  %v3724_v16 = vmul.f32 0.5, %v3596_v6  ;;  %v6312_v63 = vld [vmem:[%s6433_s30 + $0x150] sm:$0xff]  }
 0x411   : > { %v8052_v31 = vadd.f32 %v3971_v21, %v3715_v12  ;;  %v3716_v48 = vmul.f32 0.5, %v3588_v0  ;;  %v4428_v7 = vadd.f32 %v4427_v3, %v4426_v28  ;;  %v3980_v0 = vmul.f32 0.5, %v3852_v14 }
 0x412   : > { %v3853_v5 = vunpack.c.l.bf16 %v6312_v63  ;;  %v4439_v6 = vsel %vm4281_vm0, %v4232_v20, 0.0  ;;  %v4441_v14 = vsel %vm4281_vm0, %v4233_v33, 0.0  ;;  %v3599_v33 = vmax.f32 %v7543_v38, 0.0 }
 0x413   : > { %8878 = vst [vmem:[#allocation92_spill] sm:$0xff] %v8052_v31  ;;  %v4227_v13 = vmul.f32 %v8052_v31, %v8052_v31  ;;  %v8058_v50 = vadd.f32 %v3972_v55, %v3716_v48  ;;  %v8071_v55 = vadd.f32 %v3979_v54, %v3723_v22  ;;  %v3974_v48 = vmul.f32 0.5, %v3846_v32 }
 0x414   : > { %v3306_v56 = vpop.f32.mrb[24].mxu0  ;;  %v4437_v22 = vsel %vm4281_vm0, %v4231_v39, 0.0  ;;  %v4443_v54 = vsel %vm4281_vm0, %v4234_v52, 0.0  ;;  %v8084_v28 = vadd.f32 %v3980_v0, %v3724_v16  ;;  %v3981_v39 = vmul.f32 0.5, %v3853_v5  ;;  %v6313_v16 = vld [vmem:[%s6433_s30 + $0x158] sm:$0xff]  }
 0x415   : > { %8879 = vst [vmem:[#allocation93_spill] sm:$0xff] %v8058_v50  ;;  %v4429_v25 = vsel %vm4281_vm0, %v4227_v13, 0.0  ;;  %v4228_v2 = vmul.f32 %v8058_v50, %v8058_v50  ;;  %v3589_v21 = vmax.f32 %v3306_v56, 0.0  ;;  %v3308_v10 = vpop.f32.mrb[25].mxu0  ;;  %v3597_v13 = vmax.f32 %v7518_v59, 0.0 }
 0x416   : > { %v3309_v12 = vpop.f32.mrb[26].mxu0  ;;  %v4430_v56 = vadd.f32 %v4429_v25, %v4428_v7  ;;  %v4235_v59 = vmul.f32 %v8071_v55, %v8071_v55  ;;  %v3855_v7 = vunpack.c.l.bf16 %v6313_v16  ;;  %v3601_v5 = vmax.f32 %v7567_v58, 0.0 }
 0x417   : > { %v3717_v45 = vmul.f32 0.5, %v3589_v21  ;;  %v3590_v62 = vmax.f32 %v3309_v12, 0.0  ;;  %v3311_v11 = vpop.f32.mrb[27].mxu0  ;;  %v4431_v36 = vsel %vm4281_vm0, %v4228_v2, 0.0  ;;  %v3725_v25 = vmul.f32 0.5, %v3597_v13 }
 0x418   : > { %v3598_v2 = vmax.f32 %v7525_v9, 0.0  ;;  %v4432_v20 = vadd.f32 %v4431_v36, %v4430_v56  ;;  %v3854_v21 = vunpack.c.h.bf16 %v6312_v63  ;;  %v3600_v12 = vmax.f32 %v7549_v47, 0.0 }
 0x419   : > { %v8076_v10 = vadd.f32 %v3973_v30, %v3717_v45  ;;  %v3718_v50 = vmul.f32 0.5, %v3590_v62  ;;  %v6314_v45 = vld [vmem:[%s6433_s30 + $0x160] sm:$0xff]   ;;  %v3602_v63 = vmax.f32 %v7571_v29, 0.0  ;;  %v4445_v62 = vsel %vm4281_vm0, %v4235_v59, 0.0 }
 0x41a   : > { %v3857_v9 = vunpack.c.l.bf16 %v6314_v45  ;;  %v3603_v11 = vmax.f32 %v7587_v40, 0.0  ;;  %v8103_v56 = vadd.f32 %v3981_v39, %v3725_v25  ;;  %v3726_v36 = vmul.f32 0.5, %v3598_v2 }
 0x41b   : > { %8880 = vst [vmem:[#allocation94_spill] sm:$0xff] %v8076_v10  ;;  %v4229_v3 = vmul.f32 %v8076_v10, %v8076_v10  ;;  %v8088_v32 = vadd.f32 %v3974_v48, %v3718_v50  ;;  %v3856_v50 = vunpack.c.h.bf16 %v6313_v16  ;;  %v3858_v48 = vunpack.c.h.bf16 %v6314_v45 }
 0x41c   : > { %v3982_v47 = vmul.f32 0.5, %v3854_v21  ;;  %v3727_v58 = vmul.f32 0.5, %v3599_v33  ;;  %v3728_v16 = vmul.f32 0.5, %v3600_v12  ;;  %v3729_v10 = vmul.f32 0.5, %v3601_v5  ;;  %v6316_v21 = vld [vmem:[%s6433_s30 + $0x170] sm:$0xff]  }
 0x41d   : > { %8881 = vst [vmem:[#allocation95_spill] sm:$0xff] %v8088_v32  ;;  %v4433_v30 = vsel %vm4281_vm0, %v4229_v3, 0.0  ;;  %v4230_v52 = vmul.f32 %v8088_v32, %v8088_v32  ;;  %v6315_v3 = vld [vmem:[%s6433_s30 + $0x168] sm:$0xff]   ;;  %v3984_v29 = vmul.f32 0.5, %v3856_v50  ;;  %v3730_v31 = vmul.f32 0.5, %v3602_v63 }
 0x41e   : > { %v4434_v0 = vadd.f32 %v4433_v30, %v4432_v20  ;;  %v3859_v20 = vunpack.c.l.bf16 %v6315_v3  ;;  %v3983_v30 = vmul.f32 0.5, %v3855_v7  ;;  %v3986_v59 = vmul.f32 0.5, %v3858_v48 }
 0x41f   : > { %v4435_v38 = vsel %vm4281_vm0, %v4230_v52, 0.0  ;;  %v3985_v52 = vmul.f32 0.5, %v3857_v9  ;;  %v3731_v45 = vmul.f32 0.5, %v3603_v11  ;;  %v3604_v40 = vmax.f32 %v7593_v8, 0.0 }
 0x420   : > { %v4436_v13 = vadd.f32 %v4435_v38, %v4434_v0  ;;  %v3987_v25 = vmul.f32 0.5, %v3859_v20  ;;  %v3860_v39 = vunpack.c.h.bf16 %v6315_v3  ;;  %v3605_v2 = vmax.f32 %v7614_v4, 0.0 }
 0x421   : > { %v3861_v38 = vunpack.c.l.bf16 %v6316_v21  ;;  %v4236_v33 = vmul.f32 %v8084_v28, %v8084_v28  ;;  %v3862_v7 = vunpack.c.h.bf16 %v6316_v21  ;;  %v4237_v50 = vmul.f32 %v8103_v56, %v8103_v56 }
 0x422   : > { %v4438_v32 = vadd.f32 %v4437_v22, %v4436_v13  ;;  %v3606_v22 = vmax.f32 %v7621_v49, 0.0  ;;  %v8114_v5 = vadd.f32 %v3982_v47, %v3726_v36  ;;  %v8116_v8 = vadd.f32 %v3983_v30, %v3727_v58 }
 0x423   : > { %v8122_v4 = vadd.f32 %v3986_v59, %v3730_v31  ;;  %v3732_v9 = vmul.f32 0.5, %v3604_v40  ;;  %v8124_v48 = vadd.f32 %v3987_v25, %v3731_v45  ;;  %v3988_v49 = vmul.f32 0.5, %v3860_v39  ;;  %v6317_v40 = vld [vmem:[%s6433_s30 + $0x178] sm:$0xff]  }
 0x424   : > { %v4440_v0 = vadd.f32 %v4439_v6, %v4438_v32  ;;  %v8118_v6 = vadd.f32 %v3984_v29, %v3728_v16  ;;  %v8120_v32 = vadd.f32 %v3985_v52, %v3729_v10  ;;  %v3733_v11 = vmul.f32 0.5, %v3605_v2 }
 0x425   : > { %v3734_v13 = vmul.f32 0.5, %v3606_v22  ;;  %v3990_v3 = vmul.f32 0.5, %v3862_v7  ;;  %v4447_v47 = vsel %vm4281_vm0, %v4236_v33, 0.0  ;;  %v4449_v20 = vsel %vm4281_vm0, %v4237_v50, 0.0 }
 0x426   : > { %v4442_v12 = vadd.f32 %v4441_v14, %v4440_v0  ;;  %v3989_v14 = vmul.f32 0.5, %v3861_v38  ;;  %v4238_v10 = vmul.f32 %v8114_v5, %v8114_v5  ;;  %v4239_v31 = vmul.f32 %v8116_v8, %v8116_v8 }
 0x427   : > { %v4241_v58 = vmul.f32 %v8120_v32, %v8120_v32  ;;  %v4243_v16 = vmul.f32 %v8124_v48, %v8124_v48  ;;  %v8140_v29 = vadd.f32 %v3988_v49, %v3732_v9  ;;  %v8144_v59 = vadd.f32 %v3990_v3, %v3734_v13 }
 0x428   : > { %v4444_v63 = vadd.f32 %v4443_v54, %v4442_v12  ;;  %v4240_v54 = vmul.f32 %v8118_v6, %v8118_v6  ;;  %v8142_v52 = vadd.f32 %v3989_v14, %v3733_v11  ;;  %v3607_v45 = vmax.f32 %v7640_v34, 0.0 }
 0x429   : > { %8883 = vst [vmem:[#allocation97_spill] sm:$0xff] %v8144_v59  ;;  %v3863_v0 = vunpack.c.l.bf16 %v6317_v40  ;;  %v4451_v39 = vsel %vm4281_vm0, %v4238_v10, 0.0  ;;  %v3608_v2 = vmax.f32 %v7645_v15, 0.0  ;;  %v3864_v21 = vunpack.c.h.bf16 %v6317_v40  ;;  %v6320_v40 = vld [vmem:[%s6433_s30 + $0x190] sm:$0xff]  }
 0x42a   : > { %v4446_v36 = vadd.f32 %v4445_v62, %v4444_v63  ;;  %v4242_v62 = vmul.f32 %v8122_v4, %v8122_v4  ;;  %8882 = vst [vmem:[#allocation96_spill] sm:$0xff] %v8142_v52  ;;  %v4453_v38 = vsel %vm4281_vm0, %v4239_v31, 0.0  ;;  %v4455_v33 = vsel %vm4281_vm0, %v4240_v54, 0.0 }
 0x42b   : > { %v4457_v22 = vsel %vm4281_vm0, %v4241_v58, 0.0  ;;  %v4461_v34 = vsel %vm4281_vm0, %v4243_v16, 0.0  ;;  %v4244_v50 = vmul.f32 %v8140_v29, %v8140_v29  ;;  %v4245_v15 = vmul.f32 %v8142_v52, %v8142_v52  ;;  %v6319_v58 = vld [vmem:[%s6433_s30 + $0x188] sm:$0xff]  }
 0x42c   : > { %v4448_v30 = vadd.f32 %v4447_v47, %v4446_v36  ;;  %v4459_v12 = vsel %vm4281_vm0, %v4242_v62, 0.0  ;;  %v4246_v9 = vmul.f32 %v8144_v59, %v8144_v59  ;;  %v3735_v63 = vmul.f32 0.5, %v3607_v45  ;;  %v6318_v36 = vld [vmem:[%s6433_s30 + $0x180] sm:$0xff]  }
 0x42d   : > { %v3991_v49 = vmul.f32 0.5, %v3863_v0  ;;  %v3736_v14 = vmul.f32 0.5, %v3608_v2  ;;  %v3992_v13 = vmul.f32 0.5, %v3864_v21  ;;  %v3609_v3 = vmax.f32 %v7664_v44, 0.0 }
 0x42e   : > { %v4450_v25 = vadd.f32 %v4449_v20, %v4448_v30  ;;  %v3865_v47 = vunpack.c.l.bf16 %v6318_v36  ;;  %v3610_v20 = vmax.f32 %v7671_v23, 0.0  ;;  %v3866_v10 = vunpack.c.h.bf16 %v6318_v36 }
 0x42f   : > { %v3611_v31 = vmax.f32 %v7689_v61, 0.0  ;;  %v3867_v30 = vunpack.c.l.bf16 %v6319_v58  ;;  %v3612_v62 = vmax.f32 %v7695_v57, 0.0  ;;  %v3868_v16 = vunpack.c.h.bf16 %v6319_v58 }
 0x430   : > { %v4452_v7 = vadd.f32 %v4451_v39, %v4450_v25  ;;  %v3613_v45 = vmax.f32 %v7713_v17, 0.0  ;;  %v3869_v0 = vunpack.c.l.bf16 %v6320_v40  ;;  %v3614_v25 = vmax.f32 %v7716_v24, 0.0 }
 0x431   : > { %v3870_v44 = vunpack.c.h.bf16 %v6320_v40  ;;  %v8170_v2 = vadd.f32 %v3991_v49, %v3735_v63  ;;  %v8172_v23 = vadd.f32 %v3992_v13, %v3736_v14  ;;  %v3737_v21 = vmul.f32 0.5, %v3609_v3  ;;  %v6321_v49 = vld [vmem:[%s6433_s30 + $0x198] sm:$0xff]  }
 0x432   : > { %v4454_v11 = vadd.f32 %v4453_v38, %v4452_v7  ;;  %v3993_v61 = vmul.f32 0.5, %v3865_v47  ;;  %v3738_v38 = vmul.f32 0.5, %v3610_v20  ;;  %v3739_v7 = vmul.f32 0.5, %v3611_v31 }
 0x433   : > { %v3740_v36 = vmul.f32 0.5, %v3612_v62  ;;  %v3996_v17 = vmul.f32 0.5, %v3868_v16  ;;  %v3741_v58 = vmul.f32 0.5, %v3613_v45  ;;  %v3997_v59 = vmul.f32 0.5, %v3869_v0 }
 0x434   : > { %v4456_v54 = vadd.f32 %v4455_v33, %v4454_v11  ;;  %v3994_v33 = vmul.f32 0.5, %v3866_v10  ;;  %v3995_v11 = vmul.f32 0.5, %v3867_v30  ;;  %v3742_v52 = vmul.f32 0.5, %v3614_v25 }
 0x435   : > { %v3998_v24 = vmul.f32 0.5, %v3870_v44  ;;  %v3615_v63 = vmax.f32 %v7734_v37, 0.0  ;;  %v3871_v14 = vunpack.c.l.bf16 %v6321_v49  ;;  %v4465_v13 = vsel %vm4281_vm0, %v4245_v15, 0.0 }
 0x436   : > { %v4458_v39 = vadd.f32 %v4457_v22, %v4456_v54  ;;  %v4463_v22 = vsel %vm4281_vm0, %v4244_v50, 0.0  ;;  %v4467_v3 = vsel %vm4281_vm0, %v4246_v9, 0.0  ;;  %v4248_v20 = vmul.f32 %v8172_v23, %v8172_v23 }
 0x437   : > { %v8183_v10 = vadd.f32 %v3993_v61, %v3737_v21  ;;  %v8187_v50 = vadd.f32 %v3995_v11, %v3739_v7  ;;  %v8189_v37 = vadd.f32 %v3996_v17, %v3740_v36  ;;  %v8191_v31 = vadd.f32 %v3997_v59, %v3741_v58  ;;  %v6322_v36 = vld [vmem:[%s6433_s30 + $0x1a0] sm:$0xff]  }
 0x438   : > { %v4460_v57 = vadd.f32 %v4459_v12, %v4458_v39  ;;  %v4247_v12 = vmul.f32 %v8170_v2, %v8170_v2  ;;  %v8193_v15 = vadd.f32 %v3998_v24, %v3742_v52  ;;  %v3743_v54 = vmul.f32 0.5, %v3615_v63 }
 0x439   : > { %v3999_v30 = vmul.f32 0.5, %v3871_v14  ;;  %v3616_v62 = vmax.f32 %v7741_v41, 0.0  ;;  %v3872_v16 = vunpack.c.h.bf16 %v6321_v49  ;;  %v4471_v25 = vsel %vm4281_vm0, %v4248_v20, 0.0 }
 0x43a   : > { %v4462_v40 = vadd.f32 %v4461_v34, %v4460_v57  ;;  %v8185_v34 = vadd.f32 %v3994_v33, %v3738_v38  ;;  %v4469_v0 = vsel %vm4281_vm0, %v4247_v12, 0.0  ;;  %v4249_v44 = vmul.f32 %v8183_v10, %v8183_v10 }
 0x43b   : > { %v4251_v52 = vmul.f32 %v8187_v50, %v8187_v50  ;;  %v4252_v39 = vmul.f32 %v8189_v37, %v8189_v37  ;;  %v4253_v41 = vmul.f32 %v8191_v31, %v8191_v31  ;;  %v4254_v61 = vmul.f32 %v8193_v15, %v8193_v15 }
 0x43c   : > { %v4464_v47 = vadd.f32 %v4463_v22, %v4462_v40  ;;  %v4250_v59 = vmul.f32 %v8185_v34, %v8185_v34  ;;  %v8210_v38 = vadd.f32 %v3999_v30, %v3743_v54  ;;  %v3744_v33 = vmul.f32 0.5, %v3616_v62  ;;  %v6323_v30 = vld [vmem:[%s6433_s30 + $0x1a8] sm:$0xff]  }
 0x43d   : > { %v4000_v7 = vmul.f32 0.5, %v3872_v16  ;;  %v3617_v11 = vmax.f32 %v7760_v51, 0.0  ;;  %v3873_v17 = vunpack.c.l.bf16 %v6322_v36  ;;  %v3618_v58 = vmax.f32 %v7768_v42, 0.0 }
 0x43e   : > { %v4466_v9 = vadd.f32 %v4465_v13, %v4464_v47  ;;  %v4473_v24 = vsel %vm4281_vm0, %v4249_v44, 0.0  ;;  %v4475_v40 = vsel %vm4281_vm0, %v4250_v59, 0.0  ;;  %v4477_v22 = vsel %vm4281_vm0, %v4251_v52, 0.0  ;;  %v6324_v59 = vld [vmem:[%s6433_s30 + $0x1b0] sm:$0xff]  }
 0x43f   : > { %v4479_v63 = vsel %vm4281_vm0, %v4252_v39, 0.0  ;;  %v3874_v14 = vunpack.c.h.bf16 %v6322_v36  ;;  %v4481_v13 = vsel %vm4281_vm0, %v4253_v41, 0.0  ;;  %v4483_v51 = vsel %vm4281_vm0, %v4254_v61, 0.0  ;;  %v6325_v61 = vld [vmem:[%s6433_s30 + $0x1b8] sm:$0xff]  }
 0x440   : > { %v4468_v45 = vadd.f32 %v4467_v3, %v4466_v9  ;;  %v4255_v3 = vmul.f32 %v8210_v38, %v8210_v38  ;;  %v8223_v42 = vadd.f32 %v4000_v7, %v3744_v33  ;;  %v3745_v47 = vmul.f32 0.5, %v3617_v11 }
 0x441   : > { %v4001_v20 = vmul.f32 0.5, %v3873_v17  ;;  %v3746_v9 = vmul.f32 0.5, %v3618_v58  ;;  %v3619_v54 = vmax.f32 %v7783_v43, 0.0  ;;  %v3875_v62 = vunpack.c.l.bf16 %v6323_v30 }
 0x442   : > { %v4470_v21 = vadd.f32 %v4469_v0, %v4468_v45  ;;  %v3620_v16 = vmax.f32 %v7790_v1, 0.0  ;;  %v3876_v45 = vunpack.c.h.bf16 %v6323_v30  ;;  %v3621_v44 = vmax.f32 %v7810_v18, 0.0  ;;  %v6326_v30 = vld [vmem:[%s6433_s30 + $0x1c0] sm:$0xff]  }
 0x443   : > { %v3877_v52 = vunpack.c.l.bf16 %v6324_v59  ;;  %v3622_v39 = vmax.f32 %v7817_v26, 0.0  ;;  %v3878_v41 = vunpack.c.h.bf16 %v6324_v59  ;;  %v3879_v33 = vunpack.c.l.bf16 %v6325_v61 }
 0x444   : > { %v4472_v57 = vadd.f32 %v4471_v25, %v4470_v21  ;;  %v4002_v25 = vmul.f32 0.5, %v3874_v14  ;;  %v3623_v21 = vmax.f32 %v7833_v27, 0.0  ;;  %v4485_v43 = vsel %vm4281_vm0, %v4255_v3, 0.0 }
 0x445   : > { %v4256_v7 = vmul.f32 %v8223_v42, %v8223_v42  ;;  %v3747_v11 = vmul.f32 0.5, %v3619_v54  ;;  %v4003_v36 = vmul.f32 0.5, %v3875_v62  ;;  %v3748_v18 = vmul.f32 0.5, %v3620_v16 }
 0x446   : > { %v4474_v49 = vadd.f32 %v4473_v24, %v4472_v57  ;;  %v8236_v57 = vadd.f32 %v4001_v20, %v3745_v47  ;;  %v4004_v17 = vmul.f32 0.5, %v3876_v45  ;;  %v8238_v26 = vadd.f32 %v4002_v25, %v3746_v9 }
 0x447   : > { %v3749_v24 = vmul.f32 0.5, %v3621_v44  ;;  %v4005_v27 = vmul.f32 0.5, %v3877_v52  ;;  %v4007_v14 = vmul.f32 0.5, %v3879_v33  ;;  %v3880_v47 = vunpack.c.h.bf16 %v6325_v61 }
 0x448   : > { %v4476_v12 = vadd.f32 %v4475_v40, %v4474_v49  ;;  %v3750_v40 = vmul.f32 0.5, %v3622_v39  ;;  %v3751_v49 = vmul.f32 0.5, %v3623_v21  ;;  %v8243_v20 = vadd.f32 %v4003_v36, %v3747_v11 }
 0x449   : > { %v8245_v54 = vadd.f32 %v4004_v17, %v3748_v18  ;;  %v3881_v62 = vunpack.c.l.bf16 %v6326_v30  ;;  %v8249_v45 = vadd.f32 %v4005_v27, %v3749_v24  ;;  %v4008_v39 = vmul.f32 0.5, %v3880_v47 }
 0x44a   : > { %v4478_v0 = vadd.f32 %v4477_v22, %v4476_v12  ;;  %v4006_v22 = vmul.f32 0.5, %v3878_v41  ;;  %v3624_v12 = vmax.f32 %v7839_v53, 0.0  ;;  %8884 = vst [vmem:[#allocation98_spill] sm:$0xff] %v8243_v20  ;;  %v8256_v53 = vadd.f32 %v4007_v14, %v3751_v49  ;;  %v6327_v49 = vld [vmem:[%s6433_s30 + $0x1c8] sm:$0xff]  }
 0x44b   : > { %8885 = vst [vmem:[#allocation99_spill] sm:$0xff] %v8245_v54  ;;  %v4259_v41 = vmul.f32 %v8243_v20, %v8243_v20  ;;  %v4260_v21 = vmul.f32 %v8245_v54, %v8245_v54  ;;  %v4009_v33 = vmul.f32 0.5, %v3881_v62  ;;  %v3882_v36 = vunpack.c.h.bf16 %v6326_v30 }
 0x44c   : > { %v4480_v1 = vadd.f32 %v4479_v63, %v4478_v0  ;;  %v4257_v63 = vmul.f32 %v8236_v57, %v8236_v57  ;;  %v4487_v0 = vsel %vm4281_vm0, %v4256_v7, 0.0  ;;  %v8254_v25 = vadd.f32 %v4006_v22, %v3750_v40  ;;  %8889 = vst [vmem:[#allocation101_spill] sm:$0xff] %v8256_v53  ;;  %v8892_v40 = vld [vmem:[#allocation55_spill] sm:$0xff] }
 0x44d   : > { %v3752_v52 = vmul.f32 0.5, %v3624_v12  ;;  %v4261_v7 = vmul.f32 %v8249_v45, %v8249_v45  ;;  %v3627_v22 = vmax.f32 %v8892_v40, 0.0  ;;  %v3883_v14 = vunpack.c.l.bf16 %v6327_v49  ;;  %v8895_v40 = vld [vmem:[#allocation61_spill] sm:$0xff] }
 0x44e   : > { %v4482_v58 = vadd.f32 %v4481_v13, %v4480_v1  ;;  %v8886_v13 = vld [vmem:[#allocation52_spill] sm:$0xff]  ;;  %8888 = vst [vmem:[#allocation100_spill] sm:$0xff] %v8254_v25  ;;  %v4489_v59 = vsel %vm4281_vm0, %v4257_v63, 0.0  ;;  %v8890_v1 = vld [vmem:[#allocation53_spill] sm:$0xff]  ;;  %v4262_v17 = vmul.f32 %v8254_v25, %v8254_v25  ;;  %v4495_v63 = vsel %vm4281_vm0, %v4260_v21, 0.0 }
 0x44f   : > { %v3625_v9 = vmax.f32 %v8886_v13, 0.0  ;;  %8887 = vst [vmem:[#allocation52_spill] sm:$0xff] %v8249_v45  ;;  %v3626_v11 = vmax.f32 %v8890_v1, 0.0  ;;  %v8271_v27 = vadd.f32 %v4008_v39, %v3752_v52  ;;  %v4497_v13 = vsel %vm4281_vm0, %v4261_v7, 0.0  ;;  %v6333_v25 = vld [vmem:[%s6433_s30 + $0x1f8] sm:$0xff]  }
 0x450   : > { %v4484_v3 = vadd.f32 %v4483_v51, %v4482_v58  ;;  %v4258_v51 = vmul.f32 %v8238_v26, %v8238_v26  ;;  %v4263_v58 = vmul.f32 %v8256_v53, %v8256_v53  ;;  %v4010_v30 = vmul.f32 0.5, %v3882_v36 }
 0x451   : > { %v3753_v61 = vmul.f32 0.5, %v3625_v9  ;;  %8891 = vst [vmem:[#allocation53_spill] sm:$0xff] %v8271_v27  ;;  %v3754_v9 = vmul.f32 0.5, %v3626_v11  ;;  %v4499_v62 = vsel %vm4281_vm0, %v4262_v17, 0.0  ;;  %v4264_v52 = vmul.f32 %v8271_v27, %v8271_v27 }
 0x452   : > { %v4486_v16 = vadd.f32 %v4485_v43, %v4484_v3  ;;  %v4491_v18 = vsel %vm4281_vm0, %v4258_v51, 0.0  ;;  %v4493_v3 = vsel %vm4281_vm0, %v4259_v41, 0.0  ;;  %v3755_v39 = vmul.f32 0.5, %v3627_v22 }
 0x453   : > { %v8277_v12 = vadd.f32 %v4009_v33, %v3753_v61  ;;  %v4011_v41 = vmul.f32 0.5, %v3883_v14  ;;  %v8894_v61 = vld [vmem:[#allocation59_spill] sm:$0xff]  ;;  %v8289_v11 = vadd.f32 %v4010_v30, %v3754_v9  ;;  %v6359_v36 = vmov 1983009808  }
 0x454   : > { %v4488_v44 = vadd.f32 %v4487_v0, %v4486_v16  ;;  %v4501_v16 = vsel %vm4281_vm0, %v4263_v58, 0.0  ;;  %v8893_v0 = vld [vmem:[#allocation56_spill] sm:$0xff]  ;;  %v3629_v33 = vmax.f32 %v8894_v61, 0.0  ;;  %v4744_v17 = vlaneseq }
 0x455   : > { %v3628_v51 = vmax.f32 %v8893_v0, 0.0  ;;  %v4265_v21 = vmul.f32 %v8277_v12, %v8277_v12  ;;  %v3896_v54 = vunpack.c.h.bf16 %v6333_v25 }
 0x456   : > { %v4490_v43 = vadd.f32 %v4489_v59, %v4488_v44  ;;  %v3884_v44 = vunpack.c.h.bf16 %v6327_v49  ;;  %v3630_v49 = vmax.f32 %v8895_v40, 0.0  ;;  %v3757_v0 = vmul.f32 0.5, %v3629_v33 }
 0x457   : > { %v3756_v58 = vmul.f32 0.5, %v3628_v51  ;;  %v4266_v51 = vmul.f32 %v8289_v11, %v8289_v11  ;;  %v4505_v33 = vsel %vm4281_vm0, %v4265_v21, 0.0 }
 0x458   : > { %v4492_v24 = vadd.f32 %v4491_v18, %v4490_v43  ;;  %v6328_v43 = vld [vmem:[%s6433_s30 + $0x1d0] sm:$0xff]   ;;  %v4742_v18 = vunpack.c.l.s4 %v6359_v36  ;;  %v4503_v36 = vsel %vm4281_vm0, %v4264_v52, 0.0 }
 0x459   : > { %v3885_v7 = vunpack.c.l.bf16 %v6328_v43  ;;  %v3886_v22 = vunpack.c.h.bf16 %v6328_v43  ;;  %v4507_v21 = vsel %vm4281_vm0, %v4266_v51, 0.0 }
 0x45a   : > { %v4494_v47 = vadd.f32 %v4493_v3, %v4492_v24  ;;  %v4012_v24 = vmul.f32 0.5, %v3884_v44  ;;  %v8292_v3 = vadd.f32 %v4011_v41, %v3755_v39  ;;  %v8306_v41 = vld [vmem:[%s8698_s3] sm:$0xff] }
 0x45b   : > { %v4013_v61 = vmul.f32 0.5, %v3885_v7  ;;  %v4014_v39 = vmul.f32 0.5, %v3886_v22 }
 0x45c   : > { %v4496_v59 = vadd.f32 %v4495_v63, %v4494_v47  ;;  %v4743_v63 = vunpack.c.0.s8 %v4742_v18  ;;  %v4745_v47 = vshrl.u32 %v4744_v17, 7  ;;  %v8301_v44 = vadd.f32 %v4012_v24, %v3756_v58  ;;  %v8896_v18 = vld [vmem:[#allocation65_spill] sm:$0xff] }
 0x45d   : > { %v8315_v43 = vadd.f32 %v4013_v61, %v3757_v0  ;;  %v3632_v17 = vmax.f32 %v8896_v18, 0.0 }
 0x45e   : > { %v4498_v1 = vadd.f32 %v4497_v13, %v4496_v59  ;;  %v3631_v13 = vmax.f32 %v7913_v19, 0.0  ;;  %v6329_v59 = vld [vmem:[%s6433_s30 + $0x1d8] sm:$0xff]   ;;  %v8297_v27 = vsub.s32 %v4743_v63, %v4745_v47 }
 0x45f   : > { %v3887_v9 = vunpack.c.l.bf16 %v6329_v59  ;;  %v3888_v24 = vunpack.c.h.bf16 %v6329_v59  ;;  %v4269_v47 = vmul.f32 %v8315_v43, %v8315_v43  ;;  %v3760_v61 = vmul.f32 0.5, %v3632_v17 }
 0x460   : > { %v4500_v14 = vadd.f32 %v4499_v62, %v4498_v1  ;;  %v3758_v62 = vmul.f32 0.5, %v3630_v49  ;;  %v8313_v52 = vrot.slane %v8306_v41, %v8297_v27  ;;  %v3759_v7 = vmul.f32 0.5, %v3631_v13 }
 0x461   : > { %v4015_v1 = vmul.f32 0.5, %v3887_v9  ;;  %v4268_v49 = vmul.f32 %v8301_v44, %v8301_v44  ;;  %v4016_v59 = vmul.f32 0.5, %v3888_v24  ;;  %v8897_v9 = vld [vmem:[#allocation68_spill] sm:$0xff] }
 0x462   : > { %v4502_v30 = vadd.f32 %v4501_v16, %v4500_v14  ;;  %v4267_v16 = vmul.f32 %v8292_v3, %v8292_v3  ;;  %v4755_v40 = vcombine.high %v8313_v52, %v8313_v52  ;;  %v8323_v22 = vadd.f32 %v4014_v39, %v3758_v62 }
 0x463   : > { %v8328_v0 = vadd.f32 %v4015_v1, %v3759_v7  ;;  %v4513_v7 = vsel %vm4281_vm0, %v4269_v47, 0.0 }
 0x464   : > { %v4504_v19 = vadd.f32 %v4503_v36, %v4502_v30  ;;  %4814 = vmatprep.mubr.bf16.mxu1 %v4755_v40  ;;  %v4509_v63 = vsel %vm4281_vm0, %v4267_v16, 0.0  ;;  %v3633_v30 = vmax.f32 %v8897_v9, 0.0  ;;  %v6330_v36 = vld [vmem:[%s6433_s30 + $0x1e0] sm:$0xff]   ;;  %v4270_v62 = vmul.f32 %v8323_v22, %v8323_v22  ;;  %v8899_v9 = vld [vmem:[#allocation72_spill] sm:$0xff] }
 0x465   : > { %v3889_v51 = vunpack.c.l.bf16 %v6330_v36  ;;  %v3890_v18 = vunpack.c.h.bf16 %v6330_v36  ;;  %v4271_v1 = vmul.f32 %v8328_v0, %v8328_v0 }
 0x466   : > { %v4506_v58 = vadd.f32 %v4505_v33, %v4504_v19  ;;  %v4511_v19 = vsel %vm4281_vm0, %v4268_v49, 0.0  ;;  %v8898_v33 = vld [vmem:[#allocation69_spill] sm:$0xff]  ;;  %v3761_v24 = vmul.f32 0.5, %v3633_v30 }
 0x467   : > { %v3634_v16 = vmax.f32 %v8898_v33, 0.0  ;;  %v4017_v40 = vmul.f32 0.5, %v3889_v51  ;;  %v4517_v36 = vsel %vm4281_vm0, %v4271_v1, 0.0 }
 0x468   : > { %v4508_v14 = vadd.f32 %v4507_v21, %v4506_v58  ;;  %v8339_v58 = vadd.f32 %v4016_v59, %v3760_v61  ;;  %v4515_v21 = vsel %vm4281_vm0, %v4270_v62, 0.0  ;;  %v8900_v62 = vld [vmem:[#allocation74_spill] sm:$0xff] }
 0x469   : > { %v8347_v53 = vadd.f32 %v4017_v40, %v3761_v24 }
 0x46a   : > { %v4510_v13 = vadd.f32 %v4509_v63, %v4508_v14  ;;  %v3762_v14 = vmul.f32 0.5, %v3634_v16  ;;  %v4018_v63 = vmul.f32 0.5, %v3890_v18  ;;  %v4272_v47 = vmul.f32 %v8339_v58, %v8339_v58 }
 0x46c   : > { %v4512_v39 = vadd.f32 %v4511_v19, %v4510_v13  ;;  %v3635_v13 = vmax.f32 %v8899_v9, 0.0  ;;  %v6331_v19 = vld [vmem:[%s6433_s30 + $0x1e8] sm:$0xff]   ;;  %v8349_v59 = vadd.f32 %v4018_v63, %v3762_v14  ;;  %v4519_v18 = vsel %vm4281_vm0, %v4272_v47, 0.0  ;;  %v8901_v14 = vld [vmem:[#allocation77_spill] sm:$0xff]  ;;  %v6332_v9 = vld [vmem:[%s6433_s30 + $0x1f0] sm:$0xff]  }
 0x46d   : > { %v3891_v33 = vunpack.c.l.bf16 %v6331_v19  ;;  %v3892_v16 = vunpack.c.h.bf16 %v6331_v19  ;;  %v3637_v63 = vmax.f32 %v8901_v14, 0.0  ;;  %v3895_v14 = vunpack.c.l.bf16 %v6333_v25 }
 0x46e   : > { %v4514_v17 = vadd.f32 %v4513_v7, %v4512_v39  ;;  %v3763_v30 = vmul.f32 0.5, %v3635_v13  ;;  %v3636_v39 = vmax.f32 %v8900_v62, 0.0  ;;  %v4273_v7 = vmul.f32 %v8347_v53, %v8347_v53 }
 0x46f   : > { %v4019_v51 = vmul.f32 0.5, %v3891_v33  ;;  %v3893_v13 = vunpack.c.l.bf16 %v6332_v9 }
 0x470   : > { %v4516_v49 = vadd.f32 %v4515_v21, %v4514_v17  ;;  %v4274_v17 = vmul.f32 %v8349_v59, %v8349_v59  ;;  %v3764_v40 = vmul.f32 0.5, %v3636_v39  ;;  %v4020_v21 = vmul.f32 0.5, %v3892_v16 }
 0x471   : > { %v8357_v24 = vadd.f32 %v4019_v51, %v3763_v30  ;;  %v4021_v30 = vmul.f32 0.5, %v3893_v13  ;;  %v8903_v51 = vld [vmem:[#allocation79_spill] sm:$0xff]  ;;  %v3894_v39 = vunpack.c.h.bf16 %v6332_v9  ;;  %v4023_v13 = vmul.f32 0.5, %v3895_v14 }
 0x472   : > { %v4518_v61 = vadd.f32 %v4517_v36, %v4516_v49  ;;  %v4521_v49 = vsel %vm4281_vm0, %v4273_v7, 0.0  ;;  %v4523_v33 = vsel %vm4281_vm0, %v4274_v17, 0.0  ;;  %v8365_v47 = vadd.f32 %v4020_v21, %v3764_v40 }
 0x473   : > { %v4275_v36 = vmul.f32 %v8357_v24, %v8357_v24  ;;  %v3638_v62 = vmax.f32 %v8903_v51, 0.0  ;;  %v4022_v40 = vmul.f32 0.5, %v3894_v39 }
 0x474   : > { %v4520_v1 = vadd.f32 %v4519_v18, %v4518_v61  ;;  %8902 = vst [vmem:[#allocation55_spill] sm:$0xff] %v8365_v47  ;;  %v3765_v61 = vmul.f32 0.5, %v3637_v63  ;;  %v8904_v18 = vld [vmem:[#allocation82_spill] sm:$0xff] }
 0x475   : > { %v3639_v7 = vmax.f32 %v8904_v18, 0.0  ;;  %v4525_v17 = vsel %vm4281_vm0, %v4275_v36, 0.0  ;;  %v3766_v45 = vmul.f32 0.5, %v3638_v62  ;;  %v4024_v62 = vmul.f32 0.5, %v3896_v54 }
 0x476   : > { %v4522_v19 = vadd.f32 %v4521_v49, %v4520_v1  ;;  %v4276_v1 = vmul.f32 %v8365_v47, %v8365_v47  ;;  %v8373_v49 = vadd.f32 %v4021_v30, %v3765_v61 }
 0x477   : > { %v3767_v63 = vmul.f32 0.5, %v3639_v7 }
 0x478   : > { %v4524_v16 = vadd.f32 %v4523_v33, %v4522_v19  ;;  %v4527_v51 = vsel %vm4281_vm0, %v4276_v1, 0.0  ;;  %v4277_v9 = vmul.f32 %v8373_v49, %v8373_v49  ;;  %v8378_v19 = vadd.f32 %v4022_v40, %v3766_v45  ;;  %v8905_v33 = vld [vmem:[#allocation83_spill] sm:$0xff] }
 0x479   : > { %v3640_v18 = vmax.f32 %v8905_v33, 0.0  ;;  %v8381_v47 = vadd.f32 %v4023_v13, %v3767_v63 }
 0x47a   : > { %v4526_v21 = vadd.f32 %v4525_v17, %v4524_v16  ;;  %v4529_v36 = vsel %vm4281_vm0, %v4277_v9, 0.0  ;;  %v4278_v61 = vmul.f32 %v8378_v19, %v8378_v19 }
 0x47b   : > { %v3768_v30 = vmul.f32 0.5, %v3640_v18  ;;  %v4279_v16 = vmul.f32 %v8381_v47, %v8381_v47  ;;  %v8906_v18 = vld [vmem:[#allocation2_spill] sm:$0xff] }
 0x47c   : > { %v4528_v20 = vadd.f32 %v4527_v51, %v4526_v21  ;;  %v4531_v45 = vsel %vm4281_vm0, %v4278_v61, 0.0  ;;  %v8907_v61 = vld [vmem:[#allocation3_spill] sm:$0xff] }
 0x47d   : > { %v8389_v7 = vadd.f32 %v4024_v62, %v3768_v30  ;;  %v4533_v25 = vsel %vm4281_vm0, %v4279_v16, 0.0  ;;  %v8908_v62 = vld [vmem:[#allocation4_spill] sm:$0xff]  ;;  %v8909_v16 = vld [vmem:[#allocation5_spill] sm:$0xff] }
 0x47e   : > { %v4530_v39 = vadd.f32 %v4529_v36, %v4528_v20 }
 0x47f   : > { %v4280_v1 = vmul.f32 %v8389_v7, %v8389_v7 }
 0x480   : > { %v4532_v14 = vadd.f32 %v4531_v45, %v4530_v39 }
 0x481   : > { %v4535_v40 = vsel %vm4281_vm0, %v4280_v1, 0.0  ;;  %v8911_v1 = vld [vmem:[#allocation21_spill] sm:$0xff] }
 0x482   : > { %v4534_v17 = vadd.f32 %v4533_v25, %v4532_v14  ;;  %v8910_v14 = vld [vmem:[#allocation20_spill] sm:$0xff] }
 0x484   : > { %v4536_v21 = vadd.f32 %v4535_v40, %v4534_v17 }
 0x486   : > { %v4537_v63 = vrot.slane %v4536_v21, 4 }
 0x488   : > { %v4538_v54 = vadd.f32 %v4537_v63, %v4536_v21  ;;  %v8912_v63 = vld [vmem:[#allocation6_spill] sm:$0xff] }
 0x48a   : > { %v4539_v20 = vrot.slane %v4538_v54, 2 }
 0x48c   : > { %v4540_v13 = vadd.f32 %v4539_v20, %v4538_v54  ;;  %v8913_v20 = vld [vmem:[#allocation7_spill] sm:$0xff] }
 0x48e   : > { %v4541_v51 = vrot.slane %v4540_v13, 1 }
 0x490   : > { %v4542_v9 = vadd.f32 %v4541_v51, %v4540_v13  ;;  %v8914_v51 = vld [vmem:[#allocation23_spill] sm:$0xff] }
 0x492   : > { %6268 = vrsqrt.f32 %v4542_v9 }
 0x49c   : > { %v8395_v33 = vpop.eup %6268 }
 0x49d   : > { %v4544_v36 = vmul.f32 %v8395_v33, %v8906_v18  ;;  %v4545_v30 = vmul.f32 %v8395_v33, %v8907_v61  ;;  %v4560_v39 = vmul.f32 %v8395_v33, %v8908_v62  ;;  %v4561_v45 = vmul.f32 %v8395_v33, %v8909_v16  ;;  %v8915_v18 = vld [vmem:[#allocation25_spill] sm:$0xff]  ;;  %v8916_v16 = vld [vmem:[#allocation8_spill] sm:$0xff] }
 0x49e   : > { %v4562_v25 = vmul.f32 %v8395_v33, %v8910_v14  ;;  %v4563_v17 = vmul.f32 %v8395_v33, %v8911_v1  ;;  %v4546_v54 = vmul.f32 %v8395_v33, %v8912_v63  ;;  %v4547_v13 = vmul.f32 %v8395_v33, %v8913_v20  ;;  %v8918_v14 = vld [vmem:[#allocation26_spill] sm:$0xff]  ;;  %v8919_v63 = vld [vmem:[#allocation27_spill] sm:$0xff] }
 0x49f   : > { %v4674_v40 = vpack.c.bf16 %v4545_v30, %v4544_v36  ;;  %v4682_v21 = vpack.c.bf16 %v4561_v45, %v4560_v39  ;;  %v4564_v9 = vmul.f32 %v8395_v33, %v8914_v51  ;;  %v4565_v61 = vmul.f32 %v8395_v33, %v8915_v18  ;;  %v8917_v30 = vld [vmem:[#allocation9_spill] sm:$0xff] }
 0x4a0   : > { %v4683_v62 = vpack.c.bf16 %v4563_v17, %v4562_v25  ;;  %v4548_v36 = vmul.f32 %v8395_v33, %v8916_v16  ;;  %v4549_v39 = vmul.f32 %v8395_v33, %v8917_v30  ;;  %v4675_v45 = vpack.c.bf16 %v4547_v13, %v4546_v54  ;;  %v8921_v17 = vld [vmem:[#allocation11_spill] sm:$0xff]  ;;  %v8923_v54 = vld [vmem:[#allocation29_spill] sm:$0xff] }
 0x4a1   : > { %5800 = vmatprep.subr.bf16.mxu1 %v4682_v21  ;;  %v4566_v1 = vmul.f32 %v8395_v33, %v8918_v14  ;;  %v4567_v20 = vmul.f32 %v8395_v33, %v8919_v63  ;;  %v4684_v51 = vpack.c.bf16 %v4565_v61, %v4564_v9  ;;  %v8920_v21 = vld [vmem:[#allocation10_spill] sm:$0xff]  ;;  %v4569_v13 = vmul.f32 %v8395_v33, %v8923_v54  ;;  %v8924_v14 = vld [vmem:[#allocation12_spill] sm:$0xff]  ;;  %v8925_v61 = vld [vmem:[#allocation13_spill] sm:$0xff] }
 0x4a2   : > { %5801 = vmatpush3.bf16.msra.mxu1 %v4674_v40  ;;  %v4550_v25 = vmul.f32 %v8395_v33, %v8920_v21  ;;  %v4551_v40 = vmul.f32 %v8395_v33, %v8921_v17  ;;  %v4676_v18 = vpack.c.bf16 %v4549_v39, %v4548_v36  ;;  %v4552_v9 = vmul.f32 %v8395_v33, %v8924_v14  ;;  %v8927_v36 = vld [vmem:[#allocation31_spill] sm:$0xff] }
 0x4a3   : > { %5802 = vmatprep.subr.bf16.mxu1 %v4683_v62  ;;  %v8922_v62 = vld [vmem:[#allocation28_spill] sm:$0xff]  ;;  %v4685_v30 = vpack.c.bf16 %v4567_v20, %v4566_v1  ;;  %v4571_v39 = vmul.f32 %v8395_v33, %v8927_v36  ;;  %v8929_v20 = vld [vmem:[#allocation15_spill] sm:$0xff] }
 0x4a4   : > { %v4568_v16 = vmul.f32 %v8395_v33, %v8922_v62  ;;  %v4677_v63 = vpack.c.bf16 %v4551_v40, %v4550_v25  ;;  %v8928_v62 = vld [vmem:[#allocation14_spill] sm:$0xff]  ;;  %v8931_v25 = vld [vmem:[#allocation33_spill] sm:$0xff] }
 0x4a5   : > { %v4554_v1 = vmul.f32 %v8395_v33, %v8928_v62  ;;  %v4573_v40 = vmul.f32 %v8395_v33, %v8931_v25 }
 0x4a6   : > { %5803 = vmatpush3.bf16.msra.mxu1 %v4675_v45  ;;  %v4553_v45 = vmul.f32 %v8395_v33, %v8925_v61  ;;  %v4686_v17 = vpack.c.bf16 %v4569_v13, %v4568_v16  ;;  %v8933_v13 = vld [vmem:[#allocation17_spill] sm:$0xff] }
 0x4a7   : > { %5804 = vmatprep.subr.bf16.mxu1 %v4684_v51  ;;  %v8926_v51 = vld [vmem:[#allocation30_spill] sm:$0xff] }
 0x4a8   : > { %v4570_v21 = vmul.f32 %v8395_v33, %v8926_v51  ;;  %v4678_v54 = vpack.c.bf16 %v4553_v45, %v4552_v9  ;;  %v8932_v51 = vld [vmem:[#allocation16_spill] sm:$0xff]  ;;  %v8935_v9 = vld [vmem:[#allocation35_spill] sm:$0xff] }
 0x4a9   : > { %v4556_v16 = vmul.f32 %v8395_v33, %v8932_v51  ;;  %v4575_v45 = vmul.f32 %v8395_v33, %v8935_v9  ;;  %v8939_v51 = vld [vmem:[#allocation45_spill] sm:$0xff] }
 0x4aa   : > { %5805 = vmatpush3.bf16.msra.mxu1 %v4676_v18  ;;  %v4555_v18 = vmul.f32 %v8395_v33, %v8929_v20  ;;  %v4687_v61 = vpack.c.bf16 %v4571_v39, %v4570_v21  ;;  %v4740_v21 = vcombine.high %v8306_v41, %v8306_v41  ;;  %v8936_v39 = vld [vmem:[#allocation18_spill] sm:$0xff] }
 0x4ab   : > { %5806 = vmatprep.subr.bf16.mxu1 %v4685_v30  ;;  %v8930_v30 = vld [vmem:[#allocation32_spill] sm:$0xff]  ;;  %v8940_v41 = vld [vmem:[#allocation22_spill] sm:$0xff] }
 0x4ac   : > { %v4572_v14 = vmul.f32 %v8395_v33, %v8930_v30  ;;  %v4679_v36 = vpack.c.bf16 %v4555_v18, %v4554_v1  ;;  %v8937_v30 = vld [vmem:[#allocation19_spill] sm:$0xff] }
 0x4ad   : > { %v4559_v25 = vmul.f32 %v8395_v33, %v8937_v30  ;;  %v8938_v1 = vld [vmem:[#allocation43_spill] sm:$0xff] }
 0x4ae   : > { %5807 = vmatpush3.bf16.msra.mxu1 %v4677_v63  ;;  %v4557_v63 = vmul.f32 %v8395_v33, %v8933_v13  ;;  %v4688_v20 = vpack.c.bf16 %v4573_v40, %v4572_v14  ;;  %v4592_v18 = vmul.f32 %v8395_v33, %v8938_v1  ;;  %v4593_v13 = vmul.f32 %v8395_v33, %v8939_v51 }
 0x4af   : > { %5808 = vmatprep.subr.bf16.mxu1 %v4686_v17  ;;  %v8934_v17 = vld [vmem:[#allocation34_spill] sm:$0xff]  ;;  %v8468_v14 = vrot.slane %v4740_v21, %v8297_v27  ;;  %v4576_v40 = vmul.f32 %v8395_v33, %v8940_v41  ;;  %v8947_v41 = vld [vmem:[#allocation60_spill] sm:$0xff] }
 0x4b0   : > { %v4574_v62 = vmul.f32 %v8395_v33, %v8934_v17  ;;  %v4698_v1 = vpack.c.bf16 %v4593_v13, %v4592_v18  ;;  %v8948_v13 = vld [vmem:[#allocation38_spill] sm:$0xff] }
 0x4b2   : > { %5809 = vmatpush3.bf16.msra.mxu1 %v4678_v54  ;;  %v4558_v54 = vmul.f32 %v8395_v33, %v8936_v39  ;;  %v4689_v17 = vpack.c.bf16 %v4575_v45, %v4574_v62  ;;  %v8943_v39 = vld [vmem:[#allocation57_spill] sm:$0xff]  ;;  %v4756_v62 = vcombine.high %v8468_v14, %v8468_v14  ;;  %v8944_v45 = vld [vmem:[#allocation36_spill] sm:$0xff] }
 0x4b3   : > { %5810 = vmatprep.subr.bf16.mxu1 %v4687_v61  ;;  %v4680_v61 = vpack.c.bf16 %v4557_v63, %v4556_v16  ;;  %v8942_v16 = vld [vmem:[#allocation54_spill] sm:$0xff]  ;;  %v4595_v30 = vmul.f32 %v8395_v33, %v8943_v39  ;;  %v4578_v21 = vmul.f32 %v8395_v33, %v8944_v45  ;;  %v8951_v45 = vld [vmem:[#allocation63_spill] sm:$0xff] }
 0x4b4   : > { %v4594_v63 = vmul.f32 %v8395_v33, %v8942_v16  ;;  %v8949_v16 = vld [vmem:[#allocation39_spill] sm:$0xff] }
 0x4b5   : > { %v4581_v39 = vmul.f32 %v8395_v33, %v8949_v16  ;;  %v8956_v16 = vld [vmem:[#allocation42_spill] sm:$0xff] }
 0x4b6   : > { %5811 = vmatpush3.bf16.msra.mxu1 %v4679_v36  ;;  %v8941_v36 = vld [vmem:[#allocation24_spill] sm:$0xff]  ;;  %v4699_v18 = vpack.c.bf16 %v4595_v30, %v4594_v63  ;;  %v8953_v30 = vld [vmem:[#allocation41_spill] sm:$0xff] }
 0x4b7   : > { %5812 = vmatprep.subr.bf16.mxu1 %v4688_v20  ;;  %v4577_v9 = vmul.f32 %v8395_v33, %v8941_v36  ;;  %v4681_v20 = vpack.c.bf16 %v4559_v25, %v4558_v54  ;;  %v8946_v54 = vld [vmem:[#allocation58_spill] sm:$0xff]  ;;  %v4597_v36 = vmul.f32 %v8395_v33, %v8947_v41  ;;  %v8954_v41 = vld [vmem:[#allocation64_spill] sm:$0xff] }
 0x4b8   : > { %v4596_v25 = vmul.f32 %v8395_v33, %v8946_v54 }
 0x4ba   : > { %5813 = vmatpush3.bf16.msra.mxu1 %v4680_v61  ;;  %v8945_v61 = vld [vmem:[#allocation37_spill] sm:$0xff]  ;;  %v4700_v54 = vpack.c.bf16 %v4597_v36, %v4596_v25  ;;  %v4584_v25 = vmul.f32 %v8395_v33, %v8956_v16  ;;  %v8957_v36 = vld [vmem:[#allocation44_spill] sm:$0xff] }
 0x4bb   : > { %5814 = vmatprep.subr.bf16.mxu1 %v4689_v17  ;;  %v4579_v51 = vmul.f32 %v8395_v33, %v8945_v61  ;;  %v4690_v17 = vpack.c.bf16 %v4577_v9, %v4576_v40  ;;  %v8950_v40 = vld [vmem:[#allocation62_spill] sm:$0xff]  ;;  %v4599_v61 = vmul.f32 %v8395_v33, %v8951_v45  ;;  %v8958_v45 = vld [vmem:[#allocation67_spill] sm:$0xff] }
 0x4bc   : > { %v4598_v9 = vmul.f32 %v8395_v33, %v8950_v40 }
 0x4be   : > { %5815 = vmatpush3.bf16.msra.mxu1 %v4681_v20  ;;  %v4580_v20 = vmul.f32 %v8395_v33, %v8948_v13  ;;  %v4701_v13 = vpack.c.bf16 %v4599_v61, %v4598_v9  ;;  %v8961_v61 = vld [vmem:[#allocation47_spill] sm:$0xff] }
 0x4bf   : > { %5822 = vmatprep.subr.bf16.mxu1 %v4698_v1  ;;  %v4691_v1 = vpack.c.bf16 %v4579_v51, %v4578_v21  ;;  %v8955_v21 = vld [vmem:[#allocation66_spill] sm:$0xff] }
 0x4c0   : > { %v4601_v51 = vmul.f32 %v8395_v33, %v8955_v21  ;;  %v8962_v21 = vld [vmem:[#allocation71_spill] sm:$0xff] }
 0x4c1   : > { %4815 = vmatmul.mubr.bf16.vlgmr.msra.gmra.mrb[228].mxu1 %v8313_v52  ;;  %v8952_v52 = vld [vmem:[#allocation40_spill] sm:$0xff] }
 0x4c2   : > { %5823 = vmatpush3.bf16.msra.mxu1 %v4690_v17  ;;  %4854 = vmatprep.mubr.bf16.mxu1 %v4756_v62  ;;  %v4582_v63 = vmul.f32 %v8395_v33, %v8952_v52  ;;  %v4583_v62 = vmul.f32 %v8395_v33, %v8953_v30  ;;  %v4692_v17 = vpack.c.bf16 %v4581_v39, %v4580_v20  ;;  %v8959_v20 = vld [vmem:[#allocation70_spill] sm:$0xff] }
 0x4c3   : > { %5824 = vmatprep.subr.bf16.mxu1 %v4699_v18  ;;  %v4600_v18 = vmul.f32 %v8395_v33, %v8954_v41  ;;  %v4603_v39 = vmul.f32 %v8395_v33, %v8959_v20  ;;  %v8960_v30 = vld [vmem:[#allocation46_spill] sm:$0xff]  ;;  %v8966_v20 = vld [vmem:[#allocation75_spill] sm:$0xff] }
 0x4c4   : > { %v4693_v40 = vpack.c.bf16 %v4583_v62, %v4582_v63  ;;  %v4586_v9 = vmul.f32 %v8395_v33, %v8960_v30  ;;  %v8963_v63 = vld [vmem:[#allocation73_spill] sm:$0xff] }
 0x4c5   : > { %v4702_v52 = vpack.c.bf16 %v4601_v51, %v4600_v18  ;;  %v4605_v62 = vmul.f32 %v8395_v33, %v8963_v63  ;;  %v8965_v51 = vld [vmem:[#allocation49_spill] sm:$0xff] }
 0x4c6   : > { %5825 = vmatpush3.bf16.msra.mxu1 %v4691_v1  ;;  %v4585_v1 = vmul.f32 %v8395_v33, %v8957_v36  ;;  %v8964_v36 = vld [vmem:[#allocation48_spill] sm:$0xff] }
 0x4c7   : > { %5826 = vmatprep.subr.bf16.mxu1 %v4700_v54  ;;  %v4602_v54 = vmul.f32 %v8395_v33, %v8958_v45  ;;  %v4588_v18 = vmul.f32 %v8395_v33, %v8964_v36 }
 0x4c8   : > { %v4694_v41 = vpack.c.bf16 %v4585_v1, %v4584_v25  ;;  %v8967_v25 = vld [vmem:[#allocation76_spill] sm:$0xff] }
 0x4c9   : > { %v4703_v16 = vpack.c.bf16 %v4603_v39, %v4602_v54  ;;  %v4607_v1 = vmul.f32 %v8395_v33, %v8967_v25  ;;  %v8532_v54 = vld [vmem:[%s8698_s3 + $0x8] sm:$0xff]  ;;  %v8968_v39 = vld [vmem:[#allocation50_spill] sm:$0xff] }
 0x4ca   : > { %5827 = vmatpush3.bf16.msra.mxu1 %v4692_v17  ;;  %v4587_v17 = vmul.f32 %v8395_v33, %v8961_v61  ;;  %v4590_v61 = vmul.f32 %v8395_v33, %v8968_v39 }
 0x4cb   : > { %5828 = vmatprep.subr.bf16.mxu1 %v4701_v13  ;;  %v4604_v13 = vmul.f32 %v8395_v33, %v8962_v21  ;;  %v4624_v21 = vmul.f32 %v8395_v33, %v8047_v35  ;;  %v4626_v35 = vmul.f32 %v8395_v33, %v8071_v55  ;;  %v4629_v55 = vmul.f32 %v8395_v33, %v8114_v5 }
 0x4cc   : > { %v4695_v45 = vpack.c.bf16 %v4587_v17, %v4586_v9 }
 0x4cd   : > { %v4704_v30 = vpack.c.bf16 %v4605_v62, %v4604_v13  ;;  %v4625_v13 = vmul.f32 %v8395_v33, %v8049_v46  ;;  %v8544_v62 = vrot.slane %v8532_v54, %v8297_v27  ;;  %v4627_v46 = vmul.f32 %v8395_v33, %v8084_v28 }
 0x4ce   : > { %5829 = vmatpush3.bf16.msra.mxu1 %v4693_v40  ;;  %v4589_v40 = vmul.f32 %v8395_v33, %v8965_v51  ;;  %v8971_v51 = vld [vmem:[#allocation80_spill] sm:$0xff] }
 0x4cf   : > { %5830 = vmatprep.subr.bf16.mxu1 %v4702_v52  ;;  %v4606_v52 = vmul.f32 %v8395_v33, %v8966_v20  ;;  %v4772_v20 = vcombine.high %v8544_v62, %v8544_v62  ;;  %v4715_v28 = vpack.c.bf16 %v4627_v46, %v4626_v35  ;;  %v4633_v35 = vmul.f32 %v8395_v33, %v8122_v4  ;;  %v8978_v46 = vld [vmem:[#allocation89_spill] sm:$0xff]  ;;  %v8979_v4 = vld [vmem:[#allocation92_spill] sm:$0xff] }
 0x4d0   : > { %v4696_v17 = vpack.c.bf16 %v4589_v40, %v4588_v18  ;;  %v4714_v40 = vpack.c.bf16 %v4625_v13, %v4624_v21 }
 0x4d1   : > { %v4705_v63 = vpack.c.bf16 %v4607_v1, %v4606_v52  ;;  %v8972_v52 = vld [vmem:[#allocation81_spill] sm:$0xff]  ;;  %v8973_v1 = vld [vmem:[#allocation84_spill] sm:$0xff] }
 0x4d2   : > { %5831 = vmatpush3.bf16.msra.mxu1 %v4694_v41  ;;  %v8969_v41 = vld [vmem:[#allocation51_spill] sm:$0xff]  ;;  %v4610_v25 = vmul.f32 %v8395_v33, %v8972_v52  ;;  %v4634_v52 = vmul.f32 %v8395_v33, %v8124_v48 }
 0x4d3   : > { %5832 = vmatprep.subr.bf16.mxu1 %v4703_v16  ;;  %v4591_v9 = vmul.f32 %v8395_v33, %v8969_v41  ;;  %v8970_v16 = vld [vmem:[#allocation78_spill] sm:$0xff]  ;;  %v8974_v41 = vld [vmem:[#allocation85_spill] sm:$0xff] }
 0x4d4   : > { %v4608_v36 = vmul.f32 %v8395_v33, %v8970_v16 }
 0x4d5   : > { %v4697_v18 = vpack.c.bf16 %v4591_v9, %v4590_v61  ;;  %v4628_v61 = vmul.f32 %v8395_v33, %v8103_v56  ;;  %v4612_v9 = vmul.f32 %v8395_v33, %v8974_v41  ;;  %v4631_v56 = vmul.f32 %v8395_v33, %v8118_v6 }
 0x4d6   : > { %5833 = vmatpush3.bf16.msra.mxu1 %v4695_v45  ;;  %v4609_v45 = vmul.f32 %v8395_v33, %v8971_v51  ;;  %v4616_v6 = vmul.f32 %v8395_v33, %v8031_v60 }
 0x4d7   : > { %5834 = vmatprep.subr.bf16.mxu1 %v4704_v30  ;;  %v4611_v30 = vmul.f32 %v8395_v33, %v8973_v1  ;;  %v4716_v5 = vpack.c.bf16 %v4629_v55, %v4628_v61  ;;  %v4618_v1 = vmul.f32 %v8395_v33, %v8979_v4  ;;  %v8981_v61 = vld [vmem:[#allocation96_spill] sm:$0xff]  ;;  %v4647_v4 = vmul.f32 %v8395_v33, %v8223_v42 }
 0x4d8   : > { %v4706_v39 = vpack.c.bf16 %v4609_v45, %v4608_v36  ;;  %v8977_v36 = vld [vmem:[#allocation88_spill] sm:$0xff]  ;;  %v4636_v55 = vmul.f32 %v8395_v33, %v8981_v61  ;;  %v4666_v42 = vmul.f32 %v8395_v33, %v8357_v24 }
 0x4d9   : > { %v4707_v13 = vpack.c.bf16 %v4611_v30, %v4610_v25  ;;  %v4615_v51 = vmul.f32 %v8395_v33, %v8977_v36  ;;  %v4635_v25 = vmul.f32 %v8395_v33, %v8140_v29  ;;  %v8980_v30 = vld [vmem:[#allocation93_spill] sm:$0xff]  ;;  %v8983_v29 = vld [vmem:[#allocation94_spill] sm:$0xff] }
 0x4da   : > { %5835 = vmatpush3.bf16.msra.mxu1 %v4696_v17  ;;  %v8975_v17 = vld [vmem:[#allocation86_spill] sm:$0xff] }
 0x4db   : > { %5836 = vmatprep.subr.bf16.mxu1 %v4705_v63  ;;  %v4613_v21 = vmul.f32 %v8395_v33, %v8975_v17  ;;  %v4630_v63 = vmul.f32 %v8395_v33, %v8116_v8  ;;  %v4719_v48 = vpack.c.bf16 %v4635_v25, %v4634_v52  ;;  %v8984_v17 = vld [vmem:[#allocation95_spill] sm:$0xff]  ;;  %v4660_v52 = vmul.f32 %v8395_v33, %v8315_v43 }
 0x4dc   : > { %v4644_v25 = vmul.f32 %v8395_v33, %v8191_v31  ;;  %v4663_v43 = vmul.f32 %v8395_v33, %v8339_v58  ;;  %v4648_v58 = vmul.f32 %v8395_v33, %v8236_v57 }
 0x4dd   : > { %v4708_v45 = vpack.c.bf16 %v4613_v21, %v4612_v9  ;;  %v4717_v8 = vpack.c.bf16 %v4631_v56, %v4630_v63  ;;  %v4620_v9 = vmul.f32 %v8395_v33, %v8983_v29  ;;  %v4621_v21 = vmul.f32 %v8395_v33, %v8984_v17 }
 0x4de   : > { %5837 = vmatpush3.bf16.msra.mxu1 %v4697_v18  ;;  %v4632_v18 = vmul.f32 %v8395_v33, %v8120_v32  ;;  %v4638_v63 = vmul.f32 %v8395_v33, %v8170_v2  ;;  %v4639_v56 = vmul.f32 %v8395_v33, %v8172_v23  ;;  %v4657_v2 = vmul.f32 %v8395_v33, %v8289_v11 }
 0x4df   : > { %5844 = vmatprep.subr.bf16.mxu1 %v4714_v40  ;;  %v4617_v40 = vmul.f32 %v8395_v33, %v8978_v46 }
 0x4e0   : > { %v4718_v32 = vpack.c.bf16 %v4633_v35, %v4632_v18  ;;  %v4712_v18 = vpack.c.bf16 %v4621_v21, %v4620_v9  ;;  %v4656_v35 = vmul.f32 %v8395_v33, %v8277_v12  ;;  %v4721_v23 = vpack.c.bf16 %v4639_v56, %v4638_v63  ;;  %v8991_v9 = vld [vmem:[#allocation100_spill] sm:$0xff] }
 0x4e1   : > { %4855 = vmatmul.mubr.bf16.vlgmr.msra.gmra.mrb[232].mxu1 %v8468_v14  ;;  %v8976_v14 = vld [vmem:[#allocation87_spill] sm:$0xff]  ;;  %v4710_v60 = vpack.c.bf16 %v4617_v40, %v4616_v6  ;;  %v4641_v6 = vmul.f32 %v8395_v33, %v8185_v34  ;;  %v4658_v40 = vmul.f32 %v8395_v33, %v8292_v3  ;;  %v4659_v12 = vmul.f32 %v8395_v33, %v8301_v44 }
 0x4e2   : > { %5845 = vmatpush3.bf16.msra.mxu1 %v4706_v39  ;;  %4894 = vmatprep.mubr.bf16.mxu1 %v4772_v20  ;;  %v4614_v16 = vmul.f32 %v8395_v33, %v8976_v14  ;;  %v4619_v39 = vmul.f32 %v8395_v33, %v8980_v30  ;;  %v4757_v14 = vcombine.high %v8532_v54, %v8532_v54 }
 0x4e3   : > { %5846 = vmatprep.subr.bf16.mxu1 %v4715_v28  ;;  %v8982_v28 = vld [vmem:[#allocation97_spill] sm:$0xff]  ;;  %v4640_v54 = vmul.f32 %v8395_v33, %v8183_v10  ;;  %v4730_v11 = vpack.c.bf16 %v4657_v2, %v4656_v35  ;;  %v4643_v10 = vmul.f32 %v8395_v33, %v8189_v37  ;;  %v4661_v3 = vmul.f32 %v8395_v33, %v8323_v22 }
 0x4e4   : > { %v4709_v20 = vpack.c.bf16 %v4615_v51, %v4614_v16  ;;  %v4637_v41 = vmul.f32 %v8395_v33, %v8982_v28  ;;  %v8985_v16 = vld [vmem:[#allocation90_spill] sm:$0xff]  ;;  %v8986_v51 = vld [vmem:[#allocation91_spill] sm:$0xff]  ;;  %v4731_v44 = vpack.c.bf16 %v4659_v12, %v4658_v40  ;;  %v4649_v30 = vmul.f32 %v8395_v33, %v8238_v26 }
 0x4e5   : > { %v4622_v36 = vmul.f32 %v8395_v33, %v8985_v16  ;;  %v4722_v34 = vpack.c.bf16 %v4641_v6, %v4640_v54  ;;  %v4732_v22 = vpack.c.bf16 %v4661_v3, %v4660_v52  ;;  %v4668_v26 = vmul.f32 %v8395_v33, %v8373_v49 }
 0x4e6   : > { %5847 = vmatpush3.bf16.msra.mxu1 %v4707_v13  ;;  %v4711_v13 = vpack.c.bf16 %v4619_v39, %v4618_v1  ;;  %v4665_v1 = vmul.f32 %v8395_v33, %v8349_v59  ;;  %v8987_v39 = vld [vmem:[#allocation55_spill] sm:$0xff]  ;;  %v8988_v59 = vld [vmem:[#allocation98_spill] sm:$0xff]  ;;  %v4726_v57 = vpack.c.bf16 %v4649_v30, %v4648_v58  ;;  %v4653_v17 = vmul.f32 %v8395_v33, %v8991_v9 }
 0x4e7   : > { %5848 = vmatprep.subr.bf16.mxu1 %v4716_v5  ;;  %v4720_v5 = vpack.c.bf16 %v4637_v41, %v4636_v55  ;;  %v4650_v61 = vmul.f32 %v8395_v33, %v8988_v59  ;;  %v8989_v55 = vld [vmem:[#allocation99_spill] sm:$0xff]  ;;  %v4669_v41 = vmul.f32 %v8395_v33, %v8378_v19  ;;  %v4670_v63 = vmul.f32 %v8395_v33, %v8381_v47  ;;  %v8992_v19 = vld [vmem:[#allocation101_spill] sm:$0xff] }
 0x4e8   : > { %v4651_v28 = vmul.f32 %v8395_v33, %v8989_v55  ;;  %v4654_v56 = vmul.f32 %v8395_v33, %v8992_v19 }
 0x4e9   : > { %v4736_v49 = vpack.c.bf16 %v4669_v41, %v4668_v26 }
 0x4ea   : > { %5849 = vmatpush3.bf16.msra.mxu1 %v4708_v45  ;;  %v4623_v45 = vmul.f32 %v8395_v33, %v8986_v51  ;;  %v4727_v21 = vpack.c.bf16 %v4651_v28, %v4650_v61 }
 0x4eb   : > { %5850 = vmatprep.subr.bf16.mxu1 %v4717_v8  ;;  %v8616_v8 = vrot.slane %v4757_v14, %v8297_v27 }
 0x4ec   : > { %v4713_v46 = vpack.c.bf16 %v4623_v45, %v4622_v36 }
 0x4ed   : > { %v4773_v27 = vcombine.high %v8616_v8, %v8616_v8 }
 0x4ee   : > { %5851 = vmatpush3.bf16.msra.mxu1 %v4709_v20  ;;  %v4642_v20 = vmul.f32 %v8395_v33, %v8187_v50  ;;  %v4645_v50 = vmul.f32 %v8395_v33, %v8193_v15  ;;  %v4664_v15 = vmul.f32 %v8395_v33, %v8347_v53 }
 0x4ef   : > { %5852 = vmatprep.subr.bf16.mxu1 %v4718_v32  ;;  %v4662_v32 = vmul.f32 %v8395_v33, %v8328_v0 }
 0x4f0   : > { %v4723_v37 = vpack.c.bf16 %v4643_v10, %v4642_v20  ;;  %v4724_v31 = vpack.c.bf16 %v4645_v50, %v4644_v25  ;;  %v4734_v53 = vpack.c.bf16 %v4665_v1, %v4664_v15 }
 0x4f1   : > { %v4733_v0 = vpack.c.bf16 %v4663_v43, %v4662_v32 }
 0x4f2   : > { %5853 = vmatpush3.bf16.msra.mxu1 %v4710_v60  ;;  %v4667_v60 = vmul.f32 %v8395_v33, %v8987_v39 }
 0x4f3   : > { %5854 = vmatprep.subr.bf16.mxu1 %v4719_v48  ;;  %v8990_v48 = vld [vmem:[#allocation52_spill] sm:$0xff] }
 0x4f4   : > { %v4735_v24 = vpack.c.bf16 %v4667_v60, %v4666_v42  ;;  %v4652_v29 = vmul.f32 %v8395_v33, %v8990_v48 }
 0x4f6   : > { %5855 = vmatpush3.bf16.msra.mxu1 %v4711_v13  ;;  %v4671_v13 = vmul.f32 %v8395_v33, %v8389_v7  ;;  %v4728_v16 = vpack.c.bf16 %v4653_v17, %v4652_v29 }
 0x4f7   : > { %5856 = vmatprep.subr.bf16.mxu1 %v4720_v5  ;;  %v8993_v5 = vld [vmem:[#allocation53_spill] sm:$0xff] }
 0x4f8   : > { %v4655_v14 = vmul.f32 %v8395_v33, %v8993_v5  ;;  %v4737_v36 = vpack.c.bf16 %v4671_v13, %v4670_v63 }
 0x4fa   : > { %5857 = vmatpush3.bf16.msra.mxu1 %v4712_v18  ;;  %v4729_v51 = vpack.c.bf16 %v4655_v14, %v4654_v56 }
 0x4fb   : > { %5858 = vmatprep.subr.bf16.mxu1 %v4721_v23 }
 0x4fe   : > { %5859 = vmatpush3.bf16.msra.mxu1 %v4713_v46 }
 0x4ff   : > { %5866 = vmatprep.subr.bf16.mxu1 %v4730_v11 }
 0x501   : > { %4895 = vmatmul.mubr.bf16.vlgmr.msra.gmra.mrb[236].mxu1 %v8544_v62  ;;  %v4646_v62 = vmul.f32 %v8395_v33, %v8210_v38 }
 0x502   : > { %5867 = vmatpush3.bf16.msra.mxu1 %v4722_v34  ;;  %4934 = vmatprep.mubr.bf16.mxu1 %v4773_v27 }
 0x503   : > { %5868 = vmatprep.subr.bf16.mxu1 %v4731_v44  ;;  %v4725_v38 = vpack.c.bf16 %v4647_v4, %v4646_v62 }
 0x506   : > { %5869 = vmatpush3.bf16.msra.mxu1 %v4723_v37 }
 0x507   : > { %5870 = vmatprep.subr.bf16.mxu1 %v4732_v22 }
 0x50a   : > { %5871 = vmatpush3.bf16.msra.mxu1 %v4724_v31 }
 0x50b   : > { %5872 = vmatprep.subr.bf16.mxu1 %v4733_v0 }
 0x50e   : > { %5873 = vmatpush3.bf16.msra.mxu1 %v4725_v38 }
 0x50f   : > { %5874 = vmatprep.subr.bf16.mxu1 %v4734_v53 }
 0x512   : > { %5875 = vmatpush3.bf16.msra.mxu1 %v4726_v57 }
 0x513   : > { %5876 = vmatprep.subr.bf16.mxu1 %v4735_v24 }
 0x516   : > { %5877 = vmatpush3.bf16.msra.mxu1 %v4727_v21 }
 0x517   : > { %5878 = vmatprep.subr.bf16.mxu1 %v4736_v49 }
 0x51a   : > { %5879 = vmatpush3.bf16.msra.mxu1 %v4728_v16 }
 0x51b   : > { %5880 = vmatprep.subr.bf16.mxu1 %v4737_v36 }
 0x51e   : > { %5881 = vmatpush3.bf16.msra.mxu1 %v4729_v51 }
 0x521   : > { %4935 = vmatmul.mubr.bf16.vlgmr.msra.gmra.mrb[240].mxu1 %v8616_v8 }
 0x594   : > { %v5816_v7 = vpop.f32.mrb[228].mxu1 }
 0x595   : > { %v5817_v45 = vpop.f32.mrb[229].mxu1 }
 0x596   : > { %v5818_v47 = vadd.f32 %v5817_v45, %v5816_v7  ;;  %v5819_v18 = vpop.f32.mrb[230].mxu1 }
 0x597   : > { %v5820_v35 = vpop.f32.mrb[231].mxu1 }
 0x5b4   : > { %v5838_v2 = vpop.f32.mrb[232].mxu1 }
 0x5b5   : > { %v5839_v23 = vpop.f32.mrb[233].mxu1 }
 0x5b6   : > { %v5840_v54 = vadd.f32 %v5839_v23, %v5838_v2  ;;  %v5841_v6 = vpop.f32.mrb[234].mxu1 }
 0x5b7   : > { %v5842_v46 = vpop.f32.mrb[235].mxu1 }
 0x5b8   : > { %v4857_v33 = vadd.f32 %v5840_v54, %v5818_v47 }
 0x5d4   : > { %v5860_v40 = vpop.f32.mrb[236].mxu1 }
 0x5d5   : > { %v5861_v12 = vpop.f32.mrb[237].mxu1 }
 0x5d6   : > { %v5862_v11 = vadd.f32 %v5861_v12, %v5860_v40  ;;  %v5863_v27 = vpop.f32.mrb[238].mxu1 }
 0x5d7   : > { %v5864_v20 = vpop.f32.mrb[239].mxu1 }
 0x5d8   : > { %v4897_v10 = vadd.f32 %v5862_v11, %v4857_v33 }
 0x5f4   : > { %v5882_v34 = vpop.f32.mrb[240].mxu1 }
 0x5f5   : > { %v5883_v8 = vpop.f32.mrb[241].mxu1 }
 0x5f6   : > { %v5884_v52 = vadd.f32 %v5883_v8, %v5882_v34  ;;  %v5885_v3 = vpop.f32.mrb[242].mxu1 }
 0x5f7   : > { %v5886_v44 = vpop.f32.mrb[243].mxu1 }
 0x5f8   : > { %v4937_v25 = vadd.f32 %v5884_v52, %v4897_v10 }
 0x5fa   : > { %4943 = vst.msk [vmem:[%s226_s11] sm:$0xf] %vm4942_vm1, %v4937_v25 }
 0x5fb PF: > { %s14_s17 = sadd.s32 1, %s6356_s17   ;;  %s8994_s15 = smov %s6352_s16 }
 0x5fc   : > { %p11_p5 = scmp.ge.s32.totalorder %s14_s17, 4   ;;  %s8995_s16 = smov %s8997_s18 }
 0x5fe   :  { %13 = sbr.rel (!%p11_p5) target bundleno = 2 (0x2), region = 66 }

</bundles_post_ra>
